<compile_context>
chip_gen: v5e
topology: v5e:2x2
jax: 0.10.0
libtpu: 0.0.40
codegen_flags: <defaults>
</compile_context>

<pallas_src>
import jax
import jax.numpy as jnp
from jax.experimental import pallas as pl
from jax.experimental.pallas import tpu as pltpu

# ----- small, module-consistent hyper-parameters -----
STATE_DIM = 16
ACTION_DIM = 5
HIDDEN_DIM = 32
LOOKBACK_DIM = 8
NUM_LAYERS = 3
MAX_ACTION = 1.0
BATCH = 2

INPUT_SIZE = ACTION_DIM - 1           # LSTM input feature size       = 4
LSTM_H = STATE_DIM // 2               # LSTM hidden per direction     = 8
SEQ = LOOKBACK_DIM                    # time steps after reshape      = 8
MLP_IN = STATE_DIM * LOOKBACK_DIM     # = SEQ * 2 * LSTM_H            = 128

# Packed gate-column layout (width LSTM_H each), interleaved across directions:
#   [ i_f, i_r, f_f, f_r, o_f, o_r, g_f, g_r ]   -> 8*H = 64 columns
# so sigmoid covers cols [0, 6H) and tanh covers [6H, 8H), and each gate slice
# is already in the [fwd | rev] order of h_cat / c_cat.
_PACKED_GATE_SRC = (0, 1, 3, 2)   # packed slot -> PyTorch gate index (i, f, g, o)


def actor_kernel(x_ref,
                 wp0_ref, whh0_ref, bl0_ref,
                 wp1_ref, whh1_ref, bl1_ref,
                 wp2_ref, whh2_ref, bl2_ref,
                 w1t_ref, b1m_ref, w2t_ref, b2m_ref, w3t_ref, b3m_ref,
                 out_ref,
                 ab1_ref, ab2_ref, feat_ref):
    f32 = jnp.float32
    B, T, H = BATCH, SEQ, LSTM_H
    H2 = 2 * H

    def run_layer(xin, wp_ref, whh_ref, b_ref, write_hidden):
        # Hoisted input projection for ALL timesteps + folded biases:
        # row block s of p_all holds the input contribution of the fwd cell at
        # time s and the rev cell at time T-1-s (packing done host side).
        p_all = (jnp.dot(xin, wp_ref[...], preferred_element_type=f32)
                 + b_ref[...])                                   # (T*B, 8H)
        whh = whh_ref[...]                                       # (2H, 8H) block-struct
        h_cat = jnp.zeros((B, H2), f32)                          # [h_fwd | h_rev]
        c_cat = jnp.zeros((B, H2), f32)
        for s in range(T):
            g = (jnp.dot(h_cat, whh, preferred_element_type=f32)
                 + p_all[s * B:(s + 1) * B, :])                  # (B, 8H)
            sig = jax.nn.sigmoid(g[:, :6 * H])                   # i, f, o for both dirs
            i_cat = sig[:, 0:H2]
            f_cat = sig[:, H2:2 * H2]
            o_cat = sig[:, 2 * H2:3 * H2]
            g_cat = jnp.tanh(g[:, 6 * H:])                       # g for both dirs
            c_cat = f_cat * c_cat + i_cat * g_cat
            h_cat = o_cat * jnp.tanh(c_cat)
            write_hidden(s, h_cat)

    def write_ab(ab_ref):
        # AB row block t, cols 0:2H  = h_cat from step t      = [hf(t)    | hr(T-1-t)]
        #              ,  cols 2H:4H = h_cat from step T-1-t  = [hf(T-1-t)| hr(t)]
        def w(s, h_cat):
            ab_ref[s * B:(s + 1) * B, 0:H2] = h_cat
            ab_ref[(T - 1 - s) * B:(T - s) * B, H2:2 * H2] = h_cat
        return w

    def write_feat(s, h_cat):
        # feat[:, t*2H : t*2H+2H] = [hf(t) | hr(t)]  (PyTorch flatten order)
        feat_ref[:, s * H2:s * H2 + H] = h_cat[:, 0:H]
        feat_ref[:, (T - 1 - s) * H2 + H:(T - 1 - s) * H2 + H2] = h_cat[:, H:H2]

    # TODO(synk): dropout (LSTM inter-layer and MLP) is train-time stochastic;
    # implemented as identity (inference mode).
    run_layer(x_ref[...].astype(f32), wp0_ref, whh0_ref, bl0_ref, write_ab(ab1_ref))
    run_layer(ab1_ref[...], wp1_ref, whh1_ref, bl1_ref, write_ab(ab2_ref))
    run_layer(ab2_ref[...], wp2_ref, whh2_ref, bl2_ref, write_feat)

    feat = feat_ref[...]                                         # (B, 128) lane-dense
    h1 = jnp.maximum(
        jnp.dot(feat, w1t_ref[...], preferred_element_type=f32) + b1m_ref[...], 0.0)
    h2 = jnp.maximum(
        jnp.dot(h1, w2t_ref[...], preferred_element_type=f32) + b2m_ref[...], 0.0)
    logits = jnp.dot(h2, w3t_ref[...], preferred_element_type=f32) + b3m_ref[...]

    # Softmax over dim=1 (actions), then scale by max_action.
    m = jnp.max(logits, axis=1, keepdims=True)
    e = jnp.exp(logits - m)
    denom = jnp.sum(e, axis=1, keepdims=True)
    r = pl.reciprocal(denom, approx=True)
    r = r * (2.0 - denom * r)            # one Newton step -> ~f32-accurate reciprocal
    out_ref[...] = (e * r * MAX_ACTION).astype(out_ref.dtype)


def actor_forward(state, kernel_params):
    # Host-side glue: reshape exactly like
    #   state.reshape(B, -1, action_dim-1)
    # then lay the sequence out time-major, packing the time-reversed copy
    # alongside so layer 0's hoisted projection is a single matmul.
    x = state.reshape(BATCH, SEQ, INPUT_SIZE).astype(jnp.float32)
    x_tm = jnp.transpose(x, (1, 0, 2)).reshape(SEQ * BATCH, INPUT_SIZE)
    x_rev_tm = jnp.transpose(jnp.flip(x, axis=1), (1, 0, 2)).reshape(SEQ * BATCH,
                                                                     INPUT_SIZE)
    x_cat = jnp.concatenate([x_tm, x_rev_tm], axis=1)            # (T*B, 2*Din) = (16, 8)

    inputs = (x_cat,) + tuple(kernel_params)
    return pl.pallas_call(
        actor_kernel,
        out_shape=jax.ShapeDtypeStruct((BATCH, ACTION_DIM), jnp.float32),
        in_specs=[pl.BlockSpec(memory_space=pltpu.MemorySpace.VMEM)] * len(inputs),
        out_specs=pl.BlockSpec(memory_space=pltpu.MemorySpace.VMEM),
        scratch_shapes=[
            pltpu.VMEM((SEQ * BATCH, 4 * LSTM_H), jnp.float32),  # layer-1 input buffer
            pltpu.VMEM((SEQ * BATCH, 4 * LSTM_H), jnp.float32),  # layer-2 input buffer
            pltpu.VMEM((BATCH, MLP_IN), jnp.float32),            # lane-dense MLP input
        ],
    )(*inputs)


# ---------------------------------------------------------------------------
# Parameter construction (PyTorch-default-style, PyTorch layout) + packing
# ---------------------------------------------------------------------------
def init_raw_params(key):
    keys = iter(jax.random.split(key, 64))

    def u(shape, k):
        return jax.random.uniform(next(keys), shape, jnp.float32, -k, k)

    k_lstm = 1.0 / (LSTM_H ** 0.5)
    in_sizes = [INPUT_SIZE] + [2 * LSTM_H] * (NUM_LAYERS - 1)
    lstm = []
    for din in in_sizes:
        dirs = []
        for _ in range(2):                       # 0 = forward, 1 = reverse
            dirs.append(dict(
                w_ih=u((4 * LSTM_H, din), k_lstm),      # PyTorch (4H, Din), gates i,f,g,o
                w_hh=u((4 * LSTM_H, LSTM_H), k_lstm),   # PyTorch (4H, H)
                b_ih=u((4 * LSTM_H,), k_lstm),
                b_hh=u((4 * LSTM_H,), k_lstm)))
        lstm.append(dirs)

    def linear(din, dout):
        k = 1.0 / (din ** 0.5)
        return u((dout, din), k), u((dout,), k)

    mlp = [linear(MLP_IN, HIDDEN_DIM),
           linear(HIDDEN_DIM, HIDDEN_DIM),
           linear(HIDDEN_DIM, ACTION_DIM)]
    return lstm, mlp


def pack_params(raw):
    """Pack PyTorch-layout params into the fused layouts the kernel expects."""
    lstm, mlp = raw
    H = LSTM_H
    G8 = 8 * H
    packed = []

    def gate_cols(qp, d):                       # packed gate slot qp, direction d
        base = qp * 2 * H + d * H
        return base, base + H

    for layer_idx, dirs in enumerate(lstm):
        din = dirs[0]['w_ih'].shape[1]
        whh = jnp.zeros((2 * H, G8), jnp.float32)     # block-structured recurrent W
        bias = jnp.zeros((1, G8), jnp.float32)        # b_ih + b_hh, folded once
        for d in range(2):
            w_hh = dirs[d]['w_hh']
            bsum = dirs[d]['b_ih'] + dirs[d]['b_hh']
            for qp, q in enumerate(_PACKED_GATE_SRC):
                c0, c1 = gate_cols(qp, d)
                whh = whh.at[d * H:(d + 1) * H, c0:c1].set(
                    w_hh[q * H:(q + 1) * H, :].T)
                bias = bias.at[0, c0:c1].set(bsum[q * H:(q + 1) * H])

        if layer_idx == 0:
            # kernel layer-0 input row block s = [x(s) | x(T-1-s)]
            wp = jnp.zeros((2 * din, G8), jnp.float32)
            for d in range(2):
                w_ih = dirs[d]['w_ih']
                for qp, q in enumerate(_PACKED_GATE_SRC):
                    c0, c1 = gate_cols(qp, d)
                    wp = wp.at[d * din:(d + 1) * din, c0:c1].set(
                        w_ih[q * H:(q + 1) * H, :].T)
        else:
            # AB row block s = [hf(s), hr(T-1-s), hf(T-1-s), hr(s)]  (4H cols)
            wp = jnp.zeros((4 * H, G8), jnp.float32)
            row_of = {(0, 0): 0,        # fwd gates use hf(s)
                      (0, 1): 3 * H,    # fwd gates use hr(s)
                      (1, 0): 2 * H,    # rev gates use hf(T-1-s)
                      (1, 1): H}        # rev gates use hr(T-1-s)
            for d in range(2):
                w_ih = dirs[d]['w_ih']                     # (4H, 2H)
                for qp, q in enumerate(_PACKED_GATE_SRC):
                    c0, c1 = gate_cols(qp, d)
                    wt = w_ih[q * H:(q + 1) * H, :].T      # (2H, H)
                    for half in range(2):
                        r0 = row_of[(d, half)]
                        wp = wp.at[r0:r0 + H, c0:c1].set(
                            wt[half * H:(half + 1) * H, :])
        packed.extend([wp, whh, bias])

    for (w, b) in mlp:
        packed.append(w.T)                   # pre-transposed for x @ W
        packed.append(b.reshape(1, -1))
    return tuple(packed)


# ---------------------------------------------------------------------------
# Pure-JAX reference mirroring the PyTorch forward (inference mode)
# ---------------------------------------------------------------------------
def actor_reference(state, raw):
    lstm, mlp = raw
    H = LSTM_H
    x = state.reshape(BATCH, SEQ, INPUT_SIZE).astype(jnp.float32)
    xs = [x[:, t, :] for t in range(SEQ)]

    for dirs in lstm:
        outs_f, outs_r = [], [None] * SEQ
        for d in range(2):
            w_ih, w_hh = dirs[d]['w_ih'], dirs[d]['w_hh']
            b = dirs[d]['b_ih'] + dirs[d]['b_hh']
            h = jnp.zeros((BATCH, H), jnp.float32)
            c = jnp.zeros((BATCH, H), jnp.float32)
            order = range(SEQ) if d == 0 else range(SEQ - 1, -1, -1)
            for t in order:
                z = xs[t] @ w_ih.T + h @ w_hh.T + b            # gates (i, f, g, o)
                i = jax.nn.sigmoid(z[:, 0:H])
                f = jax.nn.sigmoid(z[:, H:2 * H])
                g = jnp.tanh(z[:, 2 * H:3 * H])
                o = jax.nn.sigmoid(z[:, 3 * H:4 * H])
                c = f * c + i * g
                h = o * jnp.tanh(c)
                if d == 0:
                    outs_f.append(h)
                else:
                    outs_r[t] = h
        xs = [jnp.concatenate([outs_f[t], outs_r[t]], axis=-1) for t in range(SEQ)]

    feat = jnp.concatenate(xs, axis=-1)                        # (B, T*2H)
    (w1, b1), (w2, b2), (w3, b3) = mlp
    h1 = jnp.maximum(feat @ w1.T + b1, 0.0)
    h2 = jnp.maximum(h1 @ w2.T + b2, 0.0)
    logits = h2 @ w3.T + b3
    return jax.nn.softmax(logits, axis=1) * MAX_ACTION


if __name__ == "__main__":
    key = jax.random.PRNGKey(0)
    pkey, xkey = jax.random.split(key)
    raw_params = init_raw_params(pkey)
    kernel_params = pack_params(raw_params)
    state = jax.random.normal(xkey, (BATCH, SEQ * INPUT_SIZE), jnp.float32)

    out = jax.block_until_ready(actor_forward(state, kernel_params))
    ref = actor_reference(state, raw_params)

    assert out.shape == (BATCH, ACTION_DIM)
    assert bool(jnp.all(jnp.isfinite(out)))
    assert float(jnp.max(jnp.abs(out - ref))) < 1e-3
    assert float(jnp.max(jnp.abs(jnp.sum(out, axis=1) - MAX_ACTION))) < 1e-3

    print("KERNEL_OK")
</pallas_src>

<mosaic_0001>
module attributes {stable_mosaic.version = 11 : i64} {
  func.func @actor_kernel(%arg0: memref<16x8xf32, #tpu.memory_space<vmem>>, %arg1: memref<8x64xf32, #tpu.memory_space<vmem>>, %arg2: memref<16x64xf32, #tpu.memory_space<vmem>>, %arg3: memref<1x64xf32, #tpu.memory_space<vmem>>, %arg4: memref<32x64xf32, #tpu.memory_space<vmem>>, %arg5: memref<16x64xf32, #tpu.memory_space<vmem>>, %arg6: memref<1x64xf32, #tpu.memory_space<vmem>>, %arg7: memref<32x64xf32, #tpu.memory_space<vmem>>, %arg8: memref<16x64xf32, #tpu.memory_space<vmem>>, %arg9: memref<1x64xf32, #tpu.memory_space<vmem>>, %arg10: memref<128x32xf32, #tpu.memory_space<vmem>>, %arg11: memref<1x32xf32, #tpu.memory_space<vmem>>, %arg12: memref<32x32xf32, #tpu.memory_space<vmem>>, %arg13: memref<1x32xf32, #tpu.memory_space<vmem>>, %arg14: memref<32x5xf32, #tpu.memory_space<vmem>>, %arg15: memref<1x5xf32, #tpu.memory_space<vmem>>, %arg16: memref<2x5xf32, #tpu.memory_space<vmem>>, %arg17: memref<16x32xf32, #tpu.memory_space<vmem>>, %arg18: memref<16x32xf32, #tpu.memory_space<vmem>>, %arg19: memref<2x128xf32, #tpu.memory_space<vmem>>) attributes {dimension_semantics = [], scalar_prefetch = 0 : i64, scratch_operands = 3 : i64, tpu.core_type = #tpu.core_type<tc>} {
    %c0 = arith.constant 0 : index
    %c0_0 = arith.constant 0 : index
    %0 = vector.load %arg0[%c0, %c0_0] : memref<16x8xf32, #tpu.memory_space<vmem>>, vector<16x8xf32>
    %c0_1 = arith.constant 0 : index
    %c0_2 = arith.constant 0 : index
    %1 = vector.load %arg1[%c0_1, %c0_2] : memref<8x64xf32, #tpu.memory_space<vmem>>, vector<8x64xf32>
    %cst = arith.constant dense<0.000000e+00> : vector<16x64xf32>
    %2 = tpu.matmul %0, %1, %cst {dimension_numbers = #tpu.dot_dimension_numbers<[1], [0], [0], [1], [0, 0, 1, 1], [], []>} : vector<16x8xf32>, vector<8x64xf32>, vector<16x64xf32> -> vector<16x64xf32>
    %c0_3 = arith.constant 0 : index
    %c0_4 = arith.constant 0 : index
    %3 = vector.load %arg3[%c0_3, %c0_4] : memref<1x64xf32, #tpu.memory_space<vmem>>, vector<1x64xf32>
    %4 = vector.broadcast %3 : vector<1x64xf32> to vector<16x64xf32>
    %5 = arith.addf %2, %4 : vector<16x64xf32>
    %c0_5 = arith.constant 0 : index
    %c0_6 = arith.constant 0 : index
    %6 = vector.load %arg2[%c0_5, %c0_6] : memref<16x64xf32, #tpu.memory_space<vmem>>, vector<16x64xf32>
    %cst_7 = arith.constant 0.000000e+00 : f32
    %7 = vector.broadcast %cst_7 : f32 to vector<2x16xf32>
    %cst_8 = arith.constant 0.000000e+00 : f32
    %8 = vector.broadcast %cst_8 : f32 to vector<2x16xf32>
    %cst_9 = arith.constant dense<0.000000e+00> : vector<2x64xf32>
    %9 = tpu.matmul %7, %6, %cst_9 {dimension_numbers = #tpu.dot_dimension_numbers<[1], [0], [0], [1], [0, 0, 1, 1], [], []>} : vector<2x16xf32>, vector<16x64xf32>, vector<2x64xf32> -> vector<2x64xf32>
    %10 = vector.extract_strided_slice %5 {offsets = [0, 0], sizes = [2, 64], strides = [1, 1]} : vector<16x64xf32> to vector<2x64xf32>
    %11 = arith.addf %9, %10 : vector<2x64xf32>
    %12 = vector.extract_strided_slice %11 {offsets = [0, 0], sizes = [2, 48], strides = [1, 1]} : vector<2x64xf32> to vector<2x48xf32>
    %13 = arith.negf %12 : vector<2x48xf32>
    %14 = math.exp %13 : vector<2x48xf32>
    %cst_10 = arith.constant 1.000000e+00 : f32
    %15 = vector.broadcast %cst_10 : f32 to vector<2x48xf32>
    %16 = arith.addf %15, %14 : vector<2x48xf32>
    %17 = arith.divf %15, %16 : vector<2x48xf32>
    %18 = vector.extract_strided_slice %17 {offsets = [0, 0], sizes = [2, 16], strides = [1, 1]} : vector<2x48xf32> to vector<2x16xf32>
    %19 = vector.extract_strided_slice %17 {offsets = [0, 16], sizes = [2, 16], strides = [1, 1]} : vector<2x48xf32> to vector<2x16xf32>
    %20 = vector.extract_strided_slice %17 {offsets = [0, 32], sizes = [2, 16], strides = [1, 1]} : vector<2x48xf32> to vector<2x16xf32>
    %21 = vector.extract_strided_slice %11 {offsets = [0, 48], sizes = [2, 16], strides = [1, 1]} : vector<2x64xf32> to vector<2x16xf32>
    %22 = math.tanh %21 : vector<2x16xf32>
    %23 = arith.mulf %19, %8 : vector<2x16xf32>
    %24 = arith.mulf %18, %22 : vector<2x16xf32>
    %25 = arith.addf %23, %24 : vector<2x16xf32>
    %26 = math.tanh %25 : vector<2x16xf32>
    %27 = arith.mulf %20, %26 : vector<2x16xf32>
    %c0_11 = arith.constant 0 : index
    %c0_12 = arith.constant 0 : index
    %28 = vector.load %arg17[%c0_11, %c0_12] : memref<16x32xf32, #tpu.memory_space<vmem>>, vector<2x16xf32>
    tpu.vector_store %arg17[%c0_11, %c0_12], %27 {strides = array<i32>} : memref<16x32xf32, #tpu.memory_space<vmem>>, vector<2x16xf32>,
    %c14 = arith.constant 14 : index
    %c16 = arith.constant 16 : index
    %29 = vector.load %arg17[%c14, %c16] : memref<16x32xf32, #tpu.memory_space<vmem>>, vector<2x16xf32>
    tpu.vector_store %arg17[%c14, %c16], %27 {strides = array<i32>} : memref<16x32xf32, #tpu.memory_space<vmem>>, vector<2x16xf32>,
    %cst_13 = arith.constant dense<0.000000e+00> : vector<2x64xf32>
    %30 = tpu.matmul %27, %6, %cst_13 {dimension_numbers = #tpu.dot_dimension_numbers<[1], [0], [0], [1], [0, 0, 1, 1], [], []>} : vector<2x16xf32>, vector<16x64xf32>, vector<2x64xf32> -> vector<2x64xf32>
    %31 = vector.extract_strided_slice %5 {offsets = [2, 0], sizes = [2, 64], strides = [1, 1]} : vector<16x64xf32> to vector<2x64xf32>
    %32 = arith.addf %30, %31 : vector<2x64xf32>
    %33 = vector.extract_strided_slice %32 {offsets = [0, 0], sizes = [2, 48], strides = [1, 1]} : vector<2x64xf32> to vector<2x48xf32>
    %34 = arith.negf %33 : vector<2x48xf32>
    %35 = math.exp %34 : vector<2x48xf32>
    %cst_14 = arith.constant 1.000000e+00 : f32
    %36 = vector.broadcast %cst_14 : f32 to vector<2x48xf32>
    %37 = arith.addf %36, %35 : vector<2x48xf32>
    %38 = arith.divf %36, %37 : vector<2x48xf32>
    %39 = vector.extract_strided_slice %38 {offsets = [0, 0], sizes = [2, 16], strides = [1, 1]} : vector<2x48xf32> to vector<2x16xf32>
    %40 = vector.extract_strided_slice %38 {offsets = [0, 16], sizes = [2, 16], strides = [1, 1]} : vector<2x48xf32> to vector<2x16xf32>
    %41 = vector.extract_strided_slice %38 {offsets = [0, 32], sizes = [2, 16], strides = [1, 1]} : vector<2x48xf32> to vector<2x16xf32>
    %42 = vector.extract_strided_slice %32 {offsets = [0, 48], sizes = [2, 16], strides = [1, 1]} : vector<2x64xf32> to vector<2x16xf32>
    %43 = math.tanh %42 : vector<2x16xf32>
    %44 = arith.mulf %40, %25 : vector<2x16xf32>
    %45 = arith.mulf %39, %43 : vector<2x16xf32>
    %46 = arith.addf %44, %45 : vector<2x16xf32>
    %47 = math.tanh %46 : vector<2x16xf32>
    %48 = arith.mulf %41, %47 : vector<2x16xf32>
    %c2 = arith.constant 2 : index
    %c0_15 = arith.constant 0 : index
    %49 = vector.load %arg17[%c2, %c0_15] : memref<16x32xf32, #tpu.memory_space<vmem>>, vector<2x16xf32>
    tpu.vector_store %arg17[%c2, %c0_15], %48 {strides = array<i32>} : memref<16x32xf32, #tpu.memory_space<vmem>>, vector<2x16xf32>,
    %c12 = arith.constant 12 : index
    %c16_16 = arith.constant 16 : index
    %50 = vector.load %arg17[%c12, %c16_16] : memref<16x32xf32, #tpu.memory_space<vmem>>, vector<2x16xf32>
    tpu.vector_store %arg17[%c12, %c16_16], %48 {strides = array<i32>} : memref<16x32xf32, #tpu.memory_space<vmem>>, vector<2x16xf32>,
    %cst_17 = arith.constant dense<0.000000e+00> : vector<2x64xf32>
    %51 = tpu.matmul %48, %6, %cst_17 {dimension_numbers = #tpu.dot_dimension_numbers<[1], [0], [0], [1], [0, 0, 1, 1], [], []>} : vector<2x16xf32>, vector<16x64xf32>, vector<2x64xf32> -> vector<2x64xf32>
    %52 = vector.extract_strided_slice %5 {offsets = [4, 0], sizes = [2, 64], strides = [1, 1]} : vector<16x64xf32> to vector<2x64xf32>
    %53 = arith.addf %51, %52 : vector<2x64xf32>
    %54 = vector.extract_strided_slice %53 {offsets = [0, 0], sizes = [2, 48], strides = [1, 1]} : vector<2x64xf32> to vector<2x48xf32>
    %55 = arith.negf %54 : vector<2x48xf32>
    %56 = math.exp %55 : vector<2x48xf32>
    %cst_18 = arith.constant 1.000000e+00 : f32
    %57 = vector.broadcast %cst_18 : f32 to vector<2x48xf32>
    %58 = arith.addf %57, %56 : vector<2x48xf32>
    %59 = arith.divf %57, %58 : vector<2x48xf32>
    %60 = vector.extract_strided_slice %59 {offsets = [0, 0], sizes = [2, 16], strides = [1, 1]} : vector<2x48xf32> to vector<2x16xf32>
    %61 = vector.extract_strided_slice %59 {offsets = [0, 16], sizes = [2, 16], strides = [1, 1]} : vector<2x48xf32> to vector<2x16xf32>
    %62 = vector.extract_strided_slice %59 {offsets = [0, 32], sizes = [2, 16], strides = [1, 1]} : vector<2x48xf32> to vector<2x16xf32>
    %63 = vector.extract_strided_slice %53 {offsets = [0, 48], sizes = [2, 16], strides = [1, 1]} : vector<2x64xf32> to vector<2x16xf32>
    %64 = math.tanh %63 : vector<2x16xf32>
    %65 = arith.mulf %61, %46 : vector<2x16xf32>
    %66 = arith.mulf %60, %64 : vector<2x16xf32>
    %67 = arith.addf %65, %66 : vector<2x16xf32>
    %68 = math.tanh %67 : vector<2x16xf32>
    %69 = arith.mulf %62, %68 : vector<2x16xf32>
    %c4 = arith.constant 4 : index
    %c0_19 = arith.constant 0 : index
    %70 = vector.load %arg17[%c4, %c0_19] : memref<16x32xf32, #tpu.memory_space<vmem>>, vector<2x16xf32>
    tpu.vector_store %arg17[%c4, %c0_19], %69 {strides = array<i32>} : memref<16x32xf32, #tpu.memory_space<vmem>>, vector<2x16xf32>,
    %c10 = arith.constant 10 : index
    %c16_20 = arith.constant 16 : index
    %71 = vector.load %arg17[%c10, %c16_20] : memref<16x32xf32, #tpu.memory_space<vmem>>, vector<2x16xf32>
    tpu.vector_store %arg17[%c10, %c16_20], %69 {strides = array<i32>} : memref<16x32xf32, #tpu.memory_space<vmem>>, vector<2x16xf32>,
    %cst_21 = arith.constant dense<0.000000e+00> : vector<2x64xf32>
    %72 = tpu.matmul %69, %6, %cst_21 {dimension_numbers = #tpu.dot_dimension_numbers<[1], [0], [0], [1], [0, 0, 1, 1], [], []>} : vector<2x16xf32>, vector<16x64xf32>, vector<2x64xf32> -> vector<2x64xf32>
    %73 = vector.extract_strided_slice %5 {offsets = [6, 0], sizes = [2, 64], strides = [1, 1]} : vector<16x64xf32> to vector<2x64xf32>
    %74 = arith.addf %72, %73 : vector<2x64xf32>
    %75 = vector.extract_strided_slice %74 {offsets = [0, 0], sizes = [2, 48], strides = [1, 1]} : vector<2x64xf32> to vector<2x48xf32>
    %76 = arith.negf %75 : vector<2x48xf32>
    %77 = math.exp %76 : vector<2x48xf32>
    %cst_22 = arith.constant 1.000000e+00 : f32
    %78 = vector.broadcast %cst_22 : f32 to vector<2x48xf32>
    %79 = arith.addf %78, %77 : vector<2x48xf32>
    %80 = arith.divf %78, %79 : vector<2x48xf32>
    %81 = vector.extract_strided_slice %80 {offsets = [0, 0], sizes = [2, 16], strides = [1, 1]} : vector<2x48xf32> to vector<2x16xf32>
    %82 = vector.extract_strided_slice %80 {offsets = [0, 16], sizes = [2, 16], strides = [1, 1]} : vector<2x48xf32> to vector<2x16xf32>
    %83 = vector.extract_strided_slice %80 {offsets = [0, 32], sizes = [2, 16], strides = [1, 1]} : vector<2x48xf32> to vector<2x16xf32>
    %84 = vector.extract_strided_slice %74 {offsets = [0, 48], sizes = [2, 16], strides = [1, 1]} : vector<2x64xf32> to vector<2x16xf32>
    %85 = math.tanh %84 : vector<2x16xf32>
    %86 = arith.mulf %82, %67 : vector<2x16xf32>
    %87 = arith.mulf %81, %85 : vector<2x16xf32>
    %88 = arith.addf %86, %87 : vector<2x16xf32>
    %89 = math.tanh %88 : vector<2x16xf32>
    %90 = arith.mulf %83, %89 : vector<2x16xf32>
    %c6 = arith.constant 6 : index
    %c0_23 = arith.constant 0 : index
    %91 = vector.load %arg17[%c6, %c0_23] : memref<16x32xf32, #tpu.memory_space<vmem>>, vector<2x16xf32>
    tpu.vector_store %arg17[%c6, %c0_23], %90 {strides = array<i32>} : memref<16x32xf32, #tpu.memory_space<vmem>>, vector<2x16xf32>,
    %c8 = arith.constant 8 : index
    %c16_24 = arith.constant 16 : index
    %92 = vector.load %arg17[%c8, %c16_24] : memref<16x32xf32, #tpu.memory_space<vmem>>, vector<2x16xf32>
    tpu.vector_store %arg17[%c8, %c16_24], %90 {strides = array<i32>} : memref<16x32xf32, #tpu.memory_space<vmem>>, vector<2x16xf32>,
    %cst_25 = arith.constant dense<0.000000e+00> : vector<2x64xf32>
    %93 = tpu.matmul %90, %6, %cst_25 {dimension_numbers = #tpu.dot_dimension_numbers<[1], [0], [0], [1], [0, 0, 1, 1], [], []>} : vector<2x16xf32>, vector<16x64xf32>, vector<2x64xf32> -> vector<2x64xf32>
    %94 = vector.extract_strided_slice %5 {offsets = [8, 0], sizes = [2, 64], strides = [1, 1]} : vector<16x64xf32> to vector<2x64xf32>
    %95 = arith.addf %93, %94 : vector<2x64xf32>
    %96 = vector.extract_strided_slice %95 {offsets = [0, 0], sizes = [2, 48], strides = [1, 1]} : vector<2x64xf32> to vector<2x48xf32>
    %97 = arith.negf %96 : vector<2x48xf32>
    %98 = math.exp %97 : vector<2x48xf32>
    %cst_26 = arith.constant 1.000000e+00 : f32
    %99 = vector.broadcast %cst_26 : f32 to vector<2x48xf32>
    %100 = arith.addf %99, %98 : vector<2x48xf32>
    %101 = arith.divf %99, %100 : vector<2x48xf32>
    %102 = vector.extract_strided_slice %101 {offsets = [0, 0], sizes = [2, 16], strides = [1, 1]} : vector<2x48xf32> to vector<2x16xf32>
    %103 = vector.extract_strided_slice %101 {offsets = [0, 16], sizes = [2, 16], strides = [1, 1]} : vector<2x48xf32> to vector<2x16xf32>
    %104 = vector.extract_strided_slice %101 {offsets = [0, 32], sizes = [2, 16], strides = [1, 1]} : vector<2x48xf32> to vector<2x16xf32>
    %105 = vector.extract_strided_slice %95 {offsets = [0, 48], sizes = [2, 16], strides = [1, 1]} : vector<2x64xf32> to vector<2x16xf32>
    %106 = math.tanh %105 : vector<2x16xf32>
    %107 = arith.mulf %103, %88 : vector<2x16xf32>
    %108 = arith.mulf %102, %106 : vector<2x16xf32>
    %109 = arith.addf %107, %108 : vector<2x16xf32>
    %110 = math.tanh %109 : vector<2x16xf32>
    %111 = arith.mulf %104, %110 : vector<2x16xf32>
    %c8_27 = arith.constant 8 : index
    %c0_28 = arith.constant 0 : index
    %112 = vector.load %arg17[%c8_27, %c0_28] : memref<16x32xf32, #tpu.memory_space<vmem>>, vector<2x16xf32>
    tpu.vector_store %arg17[%c8_27, %c0_28], %111 {strides = array<i32>} : memref<16x32xf32, #tpu.memory_space<vmem>>, vector<2x16xf32>,
    %c6_29 = arith.constant 6 : index
    %c16_30 = arith.constant 16 : index
    %113 = vector.load %arg17[%c6_29, %c16_30] : memref<16x32xf32, #tpu.memory_space<vmem>>, vector<2x16xf32>
    tpu.vector_store %arg17[%c6_29, %c16_30], %111 {strides = array<i32>} : memref<16x32xf32, #tpu.memory_space<vmem>>, vector<2x16xf32>,
    %cst_31 = arith.constant dense<0.000000e+00> : vector<2x64xf32>
    %114 = tpu.matmul %111, %6, %cst_31 {dimension_numbers = #tpu.dot_dimension_numbers<[1], [0], [0], [1], [0, 0, 1, 1], [], []>} : vector<2x16xf32>, vector<16x64xf32>, vector<2x64xf32> -> vector<2x64xf32>
    %115 = vector.extract_strided_slice %5 {offsets = [10, 0], sizes = [2, 64], strides = [1, 1]} : vector<16x64xf32> to vector<2x64xf32>
    %116 = arith.addf %114, %115 : vector<2x64xf32>
    %117 = vector.extract_strided_slice %116 {offsets = [0, 0], sizes = [2, 48], strides = [1, 1]} : vector<2x64xf32> to vector<2x48xf32>
    %118 = arith.negf %117 : vector<2x48xf32>
    %119 = math.exp %118 : vector<2x48xf32>
    %cst_32 = arith.constant 1.000000e+00 : f32
    %120 = vector.broadcast %cst_32 : f32 to vector<2x48xf32>
    %121 = arith.addf %120, %119 : vector<2x48xf32>
    %122 = arith.divf %120, %121 : vector<2x48xf32>
    %123 = vector.extract_strided_slice %122 {offsets = [0, 0], sizes = [2, 16], strides = [1, 1]} : vector<2x48xf32> to vector<2x16xf32>
    %124 = vector.extract_strided_slice %122 {offsets = [0, 16], sizes = [2, 16], strides = [1, 1]} : vector<2x48xf32> to vector<2x16xf32>
    %125 = vector.extract_strided_slice %122 {offsets = [0, 32], sizes = [2, 16], strides = [1, 1]} : vector<2x48xf32> to vector<2x16xf32>
    %126 = vector.extract_strided_slice %116 {offsets = [0, 48], sizes = [2, 16], strides = [1, 1]} : vector<2x64xf32> to vector<2x16xf32>
    %127 = math.tanh %126 : vector<2x16xf32>
    %128 = arith.mulf %124, %109 : vector<2x16xf32>
    %129 = arith.mulf %123, %127 : vector<2x16xf32>
    %130 = arith.addf %128, %129 : vector<2x16xf32>
    %131 = math.tanh %130 : vector<2x16xf32>
    %132 = arith.mulf %125, %131 : vector<2x16xf32>
    %c10_33 = arith.constant 10 : index
    %c0_34 = arith.constant 0 : index
    %133 = vector.load %arg17[%c10_33, %c0_34] : memref<16x32xf32, #tpu.memory_space<vmem>>, vector<2x16xf32>
    tpu.vector_store %arg17[%c10_33, %c0_34], %132 {strides = array<i32>} : memref<16x32xf32, #tpu.memory_space<vmem>>, vector<2x16xf32>,
    %c4_35 = arith.constant 4 : index
    %c16_36 = arith.constant 16 : index
    %134 = vector.load %arg17[%c4_35, %c16_36] : memref<16x32xf32, #tpu.memory_space<vmem>>, vector<2x16xf32>
    tpu.vector_store %arg17[%c4_35, %c16_36], %132 {strides = array<i32>} : memref<16x32xf32, #tpu.memory_space<vmem>>, vector<2x16xf32>,
    %cst_37 = arith.constant dense<0.000000e+00> : vector<2x64xf32>
    %135 = tpu.matmul %132, %6, %cst_37 {dimension_numbers = #tpu.dot_dimension_numbers<[1], [0], [0], [1], [0, 0, 1, 1], [], []>} : vector<2x16xf32>, vector<16x64xf32>, vector<2x64xf32> -> vector<2x64xf32>
    %136 = vector.extract_strided_slice %5 {offsets = [12, 0], sizes = [2, 64], strides = [1, 1]} : vector<16x64xf32> to vector<2x64xf32>
    %137 = arith.addf %135, %136 : vector<2x64xf32>
    %138 = vector.extract_strided_slice %137 {offsets = [0, 0], sizes = [2, 48], strides = [1, 1]} : vector<2x64xf32> to vector<2x48xf32>
    %139 = arith.negf %138 : vector<2x48xf32>
    %140 = math.exp %139 : vector<2x48xf32>
    %cst_38 = arith.constant 1.000000e+00 : f32
    %141 = vector.broadcast %cst_38 : f32 to vector<2x48xf32>
    %142 = arith.addf %141, %140 : vector<2x48xf32>
    %143 = arith.divf %141, %142 : vector<2x48xf32>
    %144 = vector.extract_strided_slice %143 {offsets = [0, 0], sizes = [2, 16], strides = [1, 1]} : vector<2x48xf32> to vector<2x16xf32>
    %145 = vector.extract_strided_slice %143 {offsets = [0, 16], sizes = [2, 16], strides = [1, 1]} : vector<2x48xf32> to vector<2x16xf32>
    %146 = vector.extract_strided_slice %143 {offsets = [0, 32], sizes = [2, 16], strides = [1, 1]} : vector<2x48xf32> to vector<2x16xf32>
    %147 = vector.extract_strided_slice %137 {offsets = [0, 48], sizes = [2, 16], strides = [1, 1]} : vector<2x64xf32> to vector<2x16xf32>
    %148 = math.tanh %147 : vector<2x16xf32>
    %149 = arith.mulf %145, %130 : vector<2x16xf32>
    %150 = arith.mulf %144, %148 : vector<2x16xf32>
    %151 = arith.addf %149, %150 : vector<2x16xf32>
    %152 = math.tanh %151 : vector<2x16xf32>
    %153 = arith.mulf %146, %152 : vector<2x16xf32>
    %c12_39 = arith.constant 12 : index
    %c0_40 = arith.constant 0 : index
    %154 = vector.load %arg17[%c12_39, %c0_40] : memref<16x32xf32, #tpu.memory_space<vmem>>, vector<2x16xf32>
    tpu.vector_store %arg17[%c12_39, %c0_40], %153 {strides = array<i32>} : memref<16x32xf32, #tpu.memory_space<vmem>>, vector<2x16xf32>,
    %c2_41 = arith.constant 2 : index
    %c16_42 = arith.constant 16 : index
    %155 = vector.load %arg17[%c2_41, %c16_42] : memref<16x32xf32, #tpu.memory_space<vmem>>, vector<2x16xf32>
    tpu.vector_store %arg17[%c2_41, %c16_42], %153 {strides = array<i32>} : memref<16x32xf32, #tpu.memory_space<vmem>>, vector<2x16xf32>,
    %cst_43 = arith.constant dense<0.000000e+00> : vector<2x64xf32>
    %156 = tpu.matmul %153, %6, %cst_43 {dimension_numbers = #tpu.dot_dimension_numbers<[1], [0], [0], [1], [0, 0, 1, 1], [], []>} : vector<2x16xf32>, vector<16x64xf32>, vector<2x64xf32> -> vector<2x64xf32>
    %157 = vector.extract_strided_slice %5 {offsets = [14, 0], sizes = [2, 64], strides = [1, 1]} : vector<16x64xf32> to vector<2x64xf32>
    %158 = arith.addf %156, %157 : vector<2x64xf32>
    %159 = vector.extract_strided_slice %158 {offsets = [0, 0], sizes = [2, 48], strides = [1, 1]} : vector<2x64xf32> to vector<2x48xf32>
    %160 = arith.negf %159 : vector<2x48xf32>
    %161 = math.exp %160 : vector<2x48xf32>
    %cst_44 = arith.constant 1.000000e+00 : f32
    %162 = vector.broadcast %cst_44 : f32 to vector<2x48xf32>
    %163 = arith.addf %162, %161 : vector<2x48xf32>
    %164 = arith.divf %162, %163 : vector<2x48xf32>
    %165 = vector.extract_strided_slice %164 {offsets = [0, 0], sizes = [2, 16], strides = [1, 1]} : vector<2x48xf32> to vector<2x16xf32>
    %166 = vector.extract_strided_slice %164 {offsets = [0, 16], sizes = [2, 16], strides = [1, 1]} : vector<2x48xf32> to vector<2x16xf32>
    %167 = vector.extract_strided_slice %164 {offsets = [0, 32], sizes = [2, 16], strides = [1, 1]} : vector<2x48xf32> to vector<2x16xf32>
    %168 = vector.extract_strided_slice %158 {offsets = [0, 48], sizes = [2, 16], strides = [1, 1]} : vector<2x64xf32> to vector<2x16xf32>
    %169 = math.tanh %168 : vector<2x16xf32>
    %170 = arith.mulf %166, %151 : vector<2x16xf32>
    %171 = arith.mulf %165, %169 : vector<2x16xf32>
    %172 = arith.addf %170, %171 : vector<2x16xf32>
    %173 = math.tanh %172 : vector<2x16xf32>
    %174 = arith.mulf %167, %173 : vector<2x16xf32>
    %c14_45 = arith.constant 14 : index
    %c0_46 = arith.constant 0 : index
    %175 = vector.load %arg17[%c14_45, %c0_46] : memref<16x32xf32, #tpu.memory_space<vmem>>, vector<2x16xf32>
    tpu.vector_store %arg17[%c14_45, %c0_46], %174 {strides = array<i32>} : memref<16x32xf32, #tpu.memory_space<vmem>>, vector<2x16xf32>,
    %c0_47 = arith.constant 0 : index
    %c16_48 = arith.constant 16 : index
    %176 = vector.load %arg17[%c0_47, %c16_48] : memref<16x32xf32, #tpu.memory_space<vmem>>, vector<2x16xf32>
    tpu.vector_store %arg17[%c0_47, %c16_48], %174 {strides = array<i32>} : memref<16x32xf32, #tpu.memory_space<vmem>>, vector<2x16xf32>,
    %c0_49 = arith.constant 0 : index
    %c0_50 = arith.constant 0 : index
    %177 = vector.load %arg17[%c0_49, %c0_50] : memref<16x32xf32, #tpu.memory_space<vmem>>, vector<16x32xf32>
    %c0_51 = arith.constant 0 : index
    %c0_52 = arith.constant 0 : index
    %178 = vector.load %arg4[%c0_51, %c0_52] : memref<32x64xf32, #tpu.memory_space<vmem>>, vector<32x64xf32>
    %cst_53 = arith.constant dense<0.000000e+00> : vector<16x64xf32>
    %179 = tpu.matmul %177, %178, %cst_53 {dimension_numbers = #tpu.dot_dimension_numbers<[1], [0], [0], [1], [0, 0, 1, 1], [], []>} : vector<16x32xf32>, vector<32x64xf32>, vector<16x64xf32> -> vector<16x64xf32>
    %c0_54 = arith.constant 0 : index
    %c0_55 = arith.constant 0 : index
    %180 = vector.load %arg6[%c0_54, %c0_55] : memref<1x64xf32, #tpu.memory_space<vmem>>, vector<1x64xf32>
    %181 = vector.broadcast %180 : vector<1x64xf32> to vector<16x64xf32>
    %182 = arith.addf %179, %181 : vector<16x64xf32>
    %c0_56 = arith.constant 0 : index
    %c0_57 = arith.constant 0 : index
    %183 = vector.load %arg5[%c0_56, %c0_57] : memref<16x64xf32, #tpu.memory_space<vmem>>, vector<16x64xf32>
    %cst_58 = arith.constant 0.000000e+00 : f32
    %184 = vector.broadcast %cst_58 : f32 to vector<2x16xf32>
    %cst_59 = arith.constant 0.000000e+00 : f32
    %185 = vector.broadcast %cst_59 : f32 to vector<2x16xf32>
    %cst_60 = arith.constant dense<0.000000e+00> : vector<2x64xf32>
    %186 = tpu.matmul %184, %183, %cst_60 {dimension_numbers = #tpu.dot_dimension_numbers<[1], [0], [0], [1], [0, 0, 1, 1], [], []>} : vector<2x16xf32>, vector<16x64xf32>, vector<2x64xf32> -> vector<2x64xf32>
    %187 = vector.extract_strided_slice %182 {offsets = [0, 0], sizes = [2, 64], strides = [1, 1]} : vector<16x64xf32> to vector<2x64xf32>
    %188 = arith.addf %186, %187 : vector<2x64xf32>
    %189 = vector.extract_strided_slice %188 {offsets = [0, 0], sizes = [2, 48], strides = [1, 1]} : vector<2x64xf32> to vector<2x48xf32>
    %190 = arith.negf %189 : vector<2x48xf32>
    %191 = math.exp %190 : vector<2x48xf32>
    %cst_61 = arith.constant 1.000000e+00 : f32
    %192 = vector.broadcast %cst_61 : f32 to vector<2x48xf32>
    %193 = arith.addf %192, %191 : vector<2x48xf32>
    %194 = arith.divf %192, %193 : vector<2x48xf32>
    %195 = vector.extract_strided_slice %194 {offsets = [0, 0], sizes = [2, 16], strides = [1, 1]} : vector<2x48xf32> to vector<2x16xf32>
    %196 = vector.extract_strided_slice %194 {offsets = [0, 16], sizes = [2, 16], strides = [1, 1]} : vector<2x48xf32> to vector<2x16xf32>
    %197 = vector.extract_strided_slice %194 {offsets = [0, 32], sizes = [2, 16], strides = [1, 1]} : vector<2x48xf32> to vector<2x16xf32>
    %198 = vector.extract_strided_slice %188 {offsets = [0, 48], sizes = [2, 16], strides = [1, 1]} : vector<2x64xf32> to vector<2x16xf32>
    %199 = math.tanh %198 : vector<2x16xf32>
    %200 = arith.mulf %196, %185 : vector<2x16xf32>
    %201 = arith.mulf %195, %199 : vector<2x16xf32>
    %202 = arith.addf %200, %201 : vector<2x16xf32>
    %203 = math.tanh %202 : vector<2x16xf32>
    %204 = arith.mulf %197, %203 : vector<2x16xf32>
    %c0_62 = arith.constant 0 : index
    %c0_63 = arith.constant 0 : index
    %205 = vector.load %arg18[%c0_62, %c0_63] : memref<16x32xf32, #tpu.memory_space<vmem>>, vector<2x16xf32>
    tpu.vector_store %arg18[%c0_62, %c0_63], %204 {strides = array<i32>} : memref<16x32xf32, #tpu.memory_space<vmem>>, vector<2x16xf32>,
    %c14_64 = arith.constant 14 : index
    %c16_65 = arith.constant 16 : index
    %206 = vector.load %arg18[%c14_64, %c16_65] : memref<16x32xf32, #tpu.memory_space<vmem>>, vector<2x16xf32>
    tpu.vector_store %arg18[%c14_64, %c16_65], %204 {strides = array<i32>} : memref<16x32xf32, #tpu.memory_space<vmem>>, vector<2x16xf32>,
    %cst_66 = arith.constant dense<0.000000e+00> : vector<2x64xf32>
    %207 = tpu.matmul %204, %183, %cst_66 {dimension_numbers = #tpu.dot_dimension_numbers<[1], [0], [0], [1], [0, 0, 1, 1], [], []>} : vector<2x16xf32>, vector<16x64xf32>, vector<2x64xf32> -> vector<2x64xf32>
    %208 = vector.extract_strided_slice %182 {offsets = [2, 0], sizes = [2, 64], strides = [1, 1]} : vector<16x64xf32> to vector<2x64xf32>
    %209 = arith.addf %207, %208 : vector<2x64xf32>
    %210 = vector.extract_strided_slice %209 {offsets = [0, 0], sizes = [2, 48], strides = [1, 1]} : vector<2x64xf32> to vector<2x48xf32>
    %211 = arith.negf %210 : vector<2x48xf32>
    %212 = math.exp %211 : vector<2x48xf32>
    %cst_67 = arith.constant 1.000000e+00 : f32
    %213 = vector.broadcast %cst_67 : f32 to vector<2x48xf32>
    %214 = arith.addf %213, %212 : vector<2x48xf32>
    %215 = arith.divf %213, %214 : vector<2x48xf32>
    %216 = vector.extract_strided_slice %215 {offsets = [0, 0], sizes = [2, 16], strides = [1, 1]} : vector<2x48xf32> to vector<2x16xf32>
    %217 = vector.extract_strided_slice %215 {offsets = [0, 16], sizes = [2, 16], strides = [1, 1]} : vector<2x48xf32> to vector<2x16xf32>
    %218 = vector.extract_strided_slice %215 {offsets = [0, 32], sizes = [2, 16], strides = [1, 1]} : vector<2x48xf32> to vector<2x16xf32>
    %219 = vector.extract_strided_slice %209 {offsets = [0, 48], sizes = [2, 16], strides = [1, 1]} : vector<2x64xf32> to vector<2x16xf32>
    %220 = math.tanh %219 : vector<2x16xf32>
    %221 = arith.mulf %217, %202 : vector<2x16xf32>
    %222 = arith.mulf %216, %220 : vector<2x16xf32>
    %223 = arith.addf %221, %222 : vector<2x16xf32>
    %224 = math.tanh %223 : vector<2x16xf32>
    %225 = arith.mulf %218, %224 : vector<2x16xf32>
    %c2_68 = arith.constant 2 : index
    %c0_69 = arith.constant 0 : index
    %226 = vector.load %arg18[%c2_68, %c0_69] : memref<16x32xf32, #tpu.memory_space<vmem>>, vector<2x16xf32>
    tpu.vector_store %arg18[%c2_68, %c0_69], %225 {strides = array<i32>} : memref<16x32xf32, #tpu.memory_space<vmem>>, vector<2x16xf32>,
    %c12_70 = arith.constant 12 : index
    %c16_71 = arith.constant 16 : index
    %227 = vector.load %arg18[%c12_70, %c16_71] : memref<16x32xf32, #tpu.memory_space<vmem>>, vector<2x16xf32>
    tpu.vector_store %arg18[%c12_70, %c16_71], %225 {strides = array<i32>} : memref<16x32xf32, #tpu.memory_space<vmem>>, vector<2x16xf32>,
    %cst_72 = arith.constant dense<0.000000e+00> : vector<2x64xf32>
    %228 = tpu.matmul %225, %183, %cst_72 {dimension_numbers = #tpu.dot_dimension_numbers<[1], [0], [0], [1], [0, 0, 1, 1], [], []>} : vector<2x16xf32>, vector<16x64xf32>, vector<2x64xf32> -> vector<2x64xf32>
    %229 = vector.extract_strided_slice %182 {offsets = [4, 0], sizes = [2, 64], strides = [1, 1]} : vector<16x64xf32> to vector<2x64xf32>
    %230 = arith.addf %228, %229 : vector<2x64xf32>
    %231 = vector.extract_strided_slice %230 {offsets = [0, 0], sizes = [2, 48], strides = [1, 1]} : vector<2x64xf32> to vector<2x48xf32>
    %232 = arith.negf %231 : vector<2x48xf32>
    %233 = math.exp %232 : vector<2x48xf32>
    %cst_73 = arith.constant 1.000000e+00 : f32
    %234 = vector.broadcast %cst_73 : f32 to vector<2x48xf32>
    %235 = arith.addf %234, %233 : vector<2x48xf32>
    %236 = arith.divf %234, %235 : vector<2x48xf32>
    %237 = vector.extract_strided_slice %236 {offsets = [0, 0], sizes = [2, 16], strides = [1, 1]} : vector<2x48xf32> to vector<2x16xf32>
    %238 = vector.extract_strided_slice %236 {offsets = [0, 16], sizes = [2, 16], strides = [1, 1]} : vector<2x48xf32> to vector<2x16xf32>
    %239 = vector.extract_strided_slice %236 {offsets = [0, 32], sizes = [2, 16], strides = [1, 1]} : vector<2x48xf32> to vector<2x16xf32>
    %240 = vector.extract_strided_slice %230 {offsets = [0, 48], sizes = [2, 16], strides = [1, 1]} : vector<2x64xf32> to vector<2x16xf32>
    %241 = math.tanh %240 : vector<2x16xf32>
    %242 = arith.mulf %238, %223 : vector<2x16xf32>
    %243 = arith.mulf %237, %241 : vector<2x16xf32>
    %244 = arith.addf %242, %243 : vector<2x16xf32>
    %245 = math.tanh %244 : vector<2x16xf32>
    %246 = arith.mulf %239, %245 : vector<2x16xf32>
    %c4_74 = arith.constant 4 : index
    %c0_75 = arith.constant 0 : index
    %247 = vector.load %arg18[%c4_74, %c0_75] : memref<16x32xf32, #tpu.memory_space<vmem>>, vector<2x16xf32>
    tpu.vector_store %arg18[%c4_74, %c0_75], %246 {strides = array<i32>} : memref<16x32xf32, #tpu.memory_space<vmem>>, vector<2x16xf32>,
    %c10_76 = arith.constant 10 : index
    %c16_77 = arith.constant 16 : index
    %248 = vector.load %arg18[%c10_76, %c16_77] : memref<16x32xf32, #tpu.memory_space<vmem>>, vector<2x16xf32>
    tpu.vector_store %arg18[%c10_76, %c16_77], %246 {strides = array<i32>} : memref<16x32xf32, #tpu.memory_space<vmem>>, vector<2x16xf32>,
    %cst_78 = arith.constant dense<0.000000e+00> : vector<2x64xf32>
    %249 = tpu.matmul %246, %183, %cst_78 {dimension_numbers = #tpu.dot_dimension_numbers<[1], [0], [0], [1], [0, 0, 1, 1], [], []>} : vector<2x16xf32>, vector<16x64xf32>, vector<2x64xf32> -> vector<2x64xf32>
    %250 = vector.extract_strided_slice %182 {offsets = [6, 0], sizes = [2, 64], strides = [1, 1]} : vector<16x64xf32> to vector<2x64xf32>
    %251 = arith.addf %249, %250 : vector<2x64xf32>
    %252 = vector.extract_strided_slice %251 {offsets = [0, 0], sizes = [2, 48], strides = [1, 1]} : vector<2x64xf32> to vector<2x48xf32>
    %253 = arith.negf %252 : vector<2x48xf32>
    %254 = math.exp %253 : vector<2x48xf32>
    %cst_79 = arith.constant 1.000000e+00 : f32
    %255 = vector.broadcast %cst_79 : f32 to vector<2x48xf32>
    %256 = arith.addf %255, %254 : vector<2x48xf32>
    %257 = arith.divf %255, %256 : vector<2x48xf32>
    %258 = vector.extract_strided_slice %257 {offsets = [0, 0], sizes = [2, 16], strides = [1, 1]} : vector<2x48xf32> to vector<2x16xf32>
    %259 = vector.extract_strided_slice %257 {offsets = [0, 16], sizes = [2, 16], strides = [1, 1]} : vector<2x48xf32> to vector<2x16xf32>
    %260 = vector.extract_strided_slice %257 {offsets = [0, 32], sizes = [2, 16], strides = [1, 1]} : vector<2x48xf32> to vector<2x16xf32>
    %261 = vector.extract_strided_slice %251 {offsets = [0, 48], sizes = [2, 16], strides = [1, 1]} : vector<2x64xf32> to vector<2x16xf32>
    %262 = math.tanh %261 : vector<2x16xf32>
    %263 = arith.mulf %259, %244 : vector<2x16xf32>
    %264 = arith.mulf %258, %262 : vector<2x16xf32>
    %265 = arith.addf %263, %264 : vector<2x16xf32>
    %266 = math.tanh %265 : vector<2x16xf32>
    %267 = arith.mulf %260, %266 : vector<2x16xf32>
    %c6_80 = arith.constant 6 : index
    %c0_81 = arith.constant 0 : index
    %268 = vector.load %arg18[%c6_80, %c0_81] : memref<16x32xf32, #tpu.memory_space<vmem>>, vector<2x16xf32>
    tpu.vector_store %arg18[%c6_80, %c0_81], %267 {strides = array<i32>} : memref<16x32xf32, #tpu.memory_space<vmem>>, vector<2x16xf32>,
    %c8_82 = arith.constant 8 : index
    %c16_83 = arith.constant 16 : index
    %269 = vector.load %arg18[%c8_82, %c16_83] : memref<16x32xf32, #tpu.memory_space<vmem>>, vector<2x16xf32>
    tpu.vector_store %arg18[%c8_82, %c16_83], %267 {strides = array<i32>} : memref<16x32xf32, #tpu.memory_space<vmem>>, vector<2x16xf32>,
    %cst_84 = arith.constant dense<0.000000e+00> : vector<2x64xf32>
    %270 = tpu.matmul %267, %183, %cst_84 {dimension_numbers = #tpu.dot_dimension_numbers<[1], [0], [0], [1], [0, 0, 1, 1], [], []>} : vector<2x16xf32>, vector<16x64xf32>, vector<2x64xf32> -> vector<2x64xf32>
    %271 = vector.extract_strided_slice %182 {offsets = [8, 0], sizes = [2, 64], strides = [1, 1]} : vector<16x64xf32> to vector<2x64xf32>
    %272 = arith.addf %270, %271 : vector<2x64xf32>
    %273 = vector.extract_strided_slice %272 {offsets = [0, 0], sizes = [2, 48], strides = [1, 1]} : vector<2x64xf32> to vector<2x48xf32>
    %274 = arith.negf %273 : vector<2x48xf32>
    %275 = math.exp %274 : vector<2x48xf32>
    %cst_85 = arith.constant 1.000000e+00 : f32
    %276 = vector.broadcast %cst_85 : f32 to vector<2x48xf32>
    %277 = arith.addf %276, %275 : vector<2x48xf32>
    %278 = arith.divf %276, %277 : vector<2x48xf32>
    %279 = vector.extract_strided_slice %278 {offsets = [0, 0], sizes = [2, 16], strides = [1, 1]} : vector<2x48xf32> to vector<2x16xf32>
    %280 = vector.extract_strided_slice %278 {offsets = [0, 16], sizes = [2, 16], strides = [1, 1]} : vector<2x48xf32> to vector<2x16xf32>
    %281 = vector.extract_strided_slice %278 {offsets = [0, 32], sizes = [2, 16], strides = [1, 1]} : vector<2x48xf32> to vector<2x16xf32>
    %282 = vector.extract_strided_slice %272 {offsets = [0, 48], sizes = [2, 16], strides = [1, 1]} : vector<2x64xf32> to vector<2x16xf32>
    %283 = math.tanh %282 : vector<2x16xf32>
    %284 = arith.mulf %280, %265 : vector<2x16xf32>
    %285 = arith.mulf %279, %283 : vector<2x16xf32>
    %286 = arith.addf %284, %285 : vector<2x16xf32>
    %287 = math.tanh %286 : vector<2x16xf32>
    %288 = arith.mulf %281, %287 : vector<2x16xf32>
    %c8_86 = arith.constant 8 : index
    %c0_87 = arith.constant 0 : index
    %289 = vector.load %arg18[%c8_86, %c0_87] : memref<16x32xf32, #tpu.memory_space<vmem>>, vector<2x16xf32>
    tpu.vector_store %arg18[%c8_86, %c0_87], %288 {strides = array<i32>} : memref<16x32xf32, #tpu.memory_space<vmem>>, vector<2x16xf32>,
    %c6_88 = arith.constant 6 : index
    %c16_89 = arith.constant 16 : index
    %290 = vector.load %arg18[%c6_88, %c16_89] : memref<16x32xf32, #tpu.memory_space<vmem>>, vector<2x16xf32>
    tpu.vector_store %arg18[%c6_88, %c16_89], %288 {strides = array<i32>} : memref<16x32xf32, #tpu.memory_space<vmem>>, vector<2x16xf32>,
    %cst_90 = arith.constant dense<0.000000e+00> : vector<2x64xf32>
    %291 = tpu.matmul %288, %183, %cst_90 {dimension_numbers = #tpu.dot_dimension_numbers<[1], [0], [0], [1], [0, 0, 1, 1], [], []>} : vector<2x16xf32>, vector<16x64xf32>, vector<2x64xf32> -> vector<2x64xf32>
    %292 = vector.extract_strided_slice %182 {offsets = [10, 0], sizes = [2, 64], strides = [1, 1]} : vector<16x64xf32> to vector<2x64xf32>
    %293 = arith.addf %291, %292 : vector<2x64xf32>
    %294 = vector.extract_strided_slice %293 {offsets = [0, 0], sizes = [2, 48], strides = [1, 1]} : vector<2x64xf32> to vector<2x48xf32>
    %295 = arith.negf %294 : vector<2x48xf32>
    %296 = math.exp %295 : vector<2x48xf32>
    %cst_91 = arith.constant 1.000000e+00 : f32
    %297 = vector.broadcast %cst_91 : f32 to vector<2x48xf32>
    %298 = arith.addf %297, %296 : vector<2x48xf32>
    %299 = arith.divf %297, %298 : vector<2x48xf32>
    %300 = vector.extract_strided_slice %299 {offsets = [0, 0], sizes = [2, 16], strides = [1, 1]} : vector<2x48xf32> to vector<2x16xf32>
    %301 = vector.extract_strided_slice %299 {offsets = [0, 16], sizes = [2, 16], strides = [1, 1]} : vector<2x48xf32> to vector<2x16xf32>
    %302 = vector.extract_strided_slice %299 {offsets = [0, 32], sizes = [2, 16], strides = [1, 1]} : vector<2x48xf32> to vector<2x16xf32>
    %303 = vector.extract_strided_slice %293 {offsets = [0, 48], sizes = [2, 16], strides = [1, 1]} : vector<2x64xf32> to vector<2x16xf32>
    %304 = math.tanh %303 : vector<2x16xf32>
    %305 = arith.mulf %301, %286 : vector<2x16xf32>
    %306 = arith.mulf %300, %304 : vector<2x16xf32>
    %307 = arith.addf %305, %306 : vector<2x16xf32>
    %308 = math.tanh %307 : vector<2x16xf32>
    %309 = arith.mulf %302, %308 : vector<2x16xf32>
    %c10_92 = arith.constant 10 : index
    %c0_93 = arith.constant 0 : index
    %310 = vector.load %arg18[%c10_92, %c0_93] : memref<16x32xf32, #tpu.memory_space<vmem>>, vector<2x16xf32>
    tpu.vector_store %arg18[%c10_92, %c0_93], %309 {strides = array<i32>} : memref<16x32xf32, #tpu.memory_space<vmem>>, vector<2x16xf32>,
    %c4_94 = arith.constant 4 : index
    %c16_95 = arith.constant 16 : index
    %311 = vector.load %arg18[%c4_94, %c16_95] : memref<16x32xf32, #tpu.memory_space<vmem>>, vector<2x16xf32>
    tpu.vector_store %arg18[%c4_94, %c16_95], %309 {strides = array<i32>} : memref<16x32xf32, #tpu.memory_space<vmem>>, vector<2x16xf32>,
    %cst_96 = arith.constant dense<0.000000e+00> : vector<2x64xf32>
    %312 = tpu.matmul %309, %183, %cst_96 {dimension_numbers = #tpu.dot_dimension_numbers<[1], [0], [0], [1], [0, 0, 1, 1], [], []>} : vector<2x16xf32>, vector<16x64xf32>, vector<2x64xf32> -> vector<2x64xf32>
    %313 = vector.extract_strided_slice %182 {offsets = [12, 0], sizes = [2, 64], strides = [1, 1]} : vector<16x64xf32> to vector<2x64xf32>
    %314 = arith.addf %312, %313 : vector<2x64xf32>
    %315 = vector.extract_strided_slice %314 {offsets = [0, 0], sizes = [2, 48], strides = [1, 1]} : vector<2x64xf32> to vector<2x48xf32>
    %316 = arith.negf %315 : vector<2x48xf32>
    %317 = math.exp %316 : vector<2x48xf32>
    %cst_97 = arith.constant 1.000000e+00 : f32
    %318 = vector.broadcast %cst_97 : f32 to vector<2x48xf32>
    %319 = arith.addf %318, %317 : vector<2x48xf32>
    %320 = arith.divf %318, %319 : vector<2x48xf32>
    %321 = vector.extract_strided_slice %320 {offsets = [0, 0], sizes = [2, 16], strides = [1, 1]} : vector<2x48xf32> to vector<2x16xf32>
    %322 = vector.extract_strided_slice %320 {offsets = [0, 16], sizes = [2, 16], strides = [1, 1]} : vector<2x48xf32> to vector<2x16xf32>
    %323 = vector.extract_strided_slice %320 {offsets = [0, 32], sizes = [2, 16], strides = [1, 1]} : vector<2x48xf32> to vector<2x16xf32>
    %324 = vector.extract_strided_slice %314 {offsets = [0, 48], sizes = [2, 16], strides = [1, 1]} : vector<2x64xf32> to vector<2x16xf32>
    %325 = math.tanh %324 : vector<2x16xf32>
    %326 = arith.mulf %322, %307 : vector<2x16xf32>
    %327 = arith.mulf %321, %325 : vector<2x16xf32>
    %328 = arith.addf %326, %327 : vector<2x16xf32>
    %329 = math.tanh %328 : vector<2x16xf32>
    %330 = arith.mulf %323, %329 : vector<2x16xf32>
    %c12_98 = arith.constant 12 : index
    %c0_99 = arith.constant 0 : index
    %331 = vector.load %arg18[%c12_98, %c0_99] : memref<16x32xf32, #tpu.memory_space<vmem>>, vector<2x16xf32>
    tpu.vector_store %arg18[%c12_98, %c0_99], %330 {strides = array<i32>} : memref<16x32xf32, #tpu.memory_space<vmem>>, vector<2x16xf32>,
    %c2_100 = arith.constant 2 : index
    %c16_101 = arith.constant 16 : index
    %332 = vector.load %arg18[%c2_100, %c16_101] : memref<16x32xf32, #tpu.memory_space<vmem>>, vector<2x16xf32>
    tpu.vector_store %arg18[%c2_100, %c16_101], %330 {strides = array<i32>} : memref<16x32xf32, #tpu.memory_space<vmem>>, vector<2x16xf32>,
    %cst_102 = arith.constant dense<0.000000e+00> : vector<2x64xf32>
    %333 = tpu.matmul %330, %183, %cst_102 {dimension_numbers = #tpu.dot_dimension_numbers<[1], [0], [0], [1], [0, 0, 1, 1], [], []>} : vector<2x16xf32>, vector<16x64xf32>, vector<2x64xf32> -> vector<2x64xf32>
    %334 = vector.extract_strided_slice %182 {offsets = [14, 0], sizes = [2, 64], strides = [1, 1]} : vector<16x64xf32> to vector<2x64xf32>
    %335 = arith.addf %333, %334 : vector<2x64xf32>
    %336 = vector.extract_strided_slice %335 {offsets = [0, 0], sizes = [2, 48], strides = [1, 1]} : vector<2x64xf32> to vector<2x48xf32>
    %337 = arith.negf %336 : vector<2x48xf32>
    %338 = math.exp %337 : vector<2x48xf32>
    %cst_103 = arith.constant 1.000000e+00 : f32
    %339 = vector.broadcast %cst_103 : f32 to vector<2x48xf32>
    %340 = arith.addf %339, %338 : vector<2x48xf32>
    %341 = arith.divf %339, %340 : vector<2x48xf32>
    %342 = vector.extract_strided_slice %341 {offsets = [0, 0], sizes = [2, 16], strides = [1, 1]} : vector<2x48xf32> to vector<2x16xf32>
    %343 = vector.extract_strided_slice %341 {offsets = [0, 16], sizes = [2, 16], strides = [1, 1]} : vector<2x48xf32> to vector<2x16xf32>
    %344 = vector.extract_strided_slice %341 {offsets = [0, 32], sizes = [2, 16], strides = [1, 1]} : vector<2x48xf32> to vector<2x16xf32>
    %345 = vector.extract_strided_slice %335 {offsets = [0, 48], sizes = [2, 16], strides = [1, 1]} : vector<2x64xf32> to vector<2x16xf32>
    %346 = math.tanh %345 : vector<2x16xf32>
    %347 = arith.mulf %343, %328 : vector<2x16xf32>
    %348 = arith.mulf %342, %346 : vector<2x16xf32>
    %349 = arith.addf %347, %348 : vector<2x16xf32>
    %350 = math.tanh %349 : vector<2x16xf32>
    %351 = arith.mulf %344, %350 : vector<2x16xf32>
    %c14_104 = arith.constant 14 : index
    %c0_105 = arith.constant 0 : index
    %352 = vector.load %arg18[%c14_104, %c0_105] : memref<16x32xf32, #tpu.memory_space<vmem>>, vector<2x16xf32>
    tpu.vector_store %arg18[%c14_104, %c0_105], %351 {strides = array<i32>} : memref<16x32xf32, #tpu.memory_space<vmem>>, vector<2x16xf32>,
    %c0_106 = arith.constant 0 : index
    %c16_107 = arith.constant 16 : index
    %353 = vector.load %arg18[%c0_106, %c16_107] : memref<16x32xf32, #tpu.memory_space<vmem>>, vector<2x16xf32>
    tpu.vector_store %arg18[%c0_106, %c16_107], %351 {strides = array<i32>} : memref<16x32xf32, #tpu.memory_space<vmem>>, vector<2x16xf32>,
    %c0_108 = arith.constant 0 : index
    %c0_109 = arith.constant 0 : index
    %354 = vector.load %arg18[%c0_108, %c0_109] : memref<16x32xf32, #tpu.memory_space<vmem>>, vector<16x32xf32>
    %c0_110 = arith.constant 0 : index
    %c0_111 = arith.constant 0 : index
    %355 = vector.load %arg7[%c0_110, %c0_111] : memref<32x64xf32, #tpu.memory_space<vmem>>, vector<32x64xf32>
    %cst_112 = arith.constant dense<0.000000e+00> : vector<16x64xf32>
    %356 = tpu.matmul %354, %355, %cst_112 {dimension_numbers = #tpu.dot_dimension_numbers<[1], [0], [0], [1], [0, 0, 1, 1], [], []>} : vector<16x32xf32>, vector<32x64xf32>, vector<16x64xf32> -> vector<16x64xf32>
    %c0_113 = arith.constant 0 : index
    %c0_114 = arith.constant 0 : index
    %357 = vector.load %arg9[%c0_113, %c0_114] : memref<1x64xf32, #tpu.memory_space<vmem>>, vector<1x64xf32>
    %358 = vector.broadcast %357 : vector<1x64xf32> to vector<16x64xf32>
    %359 = arith.addf %356, %358 : vector<16x64xf32>
    %c0_115 = arith.constant 0 : index
    %c0_116 = arith.constant 0 : index
    %360 = vector.load %arg8[%c0_115, %c0_116] : memref<16x64xf32, #tpu.memory_space<vmem>>, vector<16x64xf32>
    %cst_117 = arith.constant 0.000000e+00 : f32
    %361 = vector.broadcast %cst_117 : f32 to vector<2x16xf32>
    %cst_118 = arith.constant 0.000000e+00 : f32
    %362 = vector.broadcast %cst_118 : f32 to vector<2x16xf32>
    %cst_119 = arith.constant dense<0.000000e+00> : vector<2x64xf32>
    %363 = tpu.matmul %361, %360, %cst_119 {dimension_numbers = #tpu.dot_dimension_numbers<[1], [0], [0], [1], [0, 0, 1, 1], [], []>} : vector<2x16xf32>, vector<16x64xf32>, vector<2x64xf32> -> vector<2x64xf32>
    %364 = vector.extract_strided_slice %359 {offsets = [0, 0], sizes = [2, 64], strides = [1, 1]} : vector<16x64xf32> to vector<2x64xf32>
    %365 = arith.addf %363, %364 : vector<2x64xf32>
    %366 = vector.extract_strided_slice %365 {offsets = [0, 0], sizes = [2, 48], strides = [1, 1]} : vector<2x64xf32> to vector<2x48xf32>
    %367 = arith.negf %366 : vector<2x48xf32>
    %368 = math.exp %367 : vector<2x48xf32>
    %cst_120 = arith.constant 1.000000e+00 : f32
    %369 = vector.broadcast %cst_120 : f32 to vector<2x48xf32>
    %370 = arith.addf %369, %368 : vector<2x48xf32>
    %371 = arith.divf %369, %370 : vector<2x48xf32>
    %372 = vector.extract_strided_slice %371 {offsets = [0, 0], sizes = [2, 16], strides = [1, 1]} : vector<2x48xf32> to vector<2x16xf32>
    %373 = vector.extract_strided_slice %371 {offsets = [0, 16], sizes = [2, 16], strides = [1, 1]} : vector<2x48xf32> to vector<2x16xf32>
    %374 = vector.extract_strided_slice %371 {offsets = [0, 32], sizes = [2, 16], strides = [1, 1]} : vector<2x48xf32> to vector<2x16xf32>
    %375 = vector.extract_strided_slice %365 {offsets = [0, 48], sizes = [2, 16], strides = [1, 1]} : vector<2x64xf32> to vector<2x16xf32>
    %376 = math.tanh %375 : vector<2x16xf32>
    %377 = arith.mulf %373, %362 : vector<2x16xf32>
    %378 = arith.mulf %372, %376 : vector<2x16xf32>
    %379 = arith.addf %377, %378 : vector<2x16xf32>
    %380 = math.tanh %379 : vector<2x16xf32>
    %381 = arith.mulf %374, %380 : vector<2x16xf32>
    %382 = vector.extract_strided_slice %381 {offsets = [0, 0], sizes = [2, 8], strides = [1, 1]} : vector<2x16xf32> to vector<2x8xf32>
    %c0_121 = arith.constant 0 : index
    %c0_122 = arith.constant 0 : index
    %383 = vector.load %arg19[%c0_121, %c0_122] : memref<2x128xf32, #tpu.memory_space<vmem>>, vector<2x8xf32>
    tpu.vector_store %arg19[%c0_121, %c0_122], %382 {strides = array<i32>} : memref<2x128xf32, #tpu.memory_space<vmem>>, vector<2x8xf32>,
    %384 = vector.extract_strided_slice %381 {offsets = [0, 8], sizes = [2, 8], strides = [1, 1]} : vector<2x16xf32> to vector<2x8xf32>
    %c0_123 = arith.constant 0 : index
    %c120 = arith.constant 120 : index
    %385 = vector.load %arg19[%c0_123, %c120] : memref<2x128xf32, #tpu.memory_space<vmem>>, vector<2x8xf32>
    tpu.vector_store %arg19[%c0_123, %c120], %384 {strides = array<i32>} : memref<2x128xf32, #tpu.memory_space<vmem>>, vector<2x8xf32>,
    %cst_124 = arith.constant dense<0.000000e+00> : vector<2x64xf32>
    %386 = tpu.matmul %381, %360, %cst_124 {dimension_numbers = #tpu.dot_dimension_numbers<[1], [0], [0], [1], [0, 0, 1, 1], [], []>} : vector<2x16xf32>, vector<16x64xf32>, vector<2x64xf32> -> vector<2x64xf32>
    %387 = vector.extract_strided_slice %359 {offsets = [2, 0], sizes = [2, 64], strides = [1, 1]} : vector<16x64xf32> to vector<2x64xf32>
    %388 = arith.addf %386, %387 : vector<2x64xf32>
    %389 = vector.extract_strided_slice %388 {offsets = [0, 0], sizes = [2, 48], strides = [1, 1]} : vector<2x64xf32> to vector<2x48xf32>
    %390 = arith.negf %389 : vector<2x48xf32>
    %391 = math.exp %390 : vector<2x48xf32>
    %cst_125 = arith.constant 1.000000e+00 : f32
    %392 = vector.broadcast %cst_125 : f32 to vector<2x48xf32>
    %393 = arith.addf %392, %391 : vector<2x48xf32>
    %394 = arith.divf %392, %393 : vector<2x48xf32>
    %395 = vector.extract_strided_slice %394 {offsets = [0, 0], sizes = [2, 16], strides = [1, 1]} : vector<2x48xf32> to vector<2x16xf32>
    %396 = vector.extract_strided_slice %394 {offsets = [0, 16], sizes = [2, 16], strides = [1, 1]} : vector<2x48xf32> to vector<2x16xf32>
    %397 = vector.extract_strided_slice %394 {offsets = [0, 32], sizes = [2, 16], strides = [1, 1]} : vector<2x48xf32> to vector<2x16xf32>
    %398 = vector.extract_strided_slice %388 {offsets = [0, 48], sizes = [2, 16], strides = [1, 1]} : vector<2x64xf32> to vector<2x16xf32>
    %399 = math.tanh %398 : vector<2x16xf32>
    %400 = arith.mulf %396, %379 : vector<2x16xf32>
    %401 = arith.mulf %395, %399 : vector<2x16xf32>
    %402 = arith.addf %400, %401 : vector<2x16xf32>
    %403 = math.tanh %402 : vector<2x16xf32>
    %404 = arith.mulf %397, %403 : vector<2x16xf32>
    %405 = vector.extract_strided_slice %404 {offsets = [0, 0], sizes = [2, 8], strides = [1, 1]} : vector<2x16xf32> to vector<2x8xf32>
    %c0_126 = arith.constant 0 : index
    %c16_127 = arith.constant 16 : index
    %406 = vector.load %arg19[%c0_126, %c16_127] : memref<2x128xf32, #tpu.memory_space<vmem>>, vector<2x8xf32>
    tpu.vector_store %arg19[%c0_126, %c16_127], %405 {strides = array<i32>} : memref<2x128xf32, #tpu.memory_space<vmem>>, vector<2x8xf32>,
    %407 = vector.extract_strided_slice %404 {offsets = [0, 8], sizes = [2, 8], strides = [1, 1]} : vector<2x16xf32> to vector<2x8xf32>
    %c0_128 = arith.constant 0 : index
    %c104 = arith.constant 104 : index
    %408 = vector.load %arg19[%c0_128, %c104] : memref<2x128xf32, #tpu.memory_space<vmem>>, vector<2x8xf32>
    tpu.vector_store %arg19[%c0_128, %c104], %407 {strides = array<i32>} : memref<2x128xf32, #tpu.memory_space<vmem>>, vector<2x8xf32>,
    %cst_129 = arith.constant dense<0.000000e+00> : vector<2x64xf32>
    %409 = tpu.matmul %404, %360, %cst_129 {dimension_numbers = #tpu.dot_dimension_numbers<[1], [0], [0], [1], [0, 0, 1, 1], [], []>} : vector<2x16xf32>, vector<16x64xf32>, vector<2x64xf32> -> vector<2x64xf32>
    %410 = vector.extract_strided_slice %359 {offsets = [4, 0], sizes = [2, 64], strides = [1, 1]} : vector<16x64xf32> to vector<2x64xf32>
    %411 = arith.addf %409, %410 : vector<2x64xf32>
    %412 = vector.extract_strided_slice %411 {offsets = [0, 0], sizes = [2, 48], strides = [1, 1]} : vector<2x64xf32> to vector<2x48xf32>
    %413 = arith.negf %412 : vector<2x48xf32>
    %414 = math.exp %413 : vector<2x48xf32>
    %cst_130 = arith.constant 1.000000e+00 : f32
    %415 = vector.broadcast %cst_130 : f32 to vector<2x48xf32>
    %416 = arith.addf %415, %414 : vector<2x48xf32>
    %417 = arith.divf %415, %416 : vector<2x48xf32>
    %418 = vector.extract_strided_slice %417 {offsets = [0, 0], sizes = [2, 16], strides = [1, 1]} : vector<2x48xf32> to vector<2x16xf32>
    %419 = vector.extract_strided_slice %417 {offsets = [0, 16], sizes = [2, 16], strides = [1, 1]} : vector<2x48xf32> to vector<2x16xf32>
    %420 = vector.extract_strided_slice %417 {offsets = [0, 32], sizes = [2, 16], strides = [1, 1]} : vector<2x48xf32> to vector<2x16xf32>
    %421 = vector.extract_strided_slice %411 {offsets = [0, 48], sizes = [2, 16], strides = [1, 1]} : vector<2x64xf32> to vector<2x16xf32>
    %422 = math.tanh %421 : vector<2x16xf32>
    %423 = arith.mulf %419, %402 : vector<2x16xf32>
    %424 = arith.mulf %418, %422 : vector<2x16xf32>
    %425 = arith.addf %423, %424 : vector<2x16xf32>
    %426 = math.tanh %425 : vector<2x16xf32>
    %427 = arith.mulf %420, %426 : vector<2x16xf32>
    %428 = vector.extract_strided_slice %427 {offsets = [0, 0], sizes = [2, 8], strides = [1, 1]} : vector<2x16xf32> to vector<2x8xf32>
    %c0_131 = arith.constant 0 : index
    %c32 = arith.constant 32 : index
    %429 = vector.load %arg19[%c0_131, %c32] : memref<2x128xf32, #tpu.memory_space<vmem>>, vector<2x8xf32>
    tpu.vector_store %arg19[%c0_131, %c32], %428 {strides = array<i32>} : memref<2x128xf32, #tpu.memory_space<vmem>>, vector<2x8xf32>,
    %430 = vector.extract_strided_slice %427 {offsets = [0, 8], sizes = [2, 8], strides = [1, 1]} : vector<2x16xf32> to vector<2x8xf32>
    %c0_132 = arith.constant 0 : index
    %c88 = arith.constant 88 : index
    %431 = vector.load %arg19[%c0_132, %c88] : memref<2x128xf32, #tpu.memory_space<vmem>>, vector<2x8xf32>
    tpu.vector_store %arg19[%c0_132, %c88], %430 {strides = array<i32>} : memref<2x128xf32, #tpu.memory_space<vmem>>, vector<2x8xf32>,
    %cst_133 = arith.constant dense<0.000000e+00> : vector<2x64xf32>
    %432 = tpu.matmul %427, %360, %cst_133 {dimension_numbers = #tpu.dot_dimension_numbers<[1], [0], [0], [1], [0, 0, 1, 1], [], []>} : vector<2x16xf32>, vector<16x64xf32>, vector<2x64xf32> -> vector<2x64xf32>
    %433 = vector.extract_strided_slice %359 {offsets = [6, 0], sizes = [2, 64], strides = [1, 1]} : vector<16x64xf32> to vector<2x64xf32>
    %434 = arith.addf %432, %433 : vector<2x64xf32>
    %435 = vector.extract_strided_slice %434 {offsets = [0, 0], sizes = [2, 48], strides = [1, 1]} : vector<2x64xf32> to vector<2x48xf32>
    %436 = arith.negf %435 : vector<2x48xf32>
    %437 = math.exp %436 : vector<2x48xf32>
    %cst_134 = arith.constant 1.000000e+00 : f32
    %438 = vector.broadcast %cst_134 : f32 to vector<2x48xf32>
    %439 = arith.addf %438, %437 : vector<2x48xf32>
    %440 = arith.divf %438, %439 : vector<2x48xf32>
    %441 = vector.extract_strided_slice %440 {offsets = [0, 0], sizes = [2, 16], strides = [1, 1]} : vector<2x48xf32> to vector<2x16xf32>
    %442 = vector.extract_strided_slice %440 {offsets = [0, 16], sizes = [2, 16], strides = [1, 1]} : vector<2x48xf32> to vector<2x16xf32>
    %443 = vector.extract_strided_slice %440 {offsets = [0, 32], sizes = [2, 16], strides = [1, 1]} : vector<2x48xf32> to vector<2x16xf32>
    %444 = vector.extract_strided_slice %434 {offsets = [0, 48], sizes = [2, 16], strides = [1, 1]} : vector<2x64xf32> to vector<2x16xf32>
    %445 = math.tanh %444 : vector<2x16xf32>
    %446 = arith.mulf %442, %425 : vector<2x16xf32>
    %447 = arith.mulf %441, %445 : vector<2x16xf32>
    %448 = arith.addf %446, %447 : vector<2x16xf32>
    %449 = math.tanh %448 : vector<2x16xf32>
    %450 = arith.mulf %443, %449 : vector<2x16xf32>
    %451 = vector.extract_strided_slice %450 {offsets = [0, 0], sizes = [2, 8], strides = [1, 1]} : vector<2x16xf32> to vector<2x8xf32>
    %c0_135 = arith.constant 0 : index
    %c48 = arith.constant 48 : index
    %452 = vector.load %arg19[%c0_135, %c48] : memref<2x128xf32, #tpu.memory_space<vmem>>, vector<2x8xf32>
    tpu.vector_store %arg19[%c0_135, %c48], %451 {strides = array<i32>} : memref<2x128xf32, #tpu.memory_space<vmem>>, vector<2x8xf32>,
    %453 = vector.extract_strided_slice %450 {offsets = [0, 8], sizes = [2, 8], strides = [1, 1]} : vector<2x16xf32> to vector<2x8xf32>
    %c0_136 = arith.constant 0 : index
    %c72 = arith.constant 72 : index
    %454 = vector.load %arg19[%c0_136, %c72] : memref<2x128xf32, #tpu.memory_space<vmem>>, vector<2x8xf32>
    tpu.vector_store %arg19[%c0_136, %c72], %453 {strides = array<i32>} : memref<2x128xf32, #tpu.memory_space<vmem>>, vector<2x8xf32>,
    %cst_137 = arith.constant dense<0.000000e+00> : vector<2x64xf32>
    %455 = tpu.matmul %450, %360, %cst_137 {dimension_numbers = #tpu.dot_dimension_numbers<[1], [0], [0], [1], [0, 0, 1, 1], [], []>} : vector<2x16xf32>, vector<16x64xf32>, vector<2x64xf32> -> vector<2x64xf32>
    %456 = vector.extract_strided_slice %359 {offsets = [8, 0], sizes = [2, 64], strides = [1, 1]} : vector<16x64xf32> to vector<2x64xf32>
    %457 = arith.addf %455, %456 : vector<2x64xf32>
    %458 = vector.extract_strided_slice %457 {offsets = [0, 0], sizes = [2, 48], strides = [1, 1]} : vector<2x64xf32> to vector<2x48xf32>
    %459 = arith.negf %458 : vector<2x48xf32>
    %460 = math.exp %459 : vector<2x48xf32>
    %cst_138 = arith.constant 1.000000e+00 : f32
    %461 = vector.broadcast %cst_138 : f32 to vector<2x48xf32>
    %462 = arith.addf %461, %460 : vector<2x48xf32>
    %463 = arith.divf %461, %462 : vector<2x48xf32>
    %464 = vector.extract_strided_slice %463 {offsets = [0, 0], sizes = [2, 16], strides = [1, 1]} : vector<2x48xf32> to vector<2x16xf32>
    %465 = vector.extract_strided_slice %463 {offsets = [0, 16], sizes = [2, 16], strides = [1, 1]} : vector<2x48xf32> to vector<2x16xf32>
    %466 = vector.extract_strided_slice %463 {offsets = [0, 32], sizes = [2, 16], strides = [1, 1]} : vector<2x48xf32> to vector<2x16xf32>
    %467 = vector.extract_strided_slice %457 {offsets = [0, 48], sizes = [2, 16], strides = [1, 1]} : vector<2x64xf32> to vector<2x16xf32>
    %468 = math.tanh %467 : vector<2x16xf32>
    %469 = arith.mulf %465, %448 : vector<2x16xf32>
    %470 = arith.mulf %464, %468 : vector<2x16xf32>
    %471 = arith.addf %469, %470 : vector<2x16xf32>
    %472 = math.tanh %471 : vector<2x16xf32>
    %473 = arith.mulf %466, %472 : vector<2x16xf32>
    %474 = vector.extract_strided_slice %473 {offsets = [0, 0], sizes = [2, 8], strides = [1, 1]} : vector<2x16xf32> to vector<2x8xf32>
    %c0_139 = arith.constant 0 : index
    %c64 = arith.constant 64 : index
    %475 = vector.load %arg19[%c0_139, %c64] : memref<2x128xf32, #tpu.memory_space<vmem>>, vector<2x8xf32>
    tpu.vector_store %arg19[%c0_139, %c64], %474 {strides = array<i32>} : memref<2x128xf32, #tpu.memory_space<vmem>>, vector<2x8xf32>,
    %476 = vector.extract_strided_slice %473 {offsets = [0, 8], sizes = [2, 8], strides = [1, 1]} : vector<2x16xf32> to vector<2x8xf32>
    %c0_140 = arith.constant 0 : index
    %c56 = arith.constant 56 : index
    %477 = vector.load %arg19[%c0_140, %c56] : memref<2x128xf32, #tpu.memory_space<vmem>>, vector<2x8xf32>
    tpu.vector_store %arg19[%c0_140, %c56], %476 {strides = array<i32>} : memref<2x128xf32, #tpu.memory_space<vmem>>, vector<2x8xf32>,
    %cst_141 = arith.constant dense<0.000000e+00> : vector<2x64xf32>
    %478 = tpu.matmul %473, %360, %cst_141 {dimension_numbers = #tpu.dot_dimension_numbers<[1], [0], [0], [1], [0, 0, 1, 1], [], []>} : vector<2x16xf32>, vector<16x64xf32>, vector<2x64xf32> -> vector<2x64xf32>
    %479 = vector.extract_strided_slice %359 {offsets = [10, 0], sizes = [2, 64], strides = [1, 1]} : vector<16x64xf32> to vector<2x64xf32>
    %480 = arith.addf %478, %479 : vector<2x64xf32>
    %481 = vector.extract_strided_slice %480 {offsets = [0, 0], sizes = [2, 48], strides = [1, 1]} : vector<2x64xf32> to vector<2x48xf32>
    %482 = arith.negf %481 : vector<2x48xf32>
    %483 = math.exp %482 : vector<2x48xf32>
    %cst_142 = arith.constant 1.000000e+00 : f32
    %484 = vector.broadcast %cst_142 : f32 to vector<2x48xf32>
    %485 = arith.addf %484, %483 : vector<2x48xf32>
    %486 = arith.divf %484, %485 : vector<2x48xf32>
    %487 = vector.extract_strided_slice %486 {offsets = [0, 0], sizes = [2, 16], strides = [1, 1]} : vector<2x48xf32> to vector<2x16xf32>
    %488 = vector.extract_strided_slice %486 {offsets = [0, 16], sizes = [2, 16], strides = [1, 1]} : vector<2x48xf32> to vector<2x16xf32>
    %489 = vector.extract_strided_slice %486 {offsets = [0, 32], sizes = [2, 16], strides = [1, 1]} : vector<2x48xf32> to vector<2x16xf32>
    %490 = vector.extract_strided_slice %480 {offsets = [0, 48], sizes = [2, 16], strides = [1, 1]} : vector<2x64xf32> to vector<2x16xf32>
    %491 = math.tanh %490 : vector<2x16xf32>
    %492 = arith.mulf %488, %471 : vector<2x16xf32>
    %493 = arith.mulf %487, %491 : vector<2x16xf32>
    %494 = arith.addf %492, %493 : vector<2x16xf32>
    %495 = math.tanh %494 : vector<2x16xf32>
    %496 = arith.mulf %489, %495 : vector<2x16xf32>
    %497 = vector.extract_strided_slice %496 {offsets = [0, 0], sizes = [2, 8], strides = [1, 1]} : vector<2x16xf32> to vector<2x8xf32>
    %c0_143 = arith.constant 0 : index
    %c80 = arith.constant 80 : index
    %498 = vector.load %arg19[%c0_143, %c80] : memref<2x128xf32, #tpu.memory_space<vmem>>, vector<2x8xf32>
    tpu.vector_store %arg19[%c0_143, %c80], %497 {strides = array<i32>} : memref<2x128xf32, #tpu.memory_space<vmem>>, vector<2x8xf32>,
    %499 = vector.extract_strided_slice %496 {offsets = [0, 8], sizes = [2, 8], strides = [1, 1]} : vector<2x16xf32> to vector<2x8xf32>
    %c0_144 = arith.constant 0 : index
    %c40 = arith.constant 40 : index
    %500 = vector.load %arg19[%c0_144, %c40] : memref<2x128xf32, #tpu.memory_space<vmem>>, vector<2x8xf32>
    tpu.vector_store %arg19[%c0_144, %c40], %499 {strides = array<i32>} : memref<2x128xf32, #tpu.memory_space<vmem>>, vector<2x8xf32>,
    %cst_145 = arith.constant dense<0.000000e+00> : vector<2x64xf32>
    %501 = tpu.matmul %496, %360, %cst_145 {dimension_numbers = #tpu.dot_dimension_numbers<[1], [0], [0], [1], [0, 0, 1, 1], [], []>} : vector<2x16xf32>, vector<16x64xf32>, vector<2x64xf32> -> vector<2x64xf32>
    %502 = vector.extract_strided_slice %359 {offsets = [12, 0], sizes = [2, 64], strides = [1, 1]} : vector<16x64xf32> to vector<2x64xf32>
    %503 = arith.addf %501, %502 : vector<2x64xf32>
    %504 = vector.extract_strided_slice %503 {offsets = [0, 0], sizes = [2, 48], strides = [1, 1]} : vector<2x64xf32> to vector<2x48xf32>
    %505 = arith.negf %504 : vector<2x48xf32>
    %506 = math.exp %505 : vector<2x48xf32>
    %cst_146 = arith.constant 1.000000e+00 : f32
    %507 = vector.broadcast %cst_146 : f32 to vector<2x48xf32>
    %508 = arith.addf %507, %506 : vector<2x48xf32>
    %509 = arith.divf %507, %508 : vector<2x48xf32>
    %510 = vector.extract_strided_slice %509 {offsets = [0, 0], sizes = [2, 16], strides = [1, 1]} : vector<2x48xf32> to vector<2x16xf32>
    %511 = vector.extract_strided_slice %509 {offsets = [0, 16], sizes = [2, 16], strides = [1, 1]} : vector<2x48xf32> to vector<2x16xf32>
    %512 = vector.extract_strided_slice %509 {offsets = [0, 32], sizes = [2, 16], strides = [1, 1]} : vector<2x48xf32> to vector<2x16xf32>
    %513 = vector.extract_strided_slice %503 {offsets = [0, 48], sizes = [2, 16], strides = [1, 1]} : vector<2x64xf32> to vector<2x16xf32>
    %514 = math.tanh %513 : vector<2x16xf32>
    %515 = arith.mulf %511, %494 : vector<2x16xf32>
    %516 = arith.mulf %510, %514 : vector<2x16xf32>
    %517 = arith.addf %515, %516 : vector<2x16xf32>
    %518 = math.tanh %517 : vector<2x16xf32>
    %519 = arith.mulf %512, %518 : vector<2x16xf32>
    %520 = vector.extract_strided_slice %519 {offsets = [0, 0], sizes = [2, 8], strides = [1, 1]} : vector<2x16xf32> to vector<2x8xf32>
    %c0_147 = arith.constant 0 : index
    %c96 = arith.constant 96 : index
    %521 = vector.load %arg19[%c0_147, %c96] : memref<2x128xf32, #tpu.memory_space<vmem>>, vector<2x8xf32>
    tpu.vector_store %arg19[%c0_147, %c96], %520 {strides = array<i32>} : memref<2x128xf32, #tpu.memory_space<vmem>>, vector<2x8xf32>,
    %522 = vector.extract_strided_slice %519 {offsets = [0, 8], sizes = [2, 8], strides = [1, 1]} : vector<2x16xf32> to vector<2x8xf32>
    %c0_148 = arith.constant 0 : index
    %c24 = arith.constant 24 : index
    %523 = vector.load %arg19[%c0_148, %c24] : memref<2x128xf32, #tpu.memory_space<vmem>>, vector<2x8xf32>
    tpu.vector_store %arg19[%c0_148, %c24], %522 {strides = array<i32>} : memref<2x128xf32, #tpu.memory_space<vmem>>, vector<2x8xf32>,
    %cst_149 = arith.constant dense<0.000000e+00> : vector<2x64xf32>
    %524 = tpu.matmul %519, %360, %cst_149 {dimension_numbers = #tpu.dot_dimension_numbers<[1], [0], [0], [1], [0, 0, 1, 1], [], []>} : vector<2x16xf32>, vector<16x64xf32>, vector<2x64xf32> -> vector<2x64xf32>
    %525 = vector.extract_strided_slice %359 {offsets = [14, 0], sizes = [2, 64], strides = [1, 1]} : vector<16x64xf32> to vector<2x64xf32>
    %526 = arith.addf %524, %525 : vector<2x64xf32>
    %527 = vector.extract_strided_slice %526 {offsets = [0, 0], sizes = [2, 48], strides = [1, 1]} : vector<2x64xf32> to vector<2x48xf32>
    %528 = arith.negf %527 : vector<2x48xf32>
    %529 = math.exp %528 : vector<2x48xf32>
    %cst_150 = arith.constant 1.000000e+00 : f32
    %530 = vector.broadcast %cst_150 : f32 to vector<2x48xf32>
    %531 = arith.addf %530, %529 : vector<2x48xf32>
    %532 = arith.divf %530, %531 : vector<2x48xf32>
    %533 = vector.extract_strided_slice %532 {offsets = [0, 0], sizes = [2, 16], strides = [1, 1]} : vector<2x48xf32> to vector<2x16xf32>
    %534 = vector.extract_strided_slice %532 {offsets = [0, 16], sizes = [2, 16], strides = [1, 1]} : vector<2x48xf32> to vector<2x16xf32>
    %535 = vector.extract_strided_slice %532 {offsets = [0, 32], sizes = [2, 16], strides = [1, 1]} : vector<2x48xf32> to vector<2x16xf32>
    %536 = vector.extract_strided_slice %526 {offsets = [0, 48], sizes = [2, 16], strides = [1, 1]} : vector<2x64xf32> to vector<2x16xf32>
    %537 = math.tanh %536 : vector<2x16xf32>
    %538 = arith.mulf %534, %517 : vector<2x16xf32>
    %539 = arith.mulf %533, %537 : vector<2x16xf32>
    %540 = arith.addf %538, %539 : vector<2x16xf32>
    %541 = math.tanh %540 : vector<2x16xf32>
    %542 = arith.mulf %535, %541 : vector<2x16xf32>
    %543 = vector.extract_strided_slice %542 {offsets = [0, 0], sizes = [2, 8], strides = [1, 1]} : vector<2x16xf32> to vector<2x8xf32>
    %c0_151 = arith.constant 0 : index
    %c112 = arith.constant 112 : index
    %544 = vector.load %arg19[%c0_151, %c112] : memref<2x128xf32, #tpu.memory_space<vmem>>, vector<2x8xf32>
    tpu.vector_store %arg19[%c0_151, %c112], %543 {strides = array<i32>} : memref<2x128xf32, #tpu.memory_space<vmem>>, vector<2x8xf32>,
    %545 = vector.extract_strided_slice %542 {offsets = [0, 8], sizes = [2, 8], strides = [1, 1]} : vector<2x16xf32> to vector<2x8xf32>
    %c0_152 = arith.constant 0 : index
    %c8_153 = arith.constant 8 : index
    %546 = vector.load %arg19[%c0_152, %c8_153] : memref<2x128xf32, #tpu.memory_space<vmem>>, vector<2x8xf32>
    tpu.vector_store %arg19[%c0_152, %c8_153], %545 {strides = array<i32>} : memref<2x128xf32, #tpu.memory_space<vmem>>, vector<2x8xf32>,
    %c0_154 = arith.constant 0 : index
    %c0_155 = arith.constant 0 : index
    %547 = vector.load %arg19[%c0_154, %c0_155] : memref<2x128xf32, #tpu.memory_space<vmem>>, vector<2x128xf32>
    %c0_156 = arith.constant 0 : index
    %c0_157 = arith.constant 0 : index
    %548 = vector.load %arg10[%c0_156, %c0_157] : memref<128x32xf32, #tpu.memory_space<vmem>>, vector<128x32xf32>
    %cst_158 = arith.constant dense<0.000000e+00> : vector<2x32xf32>
    %549 = tpu.matmul %547, %548, %cst_158 {dimension_numbers = #tpu.dot_dimension_numbers<[1], [0], [0], [1], [0, 0, 1, 1], [], []>} : vector<2x128xf32>, vector<128x32xf32>, vector<2x32xf32> -> vector<2x32xf32>
    %c0_159 = arith.constant 0 : index
    %c0_160 = arith.constant 0 : index
    %550 = vector.load %arg11[%c0_159, %c0_160] : memref<1x32xf32, #tpu.memory_space<vmem>>, vector<1x32xf32>
    %551 = vector.broadcast %550 : vector<1x32xf32> to vector<2x32xf32>
    %552 = arith.addf %549, %551 : vector<2x32xf32>
    %cst_161 = arith.constant 0.000000e+00 : f32
    %553 = vector.broadcast %cst_161 : f32 to vector<2x32xf32>
    %554 = arith.maximumf %552, %553 : vector<2x32xf32>
    %c0_162 = arith.constant 0 : index
    %c0_163 = arith.constant 0 : index
    %555 = vector.load %arg12[%c0_162, %c0_163] : memref<32x32xf32, #tpu.memory_space<vmem>>, vector<32x32xf32>
    %cst_164 = arith.constant dense<0.000000e+00> : vector<2x32xf32>
    %556 = tpu.matmul %554, %555, %cst_164 {dimension_numbers = #tpu.dot_dimension_numbers<[1], [0], [0], [1], [0, 0, 1, 1], [], []>} : vector<2x32xf32>, vector<32x32xf32>, vector<2x32xf32> -> vector<2x32xf32>
    %c0_165 = arith.constant 0 : index
    %c0_166 = arith.constant 0 : index
    %557 = vector.load %arg13[%c0_165, %c0_166] : memref<1x32xf32, #tpu.memory_space<vmem>>, vector<1x32xf32>
    %558 = vector.broadcast %557 : vector<1x32xf32> to vector<2x32xf32>
    %559 = arith.addf %556, %558 : vector<2x32xf32>
    %cst_167 = arith.constant 0.000000e+00 : f32
    %560 = vector.broadcast %cst_167 : f32 to vector<2x32xf32>
    %561 = arith.maximumf %559, %560 : vector<2x32xf32>
    %c0_168 = arith.constant 0 : index
    %c0_169 = arith.constant 0 : index
    %562 = vector.load %arg14[%c0_168, %c0_169] : memref<32x5xf32, #tpu.memory_space<vmem>>, vector<32x5xf32>
    %cst_170 = arith.constant dense<0.000000e+00> : vector<2x5xf32>
    %563 = tpu.matmul %561, %562, %cst_170 {dimension_numbers = #tpu.dot_dimension_numbers<[1], [0], [0], [1], [0, 0, 1, 1], [], []>} : vector<2x32xf32>, vector<32x5xf32>, vector<2x5xf32> -> vector<2x5xf32>
    %c0_171 = arith.constant 0 : index
    %c0_172 = arith.constant 0 : index
    %564 = vector.load %arg15[%c0_171, %c0_172] : memref<1x5xf32, #tpu.memory_space<vmem>>, vector<1x5xf32>
    %565 = vector.broadcast %564 : vector<1x5xf32> to vector<2x5xf32>
    %566 = arith.addf %563, %565 : vector<2x5xf32>
    %cst_173 = arith.constant dense<0xFF800000> : vector<2xf32>
    %567 = vector.multi_reduction <maximumf>, %566, %cst_173 [1] : vector<2x5xf32> to vector<2xf32>
    %568 = vector.shape_cast %567 : vector<2xf32> to vector<2x1xf32>
    %569 = vector.broadcast %568 : vector<2x1xf32> to vector<2x5xf32>
    %570 = arith.subf %566, %569 : vector<2x5xf32>
    %571 = math.exp %570 : vector<2x5xf32>
    %cst_174 = arith.constant dense<0.000000e+00> : vector<2xf32>
    %572 = vector.multi_reduction <add>, %571, %cst_174 [1] : vector<2x5xf32> to vector<2xf32>
    %573 = vector.shape_cast %572 : vector<2xf32> to vector<2x1xf32>
    %574 = tpu.reciprocal %573 {approx = true} : vector<2x1xf32> -> vector<2x1xf32>
    %575 = arith.mulf %573, %574 : vector<2x1xf32>
    %cst_175 = arith.constant 2.000000e+00 : f32
    %576 = vector.broadcast %cst_175 : f32 to vector<2x1xf32>
    %577 = arith.subf %576, %575 : vector<2x1xf32>
    %578 = arith.mulf %574, %577 : vector<2x1xf32>
    %579 = vector.broadcast %578 : vector<2x1xf32> to vector<2x5xf32>
    %580 = arith.mulf %571, %579 : vector<2x5xf32>
    %cst_176 = arith.constant 1.000000e+00 : f32
    %581 = vector.broadcast %cst_176 : f32 to vector<2x5xf32>
    %582 = arith.mulf %580, %581 : vector<2x5xf32>
    %c0_177 = arith.constant 0 : index
    %c0_178 = arith.constant 0 : index
    %583 = vector.load %arg16[%c0_177, %c0_178] : memref<2x5xf32, #tpu.memory_space<vmem>>, vector<2x5xf32>
    tpu.vector_store %arg16[%c0_177, %c0_178], %582 {strides = array<i32>} : memref<2x5xf32, #tpu.memory_space<vmem>>, vector<2x5xf32>,
    return
  }
}

</mosaic_0001>

<bundles_post_ra>
// kernel: tpu_custom_call.1
= control target key start
LH: loop header
LB: loop body
LE: loop exit
PB: predicated region body
PF: predicated region fallthrough
CT: control target
= control target key end

     0   :  { %s2897_s0 = inlined_call_operand.vmem [shape: f32[16,8], index: 0, kind: input, shape index: {}]   ;;  %s2898_s1 = inlined_call_operand.vmem [shape: f32[8,64], index: 1, kind: input, shape index: {}]   ;;  %s2899_s2 = inlined_call_operand.vmem [shape: f32[16,64], index: 2, kind: input, shape index: {}]   ;;  %s2900_s3 = inlined_call_operand.vmem [shape: f32[1,64], index: 3, kind: input, shape index: {}]   ;;  %s2901_s4 = inlined_call_operand.vmem [shape: f32[32,64], index: 4, kind: input, shape index: {}]   ;;  %s2902_s5 = inlined_call_operand.vmem [shape: f32[16,64], index: 5, kind: input, shape index: {}]   ;;  %s2903_s6 = inlined_call_operand.vmem [shape: f32[1,64], index: 6, kind: input, shape index: {}]   ;;  %s2904_s7 = inlined_call_operand.vmem [shape: f32[32,64], index: 7, kind: input, shape index: {}]   ;;  %s2905_s8 = inlined_call_operand.vmem [shape: f32[16,64], index: 8, kind: input, shape index: {}]   ;;  %s2906_s9 = inlined_call_operand.vmem [shape: f32[1,64], index: 9, kind: input, shape index: {}]   ;;  %s2907_s10 = inlined_call_operand.vmem [shape: f32[128,32], index: 10, kind: input, shape index: {}]   ;;  %s2908_s11 = inlined_call_operand.vmem [shape: f32[1,32], index: 11, kind: input, shape index: {}]   ;;  %s2909_s12 = inlined_call_operand.vmem [shape: f32[32,32], index: 12, kind: input, shape index: {}]   ;;  %s2910_s13 = inlined_call_operand.vmem [shape: f32[1,32], index: 13, kind: input, shape index: {}]   ;;  %s2911_s14 = inlined_call_operand.vmem [shape: f32[32,5], index: 14, kind: input, shape index: {}]   ;;  %s2912_s15 = inlined_call_operand.vmem [shape: f32[1,5], index: 15, kind: input, shape index: {}]   ;;  %s2913_s16 = inlined_call_operand.hbm [shape: f32[2,5], index: 16, kind: output, shape index: {}]  }
   0x1   :  { %2915 = sst [smem:[#allocation8_spill]] %s2897_s0 }
   0x2   :  { %v56_v0 = vld [vmem:[%s2898_s1] sm:$0xff]  ;;  %v2403_v1 = vld [vmem:[%s2899_s2 + $0x8] sm:$0xff]  ;;  %s2916_s27 = sld [smem:[#allocation8_spill]]  ;;  %vm61_vm0 = vcmask 64512  }
   0x3   :  { %83 = vmatpush.msra.mxu0 %v56_v0  ;;  %111 = vmatpush.msra.mxu1 %v2403_v1  ;;  %v2412_v3 = vld [vmem:[%s2899_s2] sm:$0xff] }
   0x4   :  { %254 = vmatpush.msra.mxu3 %v2403_v1  ;;  %392 = vmatpush.msra.mxu2 %v2403_v1 }
   0x5   :  { %112 = vmatpush.msra.mxu1 %v2412_v3 }
   0x8   :  { %v54_v2 = vld [vmem:[%s2916_s27] sm:$0xff] }
   0x9   :  { %2009 = vmatmul.msk.f32.vlgmr.msra.gmra.mxu0 %vm61_vm0, %v54_v2 }
   0xa   :  { %21 = vsyncpa [#allocation6], 0  ;;  %v2303_v4 = vmov 0.0   ;;  %255 = vmatpush.msra.mxu3 %v2412_v3  ;;  %184 = vmatpush.msrb.mxu1 %v2403_v1  ;;  %v2432_v5 = vld [vmem:[%s2900_s3] ss:$0 sm:$0xff]  ;;  %s2304_s30 = smov 80  }
   0xb   :  { %113 = vmatmul.f32.vlgmr.msra.gmra.mxu1 %v2303_v4  ;;  %393 = vmatpush.msra.mxu2 %v2412_v3  ;;  %s2305_s3 = smov 16   ;;  %s2306_s0 = smov 96   ;;  %vm158_vm5 = vcmask 123904   ;;  %vm93_vm6 = vcmask 130048  }
   0xc   :  { %463 = vmatpush.msrb.mxu3 %v2403_v1  ;;  %533 = vmatpush.msrb.mxu0 %v2403_v1  ;;  %s2307_s19 = smov 112   ;;  %s2309_s29 = smov 32  }
   0xd   :  { %185 = vmatpush.msrb.mxu1 %v2412_v3  ;;  %s2310_s1 = smov 64   ;;  %s2000_s2 = sshll.u32 %s2913_s16, 4  ;;  %s2001_s2 = int_to_ptr.hbm [resolvable:$true] %s2000_s2 }
   0xe   :  { %464 = vmatpush.msrb.mxu3 %v2412_v3  ;;  %534 = vmatpush.msrb.mxu0 %v2412_v3 }
   0xf   :  { %324 = vmatpush.msra.mxu1 %v2403_v1 }
  0x11   :  { %325 = vmatpush.msra.mxu1 %v2412_v3 }
  0x86   :  { %v85_v6 = vpop.f32.mrf.mxu0 }
  0x87   :  { %v2435_v7 = vadd.f32 %v2432_v5, %v85_v6 }
  0x88   :  { %v114_v8 = vpop.f32.mrf.mxu1 }
  0x89   :  { %v115_v9 = vadd.f32 %v114_v8, %v2435_v7  ;;  %v166_v33 = vrot.slane %v2435_v7, 2  ;;  %v236_v59 = vrot.slane %v2435_v7, 4 }
  0x8b   :  { %2081 = vtanh.f32 %v115_v9  ;;  %v2011_v11 = vmul.f32 -1.442695, %v115_v9 }
  0x8d   :  { %2083 = vpow2.f32 %v2011_v11 }
  0x91   :  { %v2082_v10 = vpop.eup %2081 }
  0x92   :  { %139 = vrot.lane.b32.xlu0 %v2082_v10, %s2304_s30 }
  0x93   :  { %v2084_v12 = vpop.eup %2083 }
  0x94   :  { %v120_v13 = vadd.f32 1.0, %v2084_v12 }
  0x96   :  { %2085 = vrcp.f32 %v120_v13  ;;  %v132_v19 = vand.u32 2147483648, %v120_v13  ;;  %vm126_vm2 = vweird.f32 %v120_v13  ;;  %v130_v20 = vand.u32 2147483647, %v120_v13 }
  0x98   :  { %v133_v22 = vor.u32 1.1754944e-38, %v132_v19  ;;  %vm131_vm4 = vcmp.eq.f32.partialorder %v130_v20, 8.507059e+37 }
  0x9c   :  { %v2086_v14 = vpop.eup %2085 }
  0x9d   :  { %v122_v15 = vmul.f32 %v2086_v14, %v120_v13  ;;  %vm127_vm1 = vweird.f32 %v2086_v14 }
  0x9e   :  { %vm128_vm3 = vmor %vm126_vm2, %vm127_vm1 }
  0x9f   :  { %v123_v16 = vsub.f32 1.0, %v122_v15 }
  0xa1   :  { %v124_v17 = vmul.f32 %v2086_v14, %v123_v16 }
  0xa3   :  { %v125_v18 = vadd.f32 %v2086_v14, %v124_v17 }
  0xa5   :  { %v129_v21 = vsel %vm128_vm3, %v2086_v14, %v125_v18 }
  0xa6   :  { %v134_v24 = vsel %vm131_vm4, %v133_v22, %v129_v21 }
  0xa7   :  { %v137_v26 = vmul.f32 0.0, %v134_v24 }
 0x104   :  { %v140_v23 = vpop.permute.xlu0 %139 }
 0x105   :  { %v142_v25 = vmul.f32 %v140_v23, %v134_v24 }
 0x107   :  { %144 = vrot.lane.b32.xlu0 %v142_v25, %s2305_s3 }
 0x179   :  { %v145_v27 = vpop.permute.xlu0 %144 }
 0x17a   :  { %v147_v28 = vadd.f32 %v145_v27, %v137_v26 }
 0x17c   :  { %2087 = vtanh.f32 %v147_v28 }
 0x182   :  { %v2088_v29 = vpop.eup %2087 }
 0x183   :  { %150 = vrot.lane.b32.xlu1 %v2088_v29, %s2305_s3 }
 0x1f5   :  { %v151_v30 = vpop.permute.xlu1 %150 }
 0x1f6   :  { %v2441_v31 = vmul.f32 %v151_v30, %v134_v24  ;;  %v306_v24 = vrot.slane %v2435_v7, 6 }
 0x1f8   :  { %155 = vrot.lane.b32.xlu1 %v2441_v31, %s2306_s0 }
 0x26a   :  { %v156_v32 = vpop.permute.xlu1 %155 }
 0x26b   :  { %159 = vst.msk [vmem:[#allocation2] sm:$0x3] %vm158_vm5, %v156_v32  ;;  %2012 = vmatmul.msk.f32.vlgmr.msrb.gmra.mxu1 %vm93_vm6, %v156_v32 }
 0x26c   :  { %603 = vmatpush.msrb.mxu1 %v2403_v1 }
 0x26e   :  { %604 = vmatpush.msrb.mxu1 %v2412_v3 }
 0x2e8   :  { %v187_v34 = vpop.f32.mrf.mxu1 }
 0x2e9   :  { %v188_v35 = vadd.f32 %v187_v34, %v166_v33 }
 0x2eb   :  { %2089 = vtanh.f32 %v188_v35  ;;  %v2013_v37 = vmul.f32 -1.442695, %v188_v35 }
 0x2ed   :  { %2091 = vpow2.f32 %v2013_v37 }
 0x2f1   :  { %v2090_v36 = vpop.eup %2089 }
 0x2f2   :  { %212 = vrot.lane.b32.xlu2 %v2090_v36, %s2304_s30 }
 0x2f3   :  { %v2092_v38 = vpop.eup %2091 }
 0x2f4   :  { %v193_v39 = vadd.f32 1.0, %v2092_v38 }
 0x2f6   :  { %2093 = vrcp.f32 %v193_v39  ;;  %v205_v45 = vand.u32 2147483648, %v193_v39  ;;  %vm199_vm8 = vweird.f32 %v193_v39  ;;  %v203_v46 = vand.u32 2147483647, %v193_v39 }
 0x2f8   :  { %v206_v48 = vor.u32 1.1754944e-38, %v205_v45  ;;  %vm204_vm10 = vcmp.eq.f32.partialorder %v203_v46, 8.507059e+37 }
 0x2fc   :  { %v2094_v40 = vpop.eup %2093 }
 0x2fd   :  { %v195_v41 = vmul.f32 %v2094_v40, %v193_v39  ;;  %vm200_vm7 = vweird.f32 %v2094_v40 }
 0x2fe   :  { %vm201_vm9 = vmor %vm199_vm8, %vm200_vm7 }
 0x2ff   :  { %v196_v42 = vsub.f32 1.0, %v195_v41 }
 0x301   :  { %v197_v43 = vmul.f32 %v2094_v40, %v196_v42 }
 0x303   :  { %v198_v44 = vadd.f32 %v2094_v40, %v197_v43 }
 0x305   :  { %v202_v47 = vsel %vm201_vm9, %v2094_v40, %v198_v44 }
 0x306   :  { %v207_v50 = vsel %vm204_vm10, %v206_v48, %v202_v47 }
 0x307   :  { %v210_v52 = vmul.f32 %v207_v50, %v147_v28 }
 0x34c   :  { %v213_v49 = vpop.permute.xlu2 %212 }
 0x34d   :  { %v215_v51 = vmul.f32 %v213_v49, %v207_v50  ;;  %v55_v49 = vld [vmem:[%s2916_s27 + $0x8] sm:$0xff] }
 0x34e   :  { %2010 = vmatmul.msk.f32.gmra.mxu0 %vm61_vm0, %v55_v49 }
 0x34f   :  { %217 = vrot.lane.b32.xlu2 %v215_v51, %s2305_s3 }
 0x3a9   :  { %v218_v53 = vpop.permute.xlu2 %217 }
 0x3aa   :  { %v220_v54 = vadd.f32 %v218_v53, %v210_v52 }
 0x3ac   :  { %2095 = vtanh.f32 %v220_v54 }
 0x3b2   :  { %v2096_v55 = vpop.eup %2095 }
 0x3b3   :  { %223 = vrot.lane.b32.xlu0 %v2096_v55, %s2305_s3 }
 0x3cb   :  { %v88_v51 = vpop.f32.mrf.mxu0 }
 0x3cc   :  { %v2484_v52 = vadd.f32 %v2432_v5, %v88_v51 }
 0x425   :  { %v224_v56 = vpop.permute.xlu0 %223 }
 0x426   :  { %v2453_v57 = vmul.f32 %v224_v56, %v207_v50 }
 0x428   :  { %228 = vrot.lane.b32.xlu1 %v2453_v57, %s2306_s0 }
 0x49a   :  { %v229_v58 = vpop.permute.xlu1 %228 }
 0x49b   :  { %231 = vst.msk [vmem:[#allocation2 + $0x2] sm:$0x3] %vm158_vm5, %v229_v58  ;;  %2014 = vmatmul.msk.f32.vlgmr.msra.gmra.mxu3 %vm93_vm6, %v229_v58 }
 0x51e   :  { %v257_v60 = vpop.f32.mrf.mxu3 }
 0x51f   :  { %v258_v61 = vadd.f32 %v257_v60, %v236_v59 }
 0x521   :  { %2097 = vtanh.f32 %v258_v61  ;;  %v2015_v63 = vmul.f32 -1.442695, %v258_v61 }
 0x523   :  { %2099 = vpow2.f32 %v2015_v63 }
 0x527   :  { %v2098_v62 = vpop.eup %2097 }
 0x528   :  { %282 = vrot.lane.b32.xlu2 %v2098_v62, %s2304_s30 }
 0x529   :  { %v2100_v0 = vpop.eup %2099 }
 0x52a   :  { %v263_v1 = vadd.f32 1.0, %v2100_v0 }
 0x52c   :  { %2101 = vrcp.f32 %v263_v1  ;;  %v275_v10 = vand.u32 2147483648, %v263_v1  ;;  %vm269_vm12 = vweird.f32 %v263_v1  ;;  %v273_v11 = vand.u32 2147483647, %v263_v1 }
 0x52e   :  { %v276_v13 = vor.u32 1.1754944e-38, %v275_v10  ;;  %vm274_vm14 = vcmp.eq.f32.partialorder %v273_v11, 8.507059e+37 }
 0x532   :  { %v2102_v2 = vpop.eup %2101 }
 0x533   :  { %v265_v3 = vmul.f32 %v2102_v2, %v263_v1  ;;  %vm270_vm11 = vweird.f32 %v2102_v2 }
 0x534   :  { %vm271_vm13 = vmor %vm269_vm12, %vm270_vm11 }
 0x535   :  { %v266_v6 = vsub.f32 1.0, %v265_v3 }
 0x537   :  { %v267_v8 = vmul.f32 %v2102_v2, %v266_v6 }
 0x539   :  { %v268_v9 = vadd.f32 %v2102_v2, %v267_v8 }
 0x53b   :  { %v272_v12 = vsel %vm271_vm13, %v2102_v2, %v268_v9 }
 0x53c   :  { %v277_v15 = vsel %vm274_vm14, %v276_v13, %v272_v12 }
 0x53d   :  { %v280_v17 = vmul.f32 %v277_v15, %v220_v54 }
 0x582   :  { %v283_v14 = vpop.permute.xlu2 %282 }
 0x583   :  { %v285_v16 = vmul.f32 %v283_v14, %v277_v15 }
 0x585   :  { %287 = vrot.lane.b32.xlu0 %v285_v16, %s2305_s3 }
 0x5f7   :  { %v288_v18 = vpop.permute.xlu0 %287 }
 0x5f8   :  { %v290_v19 = vadd.f32 %v288_v18, %v280_v17  ;;  %v445_v17 = vrot.slane %v2484_v52, 2 }
 0x5fa   :  { %2103 = vtanh.f32 %v290_v19 }
 0x600   :  { %v2104_v20 = vpop.eup %2103 }
 0x601   :  { %293 = vrot.lane.b32.xlu1 %v2104_v20, %s2305_s3 }
 0x673   :  { %v294_v21 = vpop.permute.xlu1 %293 }
 0x674   :  { %v2463_v22 = vmul.f32 %v294_v21, %v277_v15 }
 0x676   :  { %298 = vrot.lane.b32.xlu2 %v2463_v22, %s2306_s0 }
 0x6d0   :  { %v299_v23 = vpop.permute.xlu2 %298 }
 0x6d1   :  { %301 = vst.msk [vmem:[#allocation2 + $0x4] sm:$0x3] %vm158_vm5, %v299_v23  ;;  %2016 = vmatmul.msk.f32.vlgmr.msra.gmra.mxu1 %vm93_vm6, %v299_v23 }
 0x74e   :  { %v327_v25 = vpop.f32.mrf.mxu1 }
 0x74f   :  { %v328_v26 = vadd.f32 %v327_v25, %v306_v24 }
 0x751   :  { %2105 = vtanh.f32 %v328_v26  ;;  %v2017_v28 = vmul.f32 -1.442695, %v328_v26 }
 0x753   :  { %2107 = vpow2.f32 %v2017_v28 }
 0x757   :  { %v2106_v27 = vpop.eup %2105 }
 0x758   :  { %352 = vrot.lane.b32.xlu0 %v2106_v27, %s2304_s30 }
 0x759   :  { %v2108_v29 = vpop.eup %2107 }
 0x75a   :  { %v333_v30 = vadd.f32 1.0, %v2108_v29 }
 0x75c   :  { %2109 = vrcp.f32 %v333_v30  ;;  %v345_v37 = vand.u32 2147483648, %v333_v30  ;;  %vm339_vm1 = vweird.f32 %v333_v30  ;;  %v343_v7 = vand.u32 2147483647, %v333_v30 }
 0x75e   :  { %v346_v39 = vor.u32 1.1754944e-38, %v345_v37  ;;  %vm344_vm3 = vcmp.eq.f32.partialorder %v343_v7, 8.507059e+37 }
 0x762   :  { %v2110_v32 = vpop.eup %2109 }
 0x763   :  { %v335_v33 = vmul.f32 %v2110_v32, %v333_v30  ;;  %vm340_vm15 = vweird.f32 %v2110_v32 }
 0x764   :  { %vm341_vm2 = vmor %vm339_vm1, %vm340_vm15 }
 0x765   :  { %v336_v34 = vsub.f32 1.0, %v335_v33 }
 0x767   :  { %v337_v35 = vmul.f32 %v2110_v32, %v336_v34 }
 0x769   :  { %v338_v36 = vadd.f32 %v2110_v32, %v337_v35 }
 0x76b   :  { %v342_v38 = vsel %vm341_vm2, %v2110_v32, %v338_v36 }
 0x76c   :  { %v347_v41 = vsel %vm344_vm3, %v346_v39, %v342_v38 }
 0x76d   :  { %v350_v43 = vmul.f32 %v347_v41, %v290_v19 }
 0x7ca   :  { %v353_v40 = vpop.permute.xlu0 %352 }
 0x7cb   :  { %v355_v42 = vmul.f32 %v353_v40, %v347_v41 }
 0x7cd   :  { %357 = vrot.lane.b32.xlu1 %v355_v42, %s2305_s3 }
 0x83f   :  { %v358_v44 = vpop.permute.xlu1 %357 }
 0x840   :  { %v360_v45 = vadd.f32 %v358_v44, %v350_v43  ;;  %v515_v44 = vrot.slane %v2484_v52, 4 }
 0x842   :  { %2111 = vtanh.f32 %v360_v45 }
 0x848   :  { %v2112_v46 = vpop.eup %2111 }
 0x849   :  { %363 = vrot.lane.b32.xlu2 %v2112_v46, %s2305_s3 }
 0x8a3   :  { %v364_v47 = vpop.permute.xlu2 %363 }
 0x8a4   :  { %v2473_v48 = vmul.f32 %v364_v47, %v347_v41 }
 0x8a6   :  { %368 = vrot.lane.b32.xlu0 %v2473_v48, %s2306_s0 }
 0x918   :  { %v369_v50 = vpop.permute.xlu0 %368 }
 0x919   :  { %371 = vst.msk [vmem:[#allocation2 + $0x6] sm:$0x3] %vm158_vm5, %v369_v50  ;;  %2018 = vmatmul.msk.f32.vlgmr.msra.gmra.mxu2 %vm93_vm6, %v369_v50 }
 0x99c   :  { %v395_v53 = vpop.f32.mrf.mxu2 }
 0x99d   :  { %v396_v54 = vadd.f32 %v395_v53, %v2484_v52 }
 0x99f   :  { %2113 = vtanh.f32 %v396_v54  ;;  %v2019_v56 = vmul.f32 -1.442695, %v396_v54 }
 0x9a1   :  { %2115 = vpow2.f32 %v2019_v56 }
 0x9a5   :  { %v2114_v55 = vpop.eup %2113 }
 0x9a6   :  { %420 = vrot.lane.b32.xlu1 %v2114_v55, %s2304_s30 }
 0x9a7   :  { %v2116_v58 = vpop.eup %2115 }
 0x9a8   :  { %v401_v59 = vadd.f32 1.0, %v2116_v58 }
 0x9aa   :  { %2117 = vrcp.f32 %v401_v59  ;;  %v413_v5 = vand.u32 2147483648, %v401_v59  ;;  %vm407_vm4 = vweird.f32 %v401_v59  ;;  %v411_v1 = vand.u32 2147483647, %v401_v59 }
 0x9ac   :  { %v414_v3 = vor.u32 1.1754944e-38, %v413_v5  ;;  %vm412_vm8 = vcmp.eq.f32.partialorder %v411_v1, 8.507059e+37 }
 0x9b0   :  { %v2118_v60 = vpop.eup %2117 }
 0x9b1   :  { %v403_v61 = vmul.f32 %v2118_v60, %v401_v59  ;;  %vm408_vm0 = vweird.f32 %v2118_v60 }
 0x9b2   :  { %vm409_vm7 = vmor %vm407_vm4, %vm408_vm0 }
 0x9b3   :  { %v404_v62 = vsub.f32 1.0, %v403_v61 }
 0x9b5   :  { %v405_v63 = vmul.f32 %v2118_v60, %v404_v62 }
 0x9b7   :  { %v406_v0 = vadd.f32 %v2118_v60, %v405_v63 }
 0x9b9   :  { %v410_v2 = vsel %vm409_vm7, %v2118_v60, %v406_v0  ;;  %vm163_vm7 = vcmask 255104  }
 0x9ba   :  { %v415_v8 = vsel %vm412_vm8, %v414_v3, %v410_v2  ;;  %vm665_vm8 = vcmask 261120  }
 0x9bb   :  { %v418_v10 = vmul.f32 %v415_v8, %v360_v45 }
 0xa18   :  { %v421_v6 = vpop.permute.xlu1 %420 }
 0xa19   :  { %v423_v9 = vmul.f32 %v421_v6, %v415_v8 }
 0xa1b   :  { %425 = vrot.lane.b32.xlu2 %v423_v9, %s2305_s3 }
 0xa75   :  { %v426_v11 = vpop.permute.xlu2 %425 }
 0xa76   :  { %v428_v12 = vadd.f32 %v426_v11, %v418_v10  ;;  %v585_v11 = vrot.slane %v2484_v52, 6 }
 0xa78   :  { %2119 = vtanh.f32 %v428_v12 }
 0xa7e   :  { %v2120_v13 = vpop.eup %2119 }
 0xa7f   :  { %431 = vrot.lane.b32.xlu0 %v2120_v13, %s2305_s3 }
 0xaf1   :  { %v432_v14 = vpop.permute.xlu0 %431 }
 0xaf2   :  { %v2490_v15 = vmul.f32 %v432_v14, %v415_v8 }
 0xaf4   :  { %436 = vrot.lane.b32.xlu1 %v2490_v15, %s2306_s0 }
 0xb66   :  { %v2494_v16 = vpop.permute.xlu1 %436 }
 0xb67   :  { %2020 = vmatmul.msk.f32.vlgmr.msrb.gmra.mxu3 %vm93_vm6, %v2494_v16 }
 0xbea   :  { %v466_v18 = vpop.f32.mrf.mxu3 }
 0xbeb   :  { %v467_v19 = vadd.f32 %v466_v18, %v445_v17 }
 0xbed   :  { %2121 = vtanh.f32 %v467_v19  ;;  %v2021_v21 = vmul.f32 -1.442695, %v467_v19 }
 0xbef   :  { %2123 = vpow2.f32 %v2021_v21 }
 0xbf3   :  { %v2122_v20 = vpop.eup %2121 }
 0xbf4   :  { %491 = vrot.lane.b32.xlu2 %v2122_v20, %s2304_s30 }
 0xbf5   :  { %v2124_v23 = vpop.eup %2123 }
 0xbf6   :  { %v472_v24 = vadd.f32 1.0, %v2124_v23 }
 0xbf8   :  { %2125 = vrcp.f32 %v472_v24  ;;  %v484_v30 = vand.u32 2147483648, %v472_v24  ;;  %vm478_vm10 = vweird.f32 %v472_v24  ;;  %v482_v32 = vand.u32 2147483647, %v472_v24 }
 0xbfa   :  { %v485_v34 = vor.u32 1.1754944e-38, %v484_v30  ;;  %vm483_vm12 = vcmp.eq.f32.partialorder %v482_v32, 8.507059e+37 }
 0xbfe   :  { %v2126_v25 = vpop.eup %2125 }
 0xbff   :  { %v474_v26 = vmul.f32 %v2126_v25, %v472_v24  ;;  %vm479_vm9 = vweird.f32 %v2126_v25 }
 0xc00   :  { %vm480_vm11 = vmor %vm478_vm10, %vm479_vm9 }
 0xc01   :  { %v475_v27 = vsub.f32 1.0, %v474_v26 }
 0xc03   :  { %v476_v28 = vmul.f32 %v2126_v25, %v475_v27 }
 0xc05   :  { %v477_v29 = vadd.f32 %v2126_v25, %v476_v28 }
 0xc07   :  { %v481_v33 = vsel %vm480_vm11, %v2126_v25, %v477_v29 }
 0xc08   :  { %v486_v36 = vsel %vm483_vm12, %v485_v34, %v481_v33 }
 0xc09   :  { %v489_v7 = vmul.f32 %v486_v36, %v428_v12 }
 0xc4e   :  { %v492_v35 = vpop.permute.xlu2 %491 }
 0xc4f   :  { %v494_v37 = vmul.f32 %v492_v35, %v486_v36 }
 0xc51   :  { %496 = vrot.lane.b32.xlu0 %v494_v37, %s2305_s3 }
 0xcc3   :  { %v497_v38 = vpop.permute.xlu0 %496 }
 0xcc4   :  { %v499_v39 = vadd.f32 %v497_v38, %v489_v7 }
 0xcc6   :  { %2127 = vtanh.f32 %v499_v39 }
 0xccc   :  { %v2128_v40 = vpop.eup %2127 }
 0xccd   :  { %502 = vrot.lane.b32.xlu1 %v2128_v40, %s2305_s3  ;;  %v658_v40 = vld [vmem:[%s2901_s4 + $0x8] sm:$0xff] }
 0xd3f   :  { %v503_v41 = vpop.permute.xlu1 %502 }
 0xd40   :  { %v505_v42 = vmul.f32 %v503_v41, %v486_v36  ;;  %v657_v41 = vld [vmem:[%s2901_s4] sm:$0xff] }
 0xd42   :  { %507 = vrot.lane.b32.xlu2 %v505_v42, %s2306_s0 }
 0xd9c   :  { %v2503_v43 = vpop.permute.xlu2 %507 }
 0xd9d   :  { %2022 = vmatmul.msk.f32.vlgmr.msrb.gmra.mxu0 %vm93_vm6, %v2503_v43 }
 0xe1a   :  { %v536_v45 = vpop.f32.mrf.mxu0 }
 0xe1b   :  { %v537_v46 = vadd.f32 %v536_v45, %v515_v44 }
 0xe1d   :  { %2129 = vtanh.f32 %v537_v46  ;;  %v2023_v49 = vmul.f32 -1.442695, %v537_v46 }
 0xe1f   :  { %2131 = vpow2.f32 %v2023_v49 }
 0xe23   :  { %v2130_v47 = vpop.eup %2129 }
 0xe24   :  { %561 = vrot.lane.b32.xlu0 %v2130_v47, %s2304_s30 }
 0xe25   :  { %v2132_v50 = vpop.eup %2131 }
 0xe26   :  { %v542_v51 = vadd.f32 1.0, %v2132_v50  ;;  %v2076_v50 = vld [vmem:[%s2903_s6] ss:$0 sm:$0xff] }
 0xe28   :  { %2133 = vrcp.f32 %v542_v51  ;;  %v554_v59 = vand.u32 2147483648, %v542_v51  ;;  %vm548_vm14 = vweird.f32 %v542_v51  ;;  %v552_v60 = vand.u32 2147483647, %v542_v51 }
 0xe2a   :  { %v555_v62 = vor.u32 1.1754944e-38, %v554_v59  ;;  %vm553_vm1 = vcmp.eq.f32.partialorder %v552_v60, 8.507059e+37 }
 0xe2e   :  { %v2134_v53 = vpop.eup %2133 }
 0xe2f   :  { %v544_v54 = vmul.f32 %v2134_v53, %v542_v51  ;;  %vm549_vm13 = vweird.f32 %v2134_v53 }
 0xe30   :  { %vm550_vm15 = vmor %vm548_vm14, %vm549_vm13 }
 0xe31   :  { %v545_v55 = vsub.f32 1.0, %v544_v54 }
 0xe33   :  { %v546_v56 = vmul.f32 %v2134_v53, %v545_v55 }
 0xe35   :  { %v547_v58 = vadd.f32 %v2134_v53, %v546_v56 }
 0xe37   :  { %v551_v61 = vsel %vm550_vm15, %v2134_v53, %v547_v58 }
 0xe38   :  { %v556_v0 = vsel %vm553_vm1, %v555_v62, %v551_v61 }
 0xe39   :  { %v559_v1 = vmul.f32 %v556_v0, %v499_v39 }
 0xe96   :  { %v562_v63 = vpop.permute.xlu0 %561 }
 0xe97   :  { %v564_v5 = vmul.f32 %v562_v63, %v556_v0 }
 0xe99   :  { %566 = vrot.lane.b32.xlu1 %v564_v5, %s2305_s3 }
 0xf0b   :  { %v567_v2 = vpop.permute.xlu1 %566 }
 0xf0c   :  { %v569_v3 = vadd.f32 %v567_v2, %v559_v1 }
 0xf0e   :  { %2135 = vtanh.f32 %v569_v3 }
 0xf14   :  { %v2136_v6 = vpop.eup %2135 }
 0xf15   :  { %572 = vrot.lane.b32.xlu2 %v2136_v6, %s2305_s3 }
 0xf6f   :  { %v573_v8 = vpop.permute.xlu2 %572 }
 0xf70   :  { %v2511_v9 = vmul.f32 %v573_v8, %v556_v0 }
 0xf72   :  { %577 = vrot.lane.b32.xlu0 %v2511_v9, %s2306_s0 }
 0xfe4   :  { %v578_v10 = vpop.permute.xlu0 %577 }
 0xfe5   :  { %2024 = vmatmul.msk.f32.vlgmr.msrb.gmra.mxu1 %vm93_vm6, %v578_v10 }
0x1062   :  { %v606_v12 = vpop.f32.mrf.mxu1 }
0x1063   :  { %v607_v13 = vadd.f32 %v606_v12, %v585_v11 }
0x1065   :  { %2137 = vtanh.f32 %v607_v13  ;;  %v2025_v17 = vmul.f32 -1.442695, %v607_v13 }
0x1067   :  { %2139 = vpow2.f32 %v2025_v17 }
0x106b   :  { %v2138_v14 = vpop.eup %2137 }
0x106c   :  { %631 = vrot.lane.b32.xlu1 %v2138_v14, %s2304_s30 }
0x106d   :  { %v2140_v18 = vpop.eup %2139 }
0x106e   :  { %v612_v19 = vadd.f32 1.0, %v2140_v18 }
0x1070   :  { %2141 = vrcp.f32 %v612_v19  ;;  %v624_v25 = vand.u32 2147483648, %v612_v19  ;;  %vm618_vm3 = vweird.f32 %v612_v19  ;;  %v622_v26 = vand.u32 2147483647, %v612_v19 }
0x1072   :  { %v625_v27 = vor.u32 1.1754944e-38, %v624_v25  ;;  %vm623_vm4 = vcmp.eq.f32.partialorder %v622_v26, 8.507059e+37 }
0x1074   :  { %160 = vrot.lane.b32.xlu1 %v2441_v31, %s2307_s19 }
0x1076   :  { %v2142_v52 = vpop.eup %2141 }
0x1077   :  { %v614_v20 = vmul.f32 %v2142_v52, %v612_v19  ;;  %vm619_vm2 = vweird.f32 %v2142_v52 }
0x1078   :  { %vm620_vm0 = vmor %vm618_vm3, %vm619_vm2 }
0x1079   :  { %v615_v21 = vsub.f32 1.0, %v614_v20 }
0x107b   :  { %v616_v23 = vmul.f32 %v2142_v52, %v615_v21 }
0x107c   :  { %372 = vrot.lane.b32.xlu1 %v2473_v48, %s2307_s19 }
0x107d   :  { %v617_v24 = vadd.f32 %v2142_v52, %v616_v23 }
0x107f   :  { %v621_v31 = vsel %vm620_vm0, %v2142_v52, %v617_v24 }
0x1080   :  { %v626_v28 = vsel %vm623_vm4, %v625_v27, %v621_v31 }
0x1081   :  { %v629_v34 = vmul.f32 %v626_v28, %v569_v3 }
0x1084   :  { %511 = vrot.lane.b32.xlu1 %v505_v42, %s2307_s19  ;;  %v696_v42 = vld [vmem:[%s2902_s5 + $0x8] sm:$0xff] }
0x1085   :  { %782 = vmatpush.msra.mxu0 %v696_v42  ;;  %852 = vmatpush.msra.mxu1 %v696_v42 }
0x10de   :  { %v632_v48 = vpop.permute.xlu1 %631 }
0x10df   :  { %v634_v29 = vmul.f32 %v632_v48, %v626_v28 }
0x10e1   :  { %636 = vrot.lane.b32.xlu2 %v634_v29, %s2305_s3 }
0x10e6   :  { %v161_v30 = vpop.permute.xlu1 %160 }
0x10e7   :  { %164 = vst.msk [vmem:[#allocation2 + $0xe] sm:$0x3] %vm163_vm7, %v161_v30 }
0x10e9   :  { %232 = vrot.lane.b32.xlu2 %v2453_v57, %s2307_s19 }
0x10ee   :  { %v373_v32 = vpop.permute.xlu1 %372 }
0x10ef   :  { %375 = vst.msk [vmem:[#allocation2 + $0x8] sm:$0x3] %vm163_vm7, %v373_v32 }
0x10f0   :  { %439 = vst.msk [vmem:[#allocation2 + $0x8] sm:$0x3] %vm158_vm5, %v2494_v16 }
0x10f6   :  { %v512_v33 = vpop.permute.xlu1 %511 }
0x10f7   :  { %514 = vst.msk [vmem:[#allocation2 + $0x4] sm:$0x3] %vm163_vm7, %v512_v33 }
0x113b   :  { %v637_v35 = vpop.permute.xlu2 %636 }
0x113c   :  { %v639_v36 = vadd.f32 %v637_v35, %v629_v34 }
0x113e   :  { %2143 = vtanh.f32 %v639_v36 }
0x1143   :  { %v233_v37 = vpop.permute.xlu2 %232 }
0x1144   :  { %v2144_v7 = vpop.eup %2143  ;;  %235 = vst.msk [vmem:[#allocation2 + $0xc] sm:$0x3] %vm163_vm7, %v233_v37 }
0x1145   :  { %580 = vst.msk [vmem:[#allocation2 + $0xc] sm:$0x3] %vm158_vm5, %v578_v10  ;;  %642 = vrot.lane.b32.xlu0 %v2144_v7, %s2305_s3 }
0x114d   :  { %302 = vrot.lane.b32.xlu0 %v2463_v22, %s2307_s19  ;;  %v660_v22 = vld [vmem:[%s2901_s4 + $0x18] sm:$0xff] }
0x114e   :  { %2062 = vmatpush.msra.mxu3 %v660_v22  ;;  %684 = vmatpush.msrb.mxu2 %v660_v22 }
0x1155   :  { %440 = vrot.lane.b32.xlu0 %v2490_v15, %s2307_s19  ;;  %v659_v15 = vld [vmem:[%s2901_s4 + $0x10] sm:$0xff] }
0x1156   :  { %2063 = vmatpush.msra.mxu3 %v659_v15  ;;  %685 = vmatpush.msrb.mxu2 %v659_v15 }
0x1158   :  { %2064 = vmatpush.msra.mxu3 %v658_v40  ;;  %686 = vmatpush.msrb.mxu2 %v658_v40 }
0x115a   :  { %2065 = vmatpush.msra.mxu3 %v657_v41  ;;  %687 = vmatpush.msrb.mxu2 %v657_v41 }
0x115c   :  { %711 = vmatpush.msrb.mxu3 %v696_v42  ;;  %1131 = vmatpush.msra.mxu2 %v696_v42 }
0x11b7   :  { %v643_v57 = vpop.permute.xlu0 %642 }
0x11b8   :  { %v645_v16 = vmul.f32 %v643_v57, %v626_v28 }
0x11ba   :  { %651 = vrot.lane.b32.xlu0 %v645_v16, %s2307_s19  ;;  %647 = vrot.lane.b32.xlu2 %v645_v16, %s2306_s0 }
0x11bf   :  { %v303_v38 = vpop.permute.xlu0 %302 }
0x11c0   :  { %305 = vst.msk [vmem:[#allocation2 + $0xa] sm:$0x3] %vm163_vm7, %v303_v38 }
0x11c1   :  { %510 = vst.msk [vmem:[#allocation2 + $0xa] sm:$0x3] %vm158_vm5, %v2503_v43  ;;  %v695_v43 = vld [vmem:[%s2902_s5] sm:$0xff] }
0x11c2   :  { %581 = vrot.lane.b32.xlu2 %v2511_v9, %s2307_s19  ;;  %712 = vmatpush.msrb.mxu3 %v695_v43 }
0x11c3   :  { %783 = vmatpush.msra.mxu0 %v695_v43  ;;  %853 = vmatpush.msra.mxu1 %v695_v43 }
0x11c4   :  { %1132 = vmatpush.msra.mxu2 %v695_v43 }
0x11c5   :  { %990 = vmatpush.msrb.mxu0 %v696_v42  ;;  %1061 = vmatpush.msrb.mxu1 %v696_v42 }
0x11c7   :  { %v441_v39 = vpop.permute.xlu0 %440  ;;  %991 = vmatpush.msrb.mxu0 %v695_v43  ;;  %1062 = vmatpush.msrb.mxu1 %v695_v43 }
0x11c8   :  { %443 = vst.msk [vmem:[#allocation2 + $0x6] sm:$0x3] %vm163_vm7, %v441_v39 }
0x1214   :  { %v648_v44 = vpop.permute.xlu2 %647 }
0x1215   :  { %650 = vst.msk [vmem:[#allocation2 + $0xe] sm:$0x3] %vm158_vm5, %v648_v44 }
0x121c   :  { %v582_v45 = vpop.permute.xlu2 %581  ;;  %v656_v46 = vld [vmem:[#allocation2 + $0x8] sm:$0xff] }
0x121d   :  { %584 = vst.msk [vmem:[#allocation2 + $0x2] sm:$0x3] %vm163_vm7, %v582_v45  ;;  %2027 = vmatmul.msk.f32.vlgmr.msra.gmra.mxu3 %vm665_vm8, %v656_v46 }
0x121e   :  { %922 = vmatpush.msra.mxu3 %v696_v42 }
0x1220   :  { %923 = vmatpush.msra.mxu3 %v695_v43 }
0x1225   :  { %713 = vmatmul.f32.vlgmr.msrb.gmra.mxu3 %v2303_v4 }
0x1226   :  { %1201 = vmatpush.msrb.mxu3 %v696_v42 }
0x1228   :  { %1202 = vmatpush.msrb.mxu3 %v695_v43 }
0x122c   :  { %v652_v47 = vpop.permute.xlu0 %651 }
0x122d   :  { %654 = vst.msk [vmem:[#allocation2] sm:$0x3] %vm163_vm7, %v652_v47 }
0x1234   :  { %v655_v49 = vld [vmem:[#allocation2] sm:$0xff] }
0x1235   :  { %2026 = vmatmul.msk.f32.vlgmr.msrb.gmra.mxu2 %vm665_vm8, %v655_v49 }
0x12a0   :  { %v692_v51 = vpop.f32.mrf.mxu3 }
0x12a1   :  { %v2573_v53 = vadd.f32 %v2076_v50, %v692_v51 }
0x12a8   :  { %v714_v55 = vpop.f32.mrf.mxu3 }
0x12b8   :  { %v689_v54 = vpop.f32.mrf.mxu2 }
0x12b9   :  { %v2575_v56 = vadd.f32 %v2076_v50, %v689_v54 }
0x12bb   :  { %v715_v58 = vadd.f32 %v714_v55, %v2575_v56  ;;  %v764_v21 = vrot.slane %v2575_v56, 2  ;;  %v834_v42 = vrot.slane %v2575_v56, 4 }
0x12bd   :  { %2145 = vtanh.f32 %v715_v58  ;;  %v2028_v60 = vmul.f32 -1.442695, %v715_v58 }
0x12bf   :  { %2147 = vpow2.f32 %v2028_v60 }
0x12c3   :  { %v2146_v59 = vpop.eup %2145 }
0x12c4   :  { %739 = vrot.lane.b32.xlu1 %v2146_v59, %s2304_s30 }
0x12c5   :  { %v2148_v61 = vpop.eup %2147 }
0x12c6   :  { %v720_v62 = vadd.f32 1.0, %v2148_v61 }
0x12c8   :  { %2149 = vrcp.f32 %v720_v62  ;;  %v732_v3 = vand.u32 2147483648, %v720_v62  ;;  %vm726_vm10 = vweird.f32 %v720_v62  ;;  %v730_v6 = vand.u32 2147483647, %v720_v62 }
0x12ca   :  { %v733_v9 = vor.u32 1.1754944e-38, %v732_v3  ;;  %vm731_vm12 = vcmp.eq.f32.partialorder %v730_v6, 8.507059e+37 }
0x12ce   :  { %v2150_v63 = vpop.eup %2149 }
0x12cf   :  { %v722_v0 = vmul.f32 %v2150_v63, %v720_v62  ;;  %vm727_vm9 = vweird.f32 %v2150_v63 }
0x12d0   :  { %vm728_vm11 = vmor %vm726_vm10, %vm727_vm9 }
0x12d1   :  { %v723_v5 = vsub.f32 1.0, %v722_v0 }
0x12d3   :  { %v724_v1 = vmul.f32 %v2150_v63, %v723_v5 }
0x12d5   :  { %v725_v2 = vadd.f32 %v2150_v63, %v724_v1 }
0x12d7   :  { %v729_v8 = vsel %vm728_vm11, %v2150_v63, %v725_v2 }
0x12d8   :  { %v734_v11 = vsel %vm731_vm12, %v733_v9, %v729_v8 }
0x12d9   :  { %v737_v13 = vmul.f32 0.0, %v734_v11 }
0x1336   :  { %v740_v10 = vpop.permute.xlu1 %739 }
0x1337   :  { %v742_v12 = vmul.f32 %v740_v10, %v734_v11 }
0x1339   :  { %744 = vrot.lane.b32.xlu2 %v742_v12, %s2305_s3 }
0x1393   :  { %v745_v14 = vpop.permute.xlu2 %744 }
0x1394   :  { %v747_v17 = vadd.f32 %v745_v14, %v737_v13 }
0x1396   :  { %2151 = vtanh.f32 %v747_v17 }
0x139c   :  { %v2152_v18 = vpop.eup %2151 }
0x139d   :  { %750 = vrot.lane.b32.xlu0 %v2152_v18, %s2305_s3 }
0x140f   :  { %v751_v19 = vpop.permute.xlu0 %750 }
0x1410   :  { %v2581_v52 = vmul.f32 %v751_v19, %v734_v11  ;;  %v904_v11 = vrot.slane %v2575_v56, 6 }
0x1412   :  { %755 = vrot.lane.b32.xlu1 %v2581_v52, %s2306_s0 }
0x1484   :  { %v756_v20 = vpop.permute.xlu1 %755 }
0x1485   :  { %758 = vst.msk [vmem:[#allocation3] sm:$0x3] %vm158_vm5, %v756_v20  ;;  %2029 = vmatmul.msk.f32.vlgmr.msra.gmra.mxu0 %vm93_vm6, %v756_v20 }
0x1502   :  { %v785_v23 = vpop.f32.mrf.mxu0 }
0x1503   :  { %v786_v24 = vadd.f32 %v785_v23, %v764_v21 }
0x1505   :  { %2153 = vtanh.f32 %v786_v24  ;;  %v2030_v26 = vmul.f32 -1.442695, %v786_v24 }
0x1507   :  { %2155 = vpow2.f32 %v2030_v26 }
0x150b   :  { %v2154_v25 = vpop.eup %2153 }
0x150c   :  { %810 = vrot.lane.b32.xlu2 %v2154_v25, %s2304_s30 }
0x150d   :  { %v2156_v31 = vpop.eup %2155 }
0x150e   :  { %v791_v27 = vadd.f32 1.0, %v2156_v31 }
0x1510   :  { %2157 = vrcp.f32 %v791_v27  ;;  %v803_v33 = vand.u32 2147483648, %v791_v27  ;;  %vm797_vm14 = vweird.f32 %v791_v27  ;;  %v801_v34 = vand.u32 2147483647, %v791_v27 }
0x1512   :  { %v804_v36 = vor.u32 1.1754944e-38, %v803_v33  ;;  %vm802_vm1 = vcmp.eq.f32.partialorder %v801_v34, 8.507059e+37 }
0x1516   :  { %v2158_v48 = vpop.eup %2157 }
0x1517   :  { %v793_v28 = vmul.f32 %v2158_v48, %v791_v27  ;;  %vm798_vm13 = vweird.f32 %v2158_v48 }
0x1518   :  { %vm799_vm15 = vmor %vm797_vm14, %vm798_vm13 }
0x1519   :  { %v794_v29 = vsub.f32 1.0, %v793_v28 }
0x151b   :  { %v795_v30 = vmul.f32 %v2158_v48, %v794_v29 }
0x151d   :  { %v796_v32 = vadd.f32 %v2158_v48, %v795_v30 }
0x151f   :  { %v800_v35 = vsel %vm799_vm15, %v2158_v48, %v796_v32 }
0x1520   :  { %v805_v7 = vsel %vm802_vm1, %v804_v36, %v800_v35 }
0x1521   :  { %v808_v16 = vmul.f32 %v805_v7, %v747_v17 }
0x1566   :  { %v811_v37 = vpop.permute.xlu2 %810 }
0x1567   :  { %v813_v57 = vmul.f32 %v811_v37, %v805_v7 }
0x1569   :  { %815 = vrot.lane.b32.xlu0 %v813_v57, %s2305_s3 }
0x15db   :  { %v816_v38 = vpop.permute.xlu0 %815 }
0x15dc   :  { %v818_v39 = vadd.f32 %v816_v38, %v808_v16 }
0x15de   :  { %2159 = vtanh.f32 %v818_v39 }
0x15e4   :  { %v2160_v22 = vpop.eup %2159 }
0x15e5   :  { %821 = vrot.lane.b32.xlu1 %v2160_v22, %s2305_s3 }
0x1657   :  { %v822_v15 = vpop.permute.xlu1 %821 }
0x1658   :  { %v2591_v40 = vmul.f32 %v822_v15, %v805_v7 }
0x165a   :  { %826 = vrot.lane.b32.xlu2 %v2591_v40, %s2306_s0 }
0x16b4   :  { %v827_v41 = vpop.permute.xlu2 %826 }
0x16b5   :  { %829 = vst.msk [vmem:[#allocation3 + $0x2] sm:$0x3] %vm158_vm5, %v827_v41  ;;  %2031 = vmatmul.msk.f32.vlgmr.msra.gmra.mxu1 %vm93_vm6, %v827_v41 }
0x1732   :  { %v855_v43 = vpop.f32.mrf.mxu1 }
0x1733   :  { %v856_v44 = vadd.f32 %v855_v43, %v834_v42 }
0x1735   :  { %2161 = vtanh.f32 %v856_v44  ;;  %v2032_v46 = vmul.f32 -1.442695, %v856_v44 }
0x1737   :  { %2163 = vpow2.f32 %v2032_v46 }
0x173b   :  { %v2162_v45 = vpop.eup %2161 }
0x173c   :  { %880 = vrot.lane.b32.xlu0 %v2162_v45, %s2304_s30 }
0x173d   :  { %v2164_v47 = vpop.eup %2163 }
0x173e   :  { %v861_v49 = vadd.f32 1.0, %v2164_v47 }
0x1740   :  { %2165 = vrcp.f32 %v861_v49  ;;  %v873_v59 = vand.u32 2147483648, %v861_v49  ;;  %vm867_vm3 = vweird.f32 %v861_v49  ;;  %v871_v60 = vand.u32 2147483647, %v861_v49 }
0x1742   :  { %v874_v62 = vor.u32 1.1754944e-38, %v873_v59  ;;  %vm872_vm4 = vcmp.eq.f32.partialorder %v871_v60, 8.507059e+37 }
0x1746   :  { %v2166_v50 = vpop.eup %2165 }
0x1747   :  { %v863_v51 = vmul.f32 %v2166_v50, %v861_v49  ;;  %vm868_vm2 = vweird.f32 %v2166_v50 }
0x1748   :  { %vm869_vm0 = vmor %vm867_vm3, %vm868_vm2 }
0x1749   :  { %v864_v54 = vsub.f32 1.0, %v863_v51 }
0x174b   :  { %v865_v55 = vmul.f32 %v2166_v50, %v864_v54 }
0x174d   :  { %v866_v58 = vadd.f32 %v2166_v50, %v865_v55 }
0x174f   :  { %v870_v61 = vsel %vm869_vm0, %v2166_v50, %v866_v58 }
0x1750   :  { %v875_v0 = vsel %vm872_vm4, %v874_v62, %v870_v61 }
0x1751   :  { %v878_v1 = vmul.f32 %v875_v0, %v818_v39 }
0x17ae   :  { %v881_v63 = vpop.permute.xlu0 %880 }
0x17af   :  { %v883_v5 = vmul.f32 %v881_v63, %v875_v0 }
0x17b1   :  { %885 = vrot.lane.b32.xlu1 %v883_v5, %s2305_s3 }
0x1823   :  { %v886_v2 = vpop.permute.xlu1 %885 }
0x1824   :  { %v888_v3 = vadd.f32 %v886_v2, %v878_v1 }
0x1826   :  { %2167 = vtanh.f32 %v888_v3 }
0x182c   :  { %v2168_v6 = vpop.eup %2167 }
0x182d   :  { %891 = vrot.lane.b32.xlu2 %v2168_v6, %s2305_s3 }
0x1887   :  { %v892_v8 = vpop.permute.xlu2 %891 }
0x1888   :  { %v2601_v9 = vmul.f32 %v892_v8, %v875_v0  ;;  %v1043_v0 = vrot.slane %v2573_v53, 2 }
0x188a   :  { %896 = vrot.lane.b32.xlu0 %v2601_v9, %s2306_s0 }
0x18fc   :  { %v897_v10 = vpop.permute.xlu0 %896 }
0x18fd   :  { %899 = vst.msk [vmem:[#allocation3 + $0x4] sm:$0x3] %vm158_vm5, %v897_v10  ;;  %2033 = vmatmul.msk.f32.vlgmr.msra.gmra.mxu3 %vm93_vm6, %v897_v10 }
0x1980   :  { %v925_v12 = vpop.f32.mrf.mxu3 }
0x1981   :  { %v926_v13 = vadd.f32 %v925_v12, %v904_v11 }
0x1983   :  { %2169 = vtanh.f32 %v926_v13  ;;  %v2034_v17 = vmul.f32 -1.442695, %v926_v13 }
0x1985   :  { %2171 = vpow2.f32 %v2034_v17 }
0x1989   :  { %v2170_v14 = vpop.eup %2169 }
0x198a   :  { %950 = vrot.lane.b32.xlu1 %v2170_v14, %s2304_s30 }
0x198b   :  { %v2172_v18 = vpop.eup %2171 }
0x198c   :  { %v931_v19 = vadd.f32 1.0, %v2172_v18 }
0x198e   :  { %2173 = vrcp.f32 %v931_v19  ;;  %v943_v26 = vand.u32 2147483648, %v931_v19  ;;  %vm937_vm10 = vweird.f32 %v931_v19  ;;  %v941_v56 = vand.u32 2147483647, %v931_v19 }
0x1990   :  { %v944_v27 = vor.u32 1.1754944e-38, %v943_v26  ;;  %vm942_vm12 = vcmp.eq.f32.partialorder %v941_v56, 8.507059e+37 }
0x1994   :  { %v2174_v20 = vpop.eup %2173 }
0x1995   :  { %v933_v21 = vmul.f32 %v2174_v20, %v931_v19  ;;  %vm938_vm9 = vweird.f32 %v2174_v20 }
0x1996   :  { %vm939_vm11 = vmor %vm937_vm10, %vm938_vm9 }
0x1997   :  { %v934_v23 = vsub.f32 1.0, %v933_v21 }
0x1999   :  { %v935_v24 = vmul.f32 %v2174_v20, %v934_v23 }
0x199b   :  { %v936_v25 = vadd.f32 %v2174_v20, %v935_v24 }
0x199d   :  { %v940_v31 = vsel %vm939_vm11, %v2174_v20, %v936_v25 }
0x199e   :  { %v945_v28 = vsel %vm942_vm12, %v944_v27, %v940_v31 }
0x199f   :  { %v948_v30 = vmul.f32 %v945_v28, %v888_v3 }
0x19fc   :  { %v951_v48 = vpop.permute.xlu1 %950 }
0x19fd   :  { %v953_v29 = vmul.f32 %v951_v48, %v945_v28 }
0x19ff   :  { %955 = vrot.lane.b32.xlu2 %v953_v29, %s2305_s3  ;;  %v1113_v29 = vrot.slane %v2573_v53, 4 }
0x1a59   :  { %v956_v32 = vpop.permute.xlu2 %955 }
0x1a5a   :  { %v958_v33 = vadd.f32 %v956_v32, %v948_v30 }
0x1a5c   :  { %2175 = vtanh.f32 %v958_v33 }
0x1a62   :  { %v2176_v34 = vpop.eup %2175 }
0x1a63   :  { %961 = vrot.lane.b32.xlu0 %v2176_v34, %s2305_s3 }
0x1ad5   :  { %v962_v35 = vpop.permute.xlu0 %961 }
0x1ad6   :  { %v2611_v36 = vmul.f32 %v962_v35, %v945_v28 }
0x1ad8   :  { %966 = vrot.lane.b32.xlu1 %v2611_v36, %s2306_s0 }
0x1b4a   :  { %v967_v37 = vpop.permute.xlu1 %966 }
0x1b4b   :  { %969 = vst.msk [vmem:[#allocation3 + $0x6] sm:$0x3] %vm158_vm5, %v967_v37  ;;  %2035 = vmatmul.msk.f32.vlgmr.msrb.gmra.mxu0 %vm93_vm6, %v967_v37 }
0x1bc8   :  { %v993_v7 = vpop.f32.mrf.mxu0 }
0x1bc9   :  { %v994_v57 = vadd.f32 %v993_v7, %v2573_v53 }
0x1bcb   :  { %2177 = vtanh.f32 %v994_v57  ;;  %v2036_v38 = vmul.f32 -1.442695, %v994_v57 }
0x1bcd   :  { %2179 = vpow2.f32 %v2036_v38 }
0x1bd1   :  { %v2178_v16 = vpop.eup %2177 }
0x1bd2   :  { %1018 = vrot.lane.b32.xlu2 %v2178_v16, %s2304_s30 }
0x1bd3   :  { %v2180_v39 = vpop.eup %2179 }
0x1bd4   :  { %v999_v22 = vadd.f32 1.0, %v2180_v39 }
0x1bd6   :  { %2181 = vrcp.f32 %v999_v22  ;;  %v1011_v45 = vand.u32 2147483648, %v999_v22  ;;  %vm1005_vm14 = vweird.f32 %v999_v22  ;;  %v1009_v46 = vand.u32 2147483647, %v999_v22 }
0x1bd8   :  { %v1012_v49 = vor.u32 1.1754944e-38, %v1011_v45  ;;  %vm1010_vm1 = vcmp.eq.f32.partialorder %v1009_v46, 8.507059e+37 }
0x1bdc   :  { %v2182_v15 = vpop.eup %2181 }
0x1bdd   :  { %v1001_v41 = vmul.f32 %v2182_v15, %v999_v22  ;;  %vm1006_vm13 = vweird.f32 %v2182_v15 }
0x1bde   :  { %vm1007_vm15 = vmor %vm1005_vm14, %vm1006_vm13 }
0x1bdf   :  { %v1002_v42 = vsub.f32 1.0, %v1001_v41 }
0x1be1   :  { %v1003_v43 = vmul.f32 %v2182_v15, %v1002_v42 }
0x1be3   :  { %v1004_v44 = vadd.f32 %v2182_v15, %v1003_v43 }
0x1be5   :  { %v1008_v47 = vsel %vm1007_vm15, %v2182_v15, %v1004_v44 }
0x1be6   :  { %v1013_v51 = vsel %vm1010_vm1, %v1012_v49, %v1008_v47 }
0x1be7   :  { %v1016_v55 = vmul.f32 %v1013_v51, %v958_v33 }
0x1c2c   :  { %v1019_v50 = vpop.permute.xlu2 %1018 }
0x1c2d   :  { %v1021_v54 = vmul.f32 %v1019_v50, %v1013_v51 }
0x1c2f   :  { %1023 = vrot.lane.b32.xlu0 %v1021_v54, %s2305_s3 }
0x1ca1   :  { %v1024_v58 = vpop.permute.xlu0 %1023 }
0x1ca2   :  { %v1026_v59 = vadd.f32 %v1024_v58, %v1016_v55  ;;  %v1183_v58 = vrot.slane %v2573_v53, 6 }
0x1ca4   :  { %2183 = vtanh.f32 %v1026_v59 }
0x1caa   :  { %v2184_v60 = vpop.eup %2183 }
0x1cab   :  { %1029 = vrot.lane.b32.xlu1 %v2184_v60, %s2305_s3 }
0x1d1d   :  { %v1030_v61 = vpop.permute.xlu1 %1029 }
0x1d1e   :  { %v2621_v62 = vmul.f32 %v1030_v61, %v1013_v51 }
0x1d20   :  { %1034 = vrot.lane.b32.xlu2 %v2621_v62, %s2306_s0 }
0x1d7a   :  { %v2625_v63 = vpop.permute.xlu2 %1034 }
0x1d7b   :  { %2037 = vmatmul.msk.f32.vlgmr.msrb.gmra.mxu1 %vm93_vm6, %v2625_v63 }
0x1df8   :  { %v1064_v5 = vpop.f32.mrf.mxu1 }
0x1df9   :  { %v1065_v1 = vadd.f32 %v1064_v5, %v1043_v0 }
0x1dfb   :  { %2185 = vtanh.f32 %v1065_v1  ;;  %v2038_v3 = vmul.f32 -1.442695, %v1065_v1 }
0x1dfd   :  { %2187 = vpow2.f32 %v2038_v3 }
0x1e01   :  { %v2186_v2 = vpop.eup %2185 }
0x1e02   :  { %1089 = vrot.lane.b32.xlu0 %v2186_v2, %s2304_s30 }
0x1e03   :  { %v2188_v6 = vpop.eup %2187 }
0x1e04   :  { %v1070_v8 = vadd.f32 1.0, %v2188_v6 }
0x1e06   :  { %2189 = vrcp.f32 %v1070_v8  ;;  %v1082_v17 = vand.u32 2147483648, %v1070_v8  ;;  %vm1076_vm3 = vweird.f32 %v1070_v8  ;;  %v1080_v18 = vand.u32 2147483647, %v1070_v8 }
0x1e08   :  { %v1083_v20 = vor.u32 1.1754944e-38, %v1082_v17  ;;  %vm1081_vm4 = vcmp.eq.f32.partialorder %v1080_v18, 8.507059e+37 }
0x1e0c   :  { %v2190_v10 = vpop.eup %2189 }
0x1e0d   :  { %v1072_v11 = vmul.f32 %v2190_v10, %v1070_v8  ;;  %vm1077_vm2 = vweird.f32 %v2190_v10 }
0x1e0e   :  { %vm1078_vm0 = vmor %vm1076_vm3, %vm1077_vm2 }
0x1e0f   :  { %v1073_v12 = vsub.f32 1.0, %v1072_v11 }
0x1e11   :  { %v1074_v13 = vmul.f32 %v2190_v10, %v1073_v12 }
0x1e13   :  { %v1075_v14 = vadd.f32 %v2190_v10, %v1074_v13 }
0x1e15   :  { %v1079_v19 = vsel %vm1078_vm0, %v2190_v10, %v1075_v14 }
0x1e16   :  { %v1084_v23 = vsel %vm1081_vm4, %v1083_v20, %v1079_v19 }
0x1e17   :  { %v1087_v25 = vmul.f32 %v1084_v23, %v1026_v59 }
0x1e74   :  { %v1090_v21 = vpop.permute.xlu0 %1089 }
0x1e75   :  { %v1092_v24 = vmul.f32 %v1090_v21, %v1084_v23 }
0x1e77   :  { %1094 = vrot.lane.b32.xlu1 %v1092_v24, %s2305_s3 }
0x1ee9   :  { %v1095_v26 = vpop.permute.xlu1 %1094 }
0x1eea   :  { %v1097_v56 = vadd.f32 %v1095_v26, %v1087_v25 }
0x1eec   :  { %2191 = vtanh.f32 %v1097_v56 }
0x1ef2   :  { %v2192_v31 = vpop.eup %2191 }
0x1ef3   :  { %1100 = vrot.lane.b32.xlu2 %v2192_v31, %s2305_s3  ;;  %v1258_v31 = vld [vmem:[%s2904_s7 + $0x18] sm:$0xff] }
0x1ef4   :  { %1281 = vmatpush.msra.mxu0 %v1258_v31 }
0x1f4d   :  { %v1101_v27 = vpop.permute.xlu2 %1100 }
0x1f4e   :  { %v2633_v48 = vmul.f32 %v1101_v27, %v1084_v23  ;;  %v1257_v27 = vld [vmem:[%s2904_s7 + $0x10] sm:$0xff] }
0x1f4f   :  { %1282 = vmatpush.msra.mxu0 %v1257_v27 }
0x1f50   :  { %1105 = vrot.lane.b32.xlu0 %v2633_v48, %s2306_s0 }
0x1fc2   :  { %v2637_v28 = vpop.permute.xlu0 %1105 }
0x1fc3   :  { %2039 = vmatmul.msk.f32.vlgmr.msra.gmra.mxu2 %vm93_vm6, %v2637_v28 }
0x2046   :  { %v1134_v30 = vpop.f32.mrf.mxu2 }
0x2047   :  { %v1135_v32 = vadd.f32 %v1134_v30, %v1113_v29  ;;  %v1292_v29 = vld [vmem:[%s2905_s8] sm:$0xff]  ;;  %v1256_v30 = vld [vmem:[%s2904_s7 + $0x8] sm:$0xff] }
0x2048   :  { %1283 = vmatpush.msra.mxu0 %v1256_v30 }
0x2049   :  { %2193 = vtanh.f32 %v1135_v32  ;;  %v2040_v34 = vmul.f32 -1.442695, %v1135_v32  ;;  %v1255_v32 = vld [vmem:[%s2904_s7] sm:$0xff] }
0x204a   :  { %1284 = vmatpush.msra.mxu0 %v1255_v32 }
0x204b   :  { %2195 = vpow2.f32 %v2040_v34 }
0x204f   :  { %v2194_v33 = vpop.eup %2193 }
0x2050   :  { %1159 = vrot.lane.b32.xlu1 %v2194_v33, %s2304_s30 }
0x2051   :  { %v2196_v35 = vpop.eup %2195 }
0x2052   :  { %v1140_v37 = vadd.f32 1.0, %v2196_v35 }
0x2054   :  { %2197 = vrcp.f32 %v1140_v37  ;;  %v1152_v22 = vand.u32 2147483648, %v1140_v37  ;;  %vm1146_vm10 = vweird.f32 %v1140_v37  ;;  %v1150_v15 = vand.u32 2147483647, %v1140_v37 }
0x2056   :  { %v1153_v42 = vor.u32 1.1754944e-38, %v1152_v22  ;;  %vm1151_vm12 = vcmp.eq.f32.partialorder %v1150_v15, 8.507059e+37 }
0x205a   :  { %v2198_v7 = vpop.eup %2197 }
0x205b   :  { %v1142_v57 = vmul.f32 %v2198_v7, %v1140_v37  ;;  %vm1147_vm9 = vweird.f32 %v2198_v7 }
0x205c   :  { %vm1148_vm11 = vmor %vm1146_vm10, %vm1147_vm9  ;;  %vm1355_vm9 = vcmask 58368  }
0x205d   :  { %v1143_v16 = vsub.f32 1.0, %v1142_v57 }
0x205f   :  { %v1144_v38 = vmul.f32 %v2198_v7, %v1143_v16 }
0x2061   :  { %v1145_v39 = vadd.f32 %v2198_v7, %v1144_v38 }
0x2063   :  { %v1149_v41 = vsel %vm1148_vm11, %v2198_v7, %v1145_v39 }
0x2064   :  { %v1154_v44 = vsel %vm1151_vm12, %v1153_v42, %v1149_v41 }
0x2065   :  { %v1157_v46 = vmul.f32 %v1154_v44, %v1097_v56 }
0x20c2   :  { %v1160_v43 = vpop.permute.xlu1 %1159 }
0x20c3   :  { %v1162_v45 = vmul.f32 %v1160_v43, %v1154_v44 }
0x20c5   :  { %1164 = vrot.lane.b32.xlu2 %v1162_v45, %s2305_s3 }
0x211f   :  { %v1165_v47 = vpop.permute.xlu2 %1164 }
0x2120   :  { %v1167_v49 = vadd.f32 %v1165_v47, %v1157_v46 }
0x2122   :  { %2199 = vtanh.f32 %v1167_v49 }
0x2128   :  { %v2200_v50 = vpop.eup %2199 }
0x2129   :  { %1170 = vrot.lane.b32.xlu0 %v2200_v50, %s2305_s3 }
0x219b   :  { %v1171_v51 = vpop.permute.xlu0 %1170 }
0x219c   :  { %v1173_v54 = vmul.f32 %v1171_v51, %v1154_v44 }
0x219e   :  { %1175 = vrot.lane.b32.xlu1 %v1173_v54, %s2306_s0 }
0x2210   :  { %v2646_v55 = vpop.permute.xlu1 %1175 }
0x2211   :  { %2041 = vmatmul.msk.f32.vlgmr.msrb.gmra.mxu3 %vm93_vm6, %v2646_v55 }
0x2294   :  { %v1204_v59 = vpop.f32.mrf.mxu3 }
0x2295   :  { %v1205_v60 = vadd.f32 %v1204_v59, %v1183_v58 }
0x2297   :  { %2201 = vtanh.f32 %v1205_v60  ;;  %v2042_v0 = vmul.f32 -1.442695, %v1205_v60 }
0x2299   :  { %2203 = vpow2.f32 %v2042_v0 }
0x229d   :  { %v2202_v61 = vpop.eup %2201 }
0x229e   :  { %1229 = vrot.lane.b32.xlu2 %v2202_v61, %s2304_s30 }
0x229f   :  { %v2204_v5 = vpop.eup %2203 }
0x22a0   :  { %v1210_v1 = vadd.f32 1.0, %v2204_v5 }
0x22a2   :  { %2205 = vrcp.f32 %v1210_v1  ;;  %v1222_v53 = vand.u32 2147483648, %v1210_v1  ;;  %vm1216_vm14 = vweird.f32 %v1210_v1  ;;  %v1220_v11 = vand.u32 2147483647, %v1210_v1 }
0x22a4   :  { %v1223_v13 = vor.u32 1.1754944e-38, %v1222_v53  ;;  %vm1221_vm1 = vcmp.eq.f32.partialorder %v1220_v11, 8.507059e+37 }
0x22a6   :  { %1038 = vrot.lane.b32.xlu2 %v2621_v62, %s2307_s19 }
0x22a8   :  { %v2206_v2 = vpop.eup %2205 }
0x22a9   :  { %v1212_v3 = vmul.f32 %v2206_v2, %v1210_v1  ;;  %vm1217_vm13 = vweird.f32 %v2206_v2 }
0x22aa   :  { %vm1218_vm15 = vmor %vm1216_vm14, %vm1217_vm13 }
0x22ab   :  { %v1213_v6 = vsub.f32 1.0, %v1212_v3 }
0x22ad   :  { %v1214_v8 = vmul.f32 %v2206_v2, %v1213_v6 }
0x22af   :  { %v1215_v10 = vadd.f32 %v2206_v2, %v1214_v8 }
0x22b1   :  { %v1219_v12 = vsel %vm1218_vm15, %v2206_v2, %v1215_v10 }
0x22b2   :  { %v1224_v62 = vsel %vm1221_vm1, %v1223_v13, %v1219_v12 }
0x22b3   :  { %v1227_v19 = vmul.f32 %v1224_v62, %v1167_v49 }
0x22f8   :  { %v1230_v14 = vpop.permute.xlu2 %1229 }
0x22f9   :  { %v1232_v17 = vmul.f32 %v1230_v14, %v1224_v62 }
0x22fb   :  { %1234 = vrot.lane.b32.xlu0 %v1232_v17, %s2305_s3 }
0x2300   :  { %v1039_v18 = vpop.permute.xlu2 %1038 }
0x2301   :  { %1041 = vst.msk [vmem:[#allocation3 + $0x6] sm:$0x3] %vm163_vm7, %v1039_v18 }
0x2303   :  { %1109 = vrot.lane.b32.xlu0 %v2633_v48, %s2307_s19  ;;  %v1293_v48 = vld [vmem:[%s2905_s8 + $0x8] sm:$0xff] }
0x2304   :  { %1308 = vmatpush.msra.mxu1 %v1293_v48  ;;  %1381 = vmatpush.msrb.mxu2 %v1293_v48 }
0x2305   :  { %1455 = vmatpush.msra.mxu3 %v1293_v48  ;;  %1744 = vmatpush.msrb.mxu0 %v1293_v48 }
0x2306   :  { %1309 = vmatpush.msra.mxu1 %v1292_v29  ;;  %1382 = vmatpush.msrb.mxu2 %v1292_v29 }
0x2307   :  { %1310 = vmatmul.f32.vlgmr.msra.gmra.mxu1 %v2303_v4  ;;  %1456 = vmatpush.msra.mxu3 %v1292_v29  ;;  %v2690_v4 = vld [vmem:[%s2906_s9] ss:$0 sm:$0xff]  ;;  %s2308_s9 = smov 48  }
0x2308   :  { %1526 = vmatpush.msrb.mxu1 %v1293_v48  ;;  %1598 = vmatpush.msra.mxu2 %v1293_v48 }
0x2309   :  { %1673 = vmatpush.msrb.mxu3 %v1293_v48  ;;  %1745 = vmatpush.msrb.mxu0 %v1292_v29 }
0x230a   :  { %1527 = vmatpush.msrb.mxu1 %v1292_v29  ;;  %1599 = vmatpush.msra.mxu2 %v1292_v29 }
0x230b   :  { %1674 = vmatpush.msrb.mxu3 %v1292_v29 }
0x230c   :  { %1818 = vmatpush.msra.mxu1 %v1293_v48 }
0x230e   :  { %1819 = vmatpush.msra.mxu1 %v1292_v29 }
0x236d   :  { %v1235_v20 = vpop.permute.xlu0 %1234 }
0x236e   :  { %v1237_v21 = vadd.f32 %v1235_v20, %v1227_v19 }
0x2370   :  { %2207 = vtanh.f32 %v1237_v21 }
0x2375   :  { %v1110_v23 = vpop.permute.xlu0 %1109 }
0x2376   :  { %v2208_v24 = vpop.eup %2207  ;;  %1112 = vst.msk [vmem:[#allocation3 + $0x4] sm:$0x3] %vm163_vm7, %v1110_v23 }
0x2377   :  { %1240 = vrot.lane.b32.xlu1 %v2208_v24, %s2305_s3 }
0x237f   :  { %1179 = vrot.lane.b32.xlu1 %v1173_v54, %s2307_s19 }
0x2384   :  { %v1311_v37 = vpop.f32.mrf.mxu1 }
0x23e9   :  { %v1241_v25 = vpop.permute.xlu1 %1240 }
0x23ea   :  { %v2661_v26 = vmul.f32 %v1241_v25, %v1224_v62 }
0x23ec   :  { %1249 = vrot.lane.b32.xlu2 %v2661_v26, %s2307_s19 }
0x23f1   :  { %v1180_v56 = vpop.permute.xlu1 %1179 }
0x23f2   :  { %1182 = vst.msk [vmem:[#allocation3 + $0x2] sm:$0x3] %vm163_vm7, %v1180_v56 }
0x2446   :  { %v1250_v33 = vpop.permute.xlu2 %1249 }
0x2447   :  { %1252 = vst.msk [vmem:[#allocation3] sm:$0x3] %vm163_vm7, %v1250_v33 }
0x244e   :  { %v1253_v34 = vld [vmem:[#allocation3] sm:$0xff] }
0x244f   :  { %2043 = vmatmul.msk.f32.vlgmr.msra.gmra.mxu0 %vm665_vm8, %v1253_v34 }
0x24cc   :  { %v1286_v35 = vpop.f32.mrf.mxu0 }
0x24cd   :  { %v2693_v7 = vadd.f32 %v2690_v4, %v1286_v35 }
0x24cf   :  { %v1312_v57 = vadd.f32 %v1311_v37, %v2693_v7  ;;  %v1363_v2 = vrot.slane %v2693_v7, 2  ;;  %v1437_v33 = vrot.slane %v2693_v7, 4 }
0x24d1   :  { %2209 = vtanh.f32 %v1312_v57  ;;  %v2045_v38 = vmul.f32 -1.442695, %v1312_v57 }
0x24d3   :  { %2211 = vpow2.f32 %v2045_v38 }
0x24d7   :  { %v2210_v16 = vpop.eup %2209 }
0x24d8   :  { %1336 = vrot.lane.b32.xlu0 %v2210_v16, %s2304_s30 }
0x24d9   :  { %v2212_v39 = vpop.eup %2211 }
0x24da   :  { %v1317_v22 = vadd.f32 1.0, %v2212_v39 }
0x24dc   :  { %2213 = vrcp.f32 %v1317_v22  ;;  %v1329_v45 = vand.u32 2147483648, %v1317_v22  ;;  %vm1323_vm3 = vweird.f32 %v1317_v22  ;;  %v1327_v46 = vand.u32 2147483647, %v1317_v22 }
0x24de   :  { %v1330_v49 = vor.u32 1.1754944e-38, %v1329_v45  ;;  %vm1328_vm4 = vcmp.eq.f32.partialorder %v1327_v46, 8.507059e+37 }
0x24e2   :  { %v2214_v15 = vpop.eup %2213 }
0x24e3   :  { %v1319_v41 = vmul.f32 %v2214_v15, %v1317_v22  ;;  %vm1324_vm2 = vweird.f32 %v2214_v15 }
0x24e4   :  { %vm1325_vm0 = vmor %vm1323_vm3, %vm1324_vm2 }
0x24e5   :  { %v1320_v42 = vsub.f32 1.0, %v1319_v41 }
0x24e7   :  { %v1321_v43 = vmul.f32 %v2214_v15, %v1320_v42 }
0x24e9   :  { %v1322_v44 = vadd.f32 %v2214_v15, %v1321_v43 }
0x24eb   :  { %v1326_v47 = vsel %vm1325_vm0, %v2214_v15, %v1322_v44 }
0x24ec   :  { %v1331_v51 = vsel %vm1328_vm4, %v1330_v49, %v1326_v47 }
0x24ed   :  { %v1334_v58 = vmul.f32 0.0, %v1331_v51 }
0x254a   :  { %v1337_v50 = vpop.permute.xlu0 %1336 }
0x254b   :  { %v1339_v54 = vmul.f32 %v1337_v50, %v1331_v51 }
0x254d   :  { %1341 = vrot.lane.b32.xlu1 %v1339_v54, %s2305_s3 }
0x25bf   :  { %v1342_v59 = vpop.permute.xlu1 %1341 }
0x25c0   :  { %v1344_v60 = vadd.f32 %v1342_v59, %v1334_v58 }
0x25c2   :  { %2215 = vtanh.f32 %v1344_v60 }
0x25c8   :  { %v2216_v61 = vpop.eup %2215 }
0x25c9   :  { %1347 = vrot.lane.b32.xlu2 %v2216_v61, %s2305_s3 }
0x2623   :  { %v1348_v0 = vpop.permute.xlu2 %1347 }
0x2624   :  { %v2699_v5 = vmul.f32 %v1348_v0, %v1331_v51 }
0x2626   :  { %1352 = vrot.lane.b32.xlu0 %v2699_v5, %s2306_s0 }
0x2698   :  { %v1353_v1 = vpop.permute.xlu0 %1352 }
0x2699   :  { %1356 = vst.msk [vmem:[#allocation4] sm:$0x3] %vm1355_vm9, %v1353_v1  ;;  %2046 = vmatmul.msk.f32.vlgmr.msrb.gmra.mxu2 %vm93_vm6, %v1353_v1  ;;  %v1508_v1 = vrot.slane %v2693_v7, 6 }
0x271c   :  { %v1384_v3 = vpop.f32.mrf.mxu2 }
0x271d   :  { %v1385_v6 = vadd.f32 %v1384_v3, %v1363_v2 }
0x271f   :  { %2217 = vtanh.f32 %v1385_v6  ;;  %v2047_v10 = vmul.f32 -1.442695, %v1385_v6 }
0x2721   :  { %2219 = vpow2.f32 %v2047_v10 }
0x2725   :  { %v2218_v8 = vpop.eup %2217 }
0x2726   :  { %1409 = vrot.lane.b32.xlu1 %v2218_v8, %s2304_s30 }
0x2727   :  { %v2220_v53 = vpop.eup %2219 }
0x2728   :  { %v1390_v11 = vadd.f32 1.0, %v2220_v53 }
0x272a   :  { %2221 = vrcp.f32 %v1390_v11  ;;  %v1402_v18 = vand.u32 2147483648, %v1390_v11  ;;  %vm1396_vm11 = vweird.f32 %v1390_v11  ;;  %v1400_v19 = vand.u32 2147483647, %v1390_v11 }
0x272c   :  { %v1403_v21 = vor.u32 1.1754944e-38, %v1402_v18  ;;  %vm1401_vm13 = vcmp.eq.f32.partialorder %v1400_v19, 8.507059e+37 }
0x2730   :  { %v2222_v12 = vpop.eup %2221 }
0x2731   :  { %v1392_v13 = vmul.f32 %v2222_v12, %v1390_v11  ;;  %vm1397_vm10 = vweird.f32 %v2222_v12 }
0x2732   :  { %vm1398_vm12 = vmor %vm1396_vm11, %vm1397_vm10 }
0x2733   :  { %v1393_v14 = vsub.f32 1.0, %v1392_v13 }
0x2735   :  { %v1394_v62 = vmul.f32 %v2222_v12, %v1393_v14 }
0x2737   :  { %v1395_v17 = vadd.f32 %v2222_v12, %v1394_v62 }
0x2739   :  { %v1399_v20 = vsel %vm1398_vm12, %v2222_v12, %v1395_v17 }
0x273a   :  { %v1404_v24 = vsel %vm1401_vm13, %v1403_v21, %v1399_v20 }
0x273b   :  { %v1407_v56 = vmul.f32 %v1404_v24, %v1344_v60 }
0x2798   :  { %v1410_v23 = vpop.permute.xlu1 %1409 }
0x2799   :  { %v1412_v25 = vmul.f32 %v1410_v23, %v1404_v24 }
0x279b   :  { %1414 = vrot.lane.b32.xlu2 %v1412_v25, %s2305_s3 }
0x27f5   :  { %v1415_v31 = vpop.permute.xlu2 %1414 }
0x27f6   :  { %v1417_v27 = vadd.f32 %v1415_v31, %v1407_v56 }
0x27f8   :  { %2223 = vtanh.f32 %v1417_v27 }
0x27fe   :  { %v2224_v48 = vpop.eup %2223 }
0x27ff   :  { %1420 = vrot.lane.b32.xlu0 %v2224_v48, %s2305_s3 }
0x2871   :  { %v1421_v29 = vpop.permute.xlu0 %1420 }
0x2872   :  { %v2708_v30 = vmul.f32 %v1421_v29, %v1404_v24 }
0x2874   :  { %1435 = vrot.lane.b32.xlu1 %v2708_v30, %s2306_s0 }
0x28e6   :  { %v1436_v32 = vpop.permute.xlu1 %1435 }
0x28e7   :  { %2048 = vmatmul.msk.f32.vlgmr.msra.gmra.mxu3 %vm93_vm6, %v1436_v32 }
0x296a   :  { %v1458_v34 = vpop.f32.mrf.mxu3 }
0x296b   :  { %v1459_v35 = vadd.f32 %v1458_v34, %v1437_v33 }
0x296d   :  { %2225 = vtanh.f32 %v1459_v35  ;;  %v2049_v57 = vmul.f32 -1.442695, %v1459_v35 }
0x296f   :  { %2227 = vpow2.f32 %v2049_v57 }
0x2973   :  { %v2226_v37 = vpop.eup %2225 }
0x2974   :  { %1483 = vrot.lane.b32.xlu2 %v2226_v37, %s2304_s30 }
0x2975   :  { %v2228_v16 = vpop.eup %2227 }
0x2976   :  { %v1464_v38 = vadd.f32 1.0, %v2228_v16 }
0x2978   :  { %2229 = vrcp.f32 %v1464_v38  ;;  %v1476_v43 = vand.u32 2147483648, %v1464_v38  ;;  %vm1470_vm15 = vweird.f32 %v1464_v38  ;;  %v1474_v44 = vand.u32 2147483647, %v1464_v38 }
0x297a   :  { %v1477_v46 = vor.u32 1.1754944e-38, %v1476_v43  ;;  %vm1475_vm2 = vcmp.eq.f32.partialorder %v1474_v44, 8.507059e+37 }
0x297e   :  { %v2230_v39 = vpop.eup %2229 }
0x297f   :  { %v1466_v22 = vmul.f32 %v2230_v39, %v1464_v38  ;;  %vm1471_vm14 = vweird.f32 %v2230_v39 }
0x2980   :  { %vm1472_vm1 = vmor %vm1470_vm15, %vm1471_vm14 }
0x2981   :  { %v1467_v15 = vsub.f32 1.0, %v1466_v22 }
0x2983   :  { %v1468_v41 = vmul.f32 %v2230_v39, %v1467_v15 }
0x2985   :  { %v1469_v42 = vadd.f32 %v2230_v39, %v1468_v41 }
0x2987   :  { %v1473_v45 = vsel %vm1472_vm1, %v2230_v39, %v1469_v42 }
0x2988   :  { %v1478_v49 = vsel %vm1475_vm2, %v1477_v46, %v1473_v45 }
0x2989   :  { %v1481_v51 = vmul.f32 %v1478_v49, %v1417_v27 }
0x29ce   :  { %v1484_v47 = vpop.permute.xlu2 %1483 }
0x29cf   :  { %v1486_v50 = vmul.f32 %v1484_v47, %v1478_v49 }
0x29d1   :  { %1488 = vrot.lane.b32.xlu0 %v1486_v50, %s2305_s3 }
0x2a43   :  { %v1489_v54 = vpop.permute.xlu0 %1488 }
0x2a44   :  { %v1491_v58 = vadd.f32 %v1489_v54, %v1481_v51 }
0x2a46   :  { %2231 = vtanh.f32 %v1491_v58 }
0x2a4c   :  { %v2232_v59 = vpop.eup %2231 }
0x2a4d   :  { %1494 = vrot.lane.b32.xlu1 %v2232_v59, %s2305_s3 }
0x2abf   :  { %v1495_v60 = vpop.permute.xlu1 %1494 }
0x2ac0   :  { %v2717_v61 = vmul.f32 %v1495_v60, %v1478_v49 }
0x2ac2   :  { %1506 = vrot.lane.b32.xlu2 %v2717_v61, %s2306_s0 }
0x2b1c   :  { %v1507_v0 = vpop.permute.xlu2 %1506 }
0x2b1d   :  { %2050 = vmatmul.msk.f32.vlgmr.msrb.gmra.mxu1 %vm93_vm6, %v1507_v0 }
0x2b9a   :  { %v1529_v2 = vpop.f32.mrf.mxu1 }
0x2b9b   :  { %v1530_v3 = vadd.f32 %v1529_v2, %v1508_v1 }
0x2b9d   :  { %2233 = vtanh.f32 %v1530_v3  ;;  %v2051_v8 = vmul.f32 -1.442695, %v1530_v3 }
0x2b9f   :  { %2235 = vpow2.f32 %v2051_v8 }
0x2ba3   :  { %v2234_v6 = vpop.eup %2233 }
0x2ba4   :  { %1554 = vrot.lane.b32.xlu0 %v2234_v6, %s2304_s30 }
0x2ba5   :  { %v2236_v10 = vpop.eup %2235 }
0x2ba6   :  { %v1535_v53 = vadd.f32 1.0, %v2236_v10 }
0x2ba8   :  { %2237 = vrcp.f32 %v1535_v53  ;;  %v1547_v62 = vand.u32 2147483648, %v1535_v53  ;;  %vm1541_vm0 = vweird.f32 %v1535_v53  ;;  %v1545_v17 = vand.u32 2147483647, %v1535_v53 }
0x2baa   :  { %vm1546_vm9 = vcmp.eq.f32.partialorder %v1545_v17, 8.507059e+37 }
0x2bac   :  { %759 = vrot.lane.b32.xlu0 %v2581_v52, %s2307_s19  ;;  %v1548_v52 = vor.u32 1.1754944e-38, %v1547_v62 }
0x2bae   :  { %v2238_v11 = vpop.eup %2237 }
0x2baf   :  { %v1537_v12 = vmul.f32 %v2238_v11, %v1535_v53  ;;  %vm1542_vm3 = vweird.f32 %v2238_v11 }
0x2bb0   :  { %vm1543_vm4 = vmor %vm1541_vm0, %vm1542_vm3 }
0x2bb1   :  { %v1538_v7 = vsub.f32 1.0, %v1537_v12 }
0x2bb3   :  { %v1539_v13 = vmul.f32 %v2238_v11, %v1538_v7 }
0x2bb4   :  { %970 = vrot.lane.b32.xlu0 %v2611_v36, %s2307_s19 }
0x2bb5   :  { %v1540_v14 = vadd.f32 %v2238_v11, %v1539_v13 }
0x2bb7   :  { %v1544_v18 = vsel %vm1543_vm4, %v2238_v11, %v1540_v14 }
0x2bb8   :  { %v1549_v36 = vsel %vm1546_vm9, %v1548_v52, %v1544_v18 }
0x2bb9   :  { %v1552_v24 = vmul.f32 %v1549_v36, %v1491_v58 }
0x2c16   :  { %v1555_v19 = vpop.permute.xlu0 %1554 }
0x2c17   :  { %v1557_v20 = vmul.f32 %v1555_v19, %v1549_v36 }
0x2c19   :  { %1559 = vrot.lane.b32.xlu1 %v1557_v20, %s2305_s3 }
0x2c1e   :  { %v760_v21 = vpop.permute.xlu0 %759 }
0x2c1f   :  { %762 = vst.msk [vmem:[#allocation3 + $0xe] sm:$0x3] %vm163_vm7, %v760_v21 }
0x2c21   :  { %830 = vrot.lane.b32.xlu1 %v2591_v40, %s2307_s19 }
0x2c26   :  { %v971_v23 = vpop.permute.xlu0 %970 }
0x2c27   :  { %973 = vst.msk [vmem:[#allocation3 + $0x8] sm:$0x3] %vm163_vm7, %v971_v23 }
0x2c28   :  { %1037 = vst.msk [vmem:[#allocation3 + $0x8] sm:$0x3] %vm158_vm5, %v2625_v63 }
0x2c29   :  { %1245 = vrot.lane.b32.xlu1 %v2661_v26, %s2306_s0 }
0x2c8b   :  { %v1560_v25 = vpop.permute.xlu1 %1559 }
0x2c8c   :  { %v1562_v56 = vadd.f32 %v1560_v25, %v1552_v24 }
0x2c8e   :  { %2239 = vtanh.f32 %v1562_v56 }
0x2c93   :  { %v831_v31 = vpop.permute.xlu1 %830 }
0x2c94   :  { %v2240_v27 = vpop.eup %2239  ;;  %833 = vst.msk [vmem:[#allocation3 + $0xc] sm:$0x3] %vm163_vm7, %v831_v31 }
0x2c95   :  { %1178 = vst.msk [vmem:[#allocation3 + $0xc] sm:$0x3] %vm158_vm5, %v2646_v55  ;;  %1565 = vrot.lane.b32.xlu2 %v2240_v27, %s2305_s3 }
0x2c9b   :  { %v1246_v40 = vpop.permute.xlu1 %1245 }
0x2c9c   :  { %1248 = vst.msk [vmem:[#allocation3 + $0xe] sm:$0x3] %vm158_vm5, %v1246_v40 }
0x2c9d   :  { %900 = vrot.lane.b32.xlu2 %v2601_v9, %s2307_s19 }
0x2cef   :  { %v1566_v63 = vpop.permute.xlu2 %1565 }
0x2cf0   :  { %v2744_v26 = vmul.f32 %v1566_v63, %v1549_v36 }
0x2cf2   :  { %1580 = vrot.lane.b32.xlu2 %v2744_v26, %s2306_s0 }
0x2cf7   :  { %v901_v48 = vpop.permute.xlu2 %900 }
0x2cf8   :  { %903 = vst.msk [vmem:[#allocation3 + $0xa] sm:$0x3] %vm163_vm7, %v901_v48 }
0x2cf9   :  { %1108 = vst.msk [vmem:[#allocation3 + $0xa] sm:$0x3] %vm158_vm5, %v2637_v28 }
0x2d00   :  { %v1254_v55 = vld [vmem:[#allocation3 + $0x8] sm:$0xff] }
0x2d01   :  { %2044 = vmatmul.msk.f32.gmra.mxu0 %vm665_vm8, %v1254_v55 }
0x2d4c   :  { %v1581_v29 = vpop.permute.xlu2 %1580 }
0x2d4d   :  { %2052 = vmatmul.msk.f32.vlgmr.msra.gmra.mxu2 %vm93_vm6, %v1581_v29 }
0x2d7e   :  { %v1289_v32 = vpop.f32.mrf.mxu0 }
0x2d7f   :  { %v2754_v9 = vadd.f32 %v2690_v4, %v1289_v32 }
0x2d81   :  { %v1655_v60 = vrot.slane %v2754_v9, 2  ;;  %v1726_v31 = vrot.slane %v2754_v9, 4 }
0x2dd0   :  { %v1601_v33 = vpop.f32.mrf.mxu2 }
0x2dd1   :  { %v1602_v34 = vadd.f32 %v1601_v33, %v2754_v9 }
0x2dd3   :  { %2241 = vtanh.f32 %v1602_v34  ;;  %v2053_v37 = vmul.f32 -1.442695, %v1602_v34 }
0x2dd5   :  { %2243 = vpow2.f32 %v2053_v37 }
0x2dd9   :  { %v2242_v35 = vpop.eup %2241 }
0x2dda   :  { %1626 = vrot.lane.b32.xlu0 %v2242_v35, %s2304_s30 }
0x2ddb   :  { %v2244_v28 = vpop.eup %2243 }
0x2ddc   :  { %v1607_v57 = vadd.f32 1.0, %v2244_v28 }
0x2dde   :  { %2245 = vrcp.f32 %v1607_v57  ;;  %v1619_v4 = vand.u32 2147483648, %v1607_v57  ;;  %vm1613_vm7 = vweird.f32 %v1607_v57  ;;  %v1617_v41 = vand.u32 2147483647, %v1607_v57 }
0x2de0   :  { %v1620_v43 = vor.u32 1.1754944e-38, %v1619_v4  ;;  %vm1618_vm11 = vcmp.eq.f32.partialorder %v1617_v41, 8.507059e+37 }
0x2de4   :  { %v2246_v16 = vpop.eup %2245 }
0x2de5   :  { %v1609_v38 = vmul.f32 %v2246_v16, %v1607_v57  ;;  %vm1614_vm5 = vweird.f32 %v2246_v16 }
0x2de6   :  { %vm1615_vm10 = vmor %vm1613_vm7, %vm1614_vm5  ;;  %vm1360_vm7 = vcmask 1042368  }
0x2de7   :  { %v1610_v39 = vsub.f32 1.0, %v1609_v38 }
0x2de9   :  { %v1611_v22 = vmul.f32 %v2246_v16, %v1610_v39 }
0x2deb   :  { %v1612_v15 = vadd.f32 %v2246_v16, %v1611_v22 }
0x2ded   :  { %v1616_v42 = vsel %vm1615_vm10, %v2246_v16, %v1612_v15  ;;  %vm1428_vm10 = vcmask 189568  }
0x2dee   :  { %v1621_v45 = vsel %vm1618_vm11, %v1620_v43, %v1616_v42  ;;  %vm1433_vm11 = vcmask 911168  }
0x2def   :  { %v1624_v47 = vmul.f32 %v1621_v45, %v1562_v56 }
0x2e4c   :  { %v1627_v44 = vpop.permute.xlu0 %1626 }
0x2e4d   :  { %v1629_v46 = vmul.f32 %v1627_v44, %v1621_v45 }
0x2e4f   :  { %1631 = vrot.lane.b32.xlu1 %v1629_v46, %s2305_s3 }
0x2ec1   :  { %v1632_v49 = vpop.permute.xlu1 %1631 }
0x2ec2   :  { %v1634_v50 = vadd.f32 %v1632_v49, %v1624_v47  ;;  %v1800_v47 = vrot.slane %v2754_v9, 6 }
0x2ec4   :  { %2247 = vtanh.f32 %v1634_v50 }
0x2eca   :  { %v2248_v51 = vpop.eup %2247 }
0x2ecb   :  { %1637 = vrot.lane.b32.xlu2 %v2248_v51, %s2305_s3 }
0x2f25   :  { %v1638_v54 = vpop.permute.xlu2 %1637 }
0x2f26   :  { %v2760_v58 = vmul.f32 %v1638_v54, %v1621_v45 }
0x2f28   :  { %1652 = vrot.lane.b32.xlu0 %v2760_v58, %s2306_s0 }
0x2f9a   :  { %v1653_v59 = vpop.permute.xlu0 %1652 }
0x2f9b   :  { %2054 = vmatmul.msk.f32.vlgmr.msrb.gmra.mxu3 %vm93_vm6, %v1653_v59 }
0x301e   :  { %v1676_v0 = vpop.f32.mrf.mxu3 }
0x301f   :  { %v1677_v1 = vadd.f32 %v1676_v0, %v1655_v60 }
0x3021   :  { %2249 = vtanh.f32 %v1677_v1  ;;  %v2055_v3 = vmul.f32 -1.442695, %v1677_v1 }
0x3023   :  { %2251 = vpow2.f32 %v2055_v3 }
0x3027   :  { %v2250_v2 = vpop.eup %2249 }
0x3028   :  { %1701 = vrot.lane.b32.xlu1 %v2250_v2, %s2304_s30 }
0x3029   :  { %v2252_v6 = vpop.eup %2251 }
0x302a   :  { %v1682_v8 = vadd.f32 1.0, %v2252_v6 }
0x302c   :  { %2253 = vrcp.f32 %v1682_v8  ;;  %v1694_v13 = vand.u32 2147483648, %v1682_v8  ;;  %vm1688_vm13 = vweird.f32 %v1682_v8  ;;  %v1692_v14 = vand.u32 2147483647, %v1682_v8 }
0x302e   :  { %v1695_v17 = vor.u32 1.1754944e-38, %v1694_v13  ;;  %vm1693_vm15 = vcmp.eq.f32.partialorder %v1692_v14, 8.507059e+37 }
0x3032   :  { %v2254_v10 = vpop.eup %2253 }
0x3033   :  { %v1684_v53 = vmul.f32 %v2254_v10, %v1682_v8  ;;  %vm1689_vm12 = vweird.f32 %v2254_v10 }
0x3034   :  { %vm1690_vm14 = vmor %vm1688_vm13, %vm1689_vm12  ;;  %vm1498_vm12 = vcmask 320768   ;;  %vm1504_vm13 = vcmask 779968  }
0x3035   :  { %v1685_v11 = vsub.f32 1.0, %v1684_v53 }
0x3037   :  { %v1686_v12 = vmul.f32 %v2254_v10, %v1685_v11 }
0x3039   :  { %v1687_v7 = vadd.f32 %v2254_v10, %v1686_v12 }
0x303b   :  { %v1691_v62 = vsel %vm1690_vm14, %v2254_v10, %v1687_v7  ;;  %vm1573_vm14 = vcmask 451968  }
0x303c   :  { %v1696_v52 = vsel %vm1693_vm15, %v1695_v17, %v1691_v62  ;;  %vm1578_vm15 = vcmask 648768  }
0x303d   :  { %v1699_v36 = vmul.f32 %v1696_v52, %v1634_v50 }
0x309a   :  { %v1702_v18 = vpop.permute.xlu1 %1701 }
0x309b   :  { %v1704_v19 = vmul.f32 %v1702_v18, %v1696_v52 }
0x309d   :  { %1706 = vrot.lane.b32.xlu2 %v1704_v19, %s2305_s3 }
0x30f7   :  { %v1707_v20 = vpop.permute.xlu2 %1706 }
0x30f8   :  { %v1709_v21 = vadd.f32 %v1707_v20, %v1699_v36 }
0x30fa   :  { %2255 = vtanh.f32 %v1709_v21 }
0x3100   :  { %v2256_v23 = vpop.eup %2255 }
0x3101   :  { %1712 = vrot.lane.b32.xlu0 %v2256_v23, %s2305_s3 }
0x3173   :  { %v1713_v24 = vpop.permute.xlu0 %1712 }
0x3174   :  { %v2769_v25 = vmul.f32 %v1713_v24, %v1696_v52 }
0x3176   :  { %1724 = vrot.lane.b32.xlu1 %v2769_v25, %s2306_s0 }
0x31e8   :  { %v1725_v56 = vpop.permute.xlu1 %1724 }
0x31e9   :  { %2056 = vmatmul.msk.f32.vlgmr.msrb.gmra.mxu0 %vm93_vm6, %v1725_v56  ;;  %v1888_v56 = vld [vmem:[%s2907_s10 + $0x78] sm:$0xff] }
0x31ea   :  { %1893 = vmatpush.msrb.mxu2 %v1888_v56 }
0x3266   :  { %v1747_v27 = vpop.f32.mrf.mxu0 }
0x3267   :  { %v1748_v40 = vadd.f32 %v1747_v27, %v1726_v31  ;;  %v1887_v31 = vld [vmem:[%s2907_s10 + $0x70] sm:$0xff]  ;;  %v1886_v27 = vld [vmem:[%s2907_s10 + $0x68] sm:$0xff] }
0x3268   :  { %1894 = vmatpush.msrb.mxu2 %v1887_v31 }
0x3269   :  { %2257 = vtanh.f32 %v1748_v40  ;;  %v2057_v48 = vmul.f32 -1.442695, %v1748_v40  ;;  %v1884_v40 = vld [vmem:[%s2907_s10 + $0x58] sm:$0xff] }
0x326a   :  { %1895 = vmatpush.msrb.mxu2 %v1886_v27 }
0x326b   :  { %2259 = vpow2.f32 %v2057_v48  ;;  %v1882_v48 = vld [vmem:[%s2907_s10 + $0x48] sm:$0xff] }
0x326f   :  { %v2258_v63 = vpop.eup %2257 }
0x3270   :  { %1772 = vrot.lane.b32.xlu2 %v2258_v63, %s2304_s30  ;;  %v1883_v63 = vld [vmem:[%s2907_s10 + $0x50] sm:$0xff] }
0x3271   :  { %v2260_v55 = vpop.eup %2259 }
0x3272   :  { %v1753_v29 = vadd.f32 1.0, %v2260_v55  ;;  %v1881_v55 = vld [vmem:[%s2907_s10 + $0x40] sm:$0xff] }
0x3274   :  { %2261 = vrcp.f32 %v1753_v29  ;;  %v1765_v28 = vand.u32 2147483648, %v1753_v29  ;;  %vm1759_vm2 = vweird.f32 %v1753_v29  ;;  %v1763_v57 = vand.u32 2147483647, %v1753_v29 }
0x3276   :  { %v1766_v38 = vor.u32 1.1754944e-38, %v1765_v28  ;;  %vm1764_vm0 = vcmp.eq.f32.partialorder %v1763_v57, 8.507059e+37  ;;  %v1874_v28 = vld [vmem:[%s2907_s10 + $0x8] sm:$0xff]  ;;  %v1873_v57 = vld [vmem:[%s2907_s10] sm:$0xff] }
0x327a   :  { %v2262_v32 = vpop.eup %2261 }
0x327b   :  { %v1755_v33 = vmul.f32 %v2262_v32, %v1753_v29  ;;  %vm1760_vm1 = vweird.f32 %v2262_v32  ;;  %v1880_v29 = vld [vmem:[%s2907_s10 + $0x38] sm:$0xff] }
0x327c   :  { %vm1761_vm3 = vmor %vm1759_vm2, %vm1760_vm1  ;;  %vm1645_vm1 = vcmask 583168   ;;  %vm1650_vm2 = vcmask 517568  }
0x327d   :  { %v1756_v34 = vsub.f32 1.0, %v1755_v33  ;;  %v1878_v33 = vld [vmem:[%s2907_s10 + $0x28] sm:$0xff] }
0x327f   :  { %v1757_v35 = vmul.f32 %v2262_v32, %v1756_v34  ;;  %v1877_v34 = vld [vmem:[%s2907_s10 + $0x20] sm:$0xff] }
0x3281   :  { %v1758_v37 = vadd.f32 %v2262_v32, %v1757_v35  ;;  %v1876_v35 = vld [vmem:[%s2907_s10 + $0x18] sm:$0xff] }
0x3283   :  { %v1762_v16 = vsel %vm1761_vm3, %v2262_v32, %v1758_v37  ;;  %vm1720_vm3 = vcmask 714368   ;;  %v1879_v32 = vld [vmem:[%s2907_s10 + $0x30] sm:$0xff] }
0x3284   :  { %v1767_v22 = vsel %vm1764_vm0, %v1766_v38, %v1762_v16  ;;  %vm1722_vm0 = vcmask 386368   ;;  %v1875_v37 = vld [vmem:[%s2907_s10 + $0x10] sm:$0xff]  ;;  %v1917_v38 = vld [vmem:[%s2909_s12 + $0x18] sm:$0xff] }
0x3285   :  { %v1770_v4 = vmul.f32 %v1767_v22, %v1709_v21  ;;  %1937 = vmatpush.msra.mxu3 %v1917_v38 }
0x32ca   :  { %v1773_v39 = vpop.permute.xlu2 %1772 }
0x32cb   :  { %v1775_v15 = vmul.f32 %v1773_v39, %v1767_v22  ;;  %v1916_v39 = vld [vmem:[%s2909_s12 + $0x10] sm:$0xff] }
0x32cc   :  { %1938 = vmatpush.msra.mxu3 %v1916_v39 }
0x32cd   :  { %1777 = vrot.lane.b32.xlu0 %v1775_v15, %s2305_s3 }
0x333f   :  { %v1778_v41 = vpop.permute.xlu0 %1777 }
0x3340   :  { %v1780_v42 = vadd.f32 %v1778_v41, %v1770_v4  ;;  %v1915_v4 = vld [vmem:[%s2909_s12 + $0x8] sm:$0xff]  ;;  %v1914_v41 = vld [vmem:[%s2909_s12] sm:$0xff] }
0x3341   :  { %1939 = vmatpush.msra.mxu3 %v1915_v4 }
0x3342   :  { %2263 = vtanh.f32 %v1780_v42 }
0x3343   :  { %1940 = vmatpush.msra.mxu3 %v1914_v41 }
0x3348   :  { %v2264_v43 = vpop.eup %2263 }
0x3349   :  { %1783 = vrot.lane.b32.xlu1 %v2264_v43, %s2305_s3  ;;  %v1948_v43 = vld [vmem:[%s2911_s14 + $0x10] sm:$0xff] }
0x33bb   :  { %v1784_v44 = vpop.permute.xlu1 %1783 }
0x33bc   :  { %v1786_v45 = vmul.f32 %v1784_v44, %v1767_v22  ;;  %v2078_v44 = vld [vmem:[%s2908_s11] ss:$0 sm:$0xff] }
0x33be   :  { %1798 = vrot.lane.b32.xlu2 %v1786_v45, %s2306_s0 }
0x3418   :  { %v1799_v46 = vpop.permute.xlu2 %1798 }
0x3419   :  { %2058 = vmatmul.msk.f32.vlgmr.msra.gmra.mxu1 %vm93_vm6, %v1799_v46 }
0x3496   :  { %v1821_v49 = vpop.f32.mrf.mxu1 }
0x3497   :  { %v1822_v50 = vadd.f32 %v1821_v49, %v1800_v47  ;;  %v1947_v49 = vld [vmem:[%s2911_s14 + $0x8] sm:$0xff] }
0x3499   :  { %2265 = vtanh.f32 %v1822_v50  ;;  %v2059_v9 = vmul.f32 -1.442695, %v1822_v50  ;;  %v1946_v50 = vld [vmem:[%s2911_s14] sm:$0xff] }
0x349b   :  { %2267 = vpow2.f32 %v2059_v9 }
0x349f   :  { %v2266_v51 = vpop.eup %2265 }
0x34a0   :  { %1846 = vrot.lane.b32.xlu0 %v2266_v51, %s2304_s30  ;;  %v2079_v51 = vld [vmem:[%s2910_s13] ss:$0 sm:$0xff]  ;;  %s2311_s13 = smov [#allocation5]  }
0x34a1   :  { %v2268_v54 = vpop.eup %2267 }
0x34a2   :  { %v1827_v59 = vadd.f32 1.0, %v2268_v54 }
0x34a4   :  { %2269 = vrcp.f32 %v1827_v59  ;;  %v1839_v3 = vand.u32 2147483648, %v1827_v59  ;;  %vm1833_vm4 = vweird.f32 %v1827_v59  ;;  %v1837_v6 = vand.u32 2147483647, %v1827_v59 }
0x34a6   :  { %v1840_v10 = vor.u32 1.1754944e-38, %v1839_v3  ;;  %vm1838_vm5 = vcmp.eq.f32.partialorder %v1837_v6, 8.507059e+37 }
0x34a8   :  { %1357 = vrot.lane.b32.xlu0 %v2699_v5, %s2304_s30 }
0x34aa   :  { %v2270_v60 = vpop.eup %2269 }
0x34ab   :  { %v1829_v0 = vmul.f32 %v2270_v60, %v1827_v59  ;;  %vm1834_vm6 = vweird.f32 %v2270_v60 }
0x34ac   :  { %vm1835_vm9 = vmor %vm1833_vm4, %vm1834_vm6  ;;  %vm1791_vm6 = vcmask 845568   ;;  %vm1796_vm4 = vcmask 255168  }
0x34ad   :  { %v1830_v1 = vsub.f32 1.0, %v1829_v0 }
0x34af   :  { %v1831_v5 = vmul.f32 %v2270_v60, %v1830_v1 }
0x34b0   :  { %1501 = vrot.lane.b32.xlu0 %v2717_v61, %s2308_s9 }
0x34b1   :  { %v1832_v2 = vadd.f32 %v2270_v60, %v1831_v5 }
0x34b3   :  { %v1836_v8 = vsel %vm1835_vm9, %v2270_v60, %v1832_v2  ;;  %vm1865_vm9 = vcmask 976768   ;;  %v2080_v60 = vld [vmem:[%s2912_s15] ss:$0 sm:$0xff] }
0x34b4   :  { %v1841_v11 = vsel %vm1838_vm5, %v1840_v10, %v1836_v8  ;;  %vm1870_vm5 = vcmask 123968  }
0x34b5   :  { %v1844_v13 = vmul.f32 %v1841_v11, %v1780_v42  ;;  %v1949_v42 = vld [vmem:[%s2911_s14 + $0x18] sm:$0xff]  ;;  %s1998_s14 = sshll.u32 %s2311_s13, 4  ;;  %s1999_s14 = int_to_ptr.vmem [resolvable:$true] %s1998_s14 }
0x34b6   :  { %1969 = vmatpush.msra.mxu0 %v1949_v42 }
0x34b8   :  { %1642 = vrot.lane.b32.xlu0 %v2760_v58, %s2309_s29  ;;  %1970 = vmatpush.msra.mxu0 %v1948_v43 }
0x34ba   :  { %1971 = vmatpush.msra.mxu0 %v1947_v49 }
0x34bc   :  { %1972 = vmatpush.msra.mxu0 %v1946_v50 }
0x34c0   :  { %1788 = vrot.lane.b32.xlu0 %v1786_v45, %s2310_s1 }
0x3512   :  { %v1847_v53 = vpop.permute.xlu0 %1846 }
0x3513   :  { %v1849_v12 = vmul.f32 %v1847_v53, %v1841_v11 }
0x3515   :  { %1851 = vrot.lane.b32.xlu1 %v1849_v12, %s2305_s3 }
0x351a   :  { %v1358_v7 = vpop.permute.xlu0 %1357 }
0x351b   :  { %1361 = vst.msk [vmem:[#allocation4] sm:$0x3] %vm1360_vm7, %v1358_v7  ;;  %vm1977_vm7 = vcmask 33792  }
0x351d   :  { %1425 = vrot.lane.b32.xlu1 %v2708_v30, %s2307_s19 }
0x3522   :  { %v1502_v19 = vpop.permute.xlu0 %1501 }
0x3525   :  { %1570 = vrot.lane.b32.xlu1 %v2744_v26, %s2305_s3 }
0x352d   :  { %1647 = vrot.lane.b32.xlu1 %v2760_v58, %s2305_s3 }
0x3535   :  { %1793 = vrot.lane.b32.xlu1 %v1786_v45, %s2307_s19 }
0x3587   :  { %v1852_v14 = vpop.permute.xlu1 %1851 }
0x3588   :  { %v1854_v62 = vadd.f32 %v1852_v14, %v1844_v13 }
0x358a   :  { %2271 = vtanh.f32 %v1854_v62 }
0x358f   :  { %v1426_v17 = vpop.permute.xlu1 %1425 }
0x3590   :  { %v2272_v18 = vpop.eup %2271  ;;  %1429 = vst.msk [vmem:[#allocation4] sm:$0x3] %vm1428_vm10, %v1426_v17 }
0x3591   :  { %1857 = vrot.lane.b32.xlu2 %v2272_v18, %s2305_s3 }
0x3597   :  { %v1571_v36 = vpop.permute.xlu1 %1570 }
0x3599   :  { %1430 = vrot.lane.b32.xlu2 %v2708_v30, %s2310_s1  ;;  %v1643_v30 = vpop.permute.xlu0 %1642 }
0x359f   :  { %v1648_v21 = vpop.permute.xlu1 %1647 }
0x35a1   :  { %1575 = vrot.lane.b32.xlu2 %v2744_v26, %s2309_s29  ;;  %v1789_v24 = vpop.permute.xlu0 %1788 }
0x35a9   :  { %1717 = vrot.lane.b32.xlu2 %v2769_v25, %s2308_s9 }
0x35eb   :  { %v1858_v58 = vpop.permute.xlu2 %1857 }
0x35ec   :  { %v1860_v52 = vmul.f32 %v1858_v58, %v1841_v11 }
0x35ee   :  { %1867 = vrot.lane.b32.xlu0 %v1860_v52, %s2306_s0  ;;  %1862 = vrot.lane.b32.xlu2 %v1860_v52, %s2304_s30 }
0x35f3   :  { %v1431_v20 = vpop.permute.xlu2 %1430 }
0x35f4   :  { %1434 = vst.msk [vmem:[#allocation4] sm:$0x3] %vm1433_vm11, %v1431_v20 }
0x35f5   :  { %1499 = vst.msk [vmem:[#allocation4] sm:$0x3] %vm1498_vm12, %v2717_v61  ;;  %v1794_v61 = vpop.permute.xlu1 %1793 }
0x35f6   :  { %1505 = vst.msk [vmem:[#allocation4] sm:$0x3] %vm1504_vm13, %v1502_v19 }
0x35f7   :  { %1574 = vst.msk [vmem:[#allocation4] sm:$0x3] %vm1573_vm14, %v1571_v36 }
0x35fb   :  { %v1576_v26 = vpop.permute.xlu2 %1575 }
0x35fc   :  { %1579 = vst.msk [vmem:[#allocation4] sm:$0x3] %vm1578_vm15, %v1576_v26 }
0x35fd   :  { %1646 = vst.msk [vmem:[#allocation4] sm:$0x3] %vm1645_vm1, %v1643_v30 }
0x35fe   :  { %1651 = vst.msk [vmem:[#allocation4] sm:$0x3] %vm1650_vm2, %v1648_v21 }
0x3603   :  { %v1718_v23 = vpop.permute.xlu2 %1717 }
0x3604   :  { %1721 = vst.msk [vmem:[#allocation4] sm:$0x3] %vm1720_vm3, %v1718_v23 }
0x3605   :  { %1723 = vst.msk [vmem:[#allocation4] sm:$0x3] %vm1722_vm0, %v2769_v25  ;;  %v1885_v25 = vld [vmem:[%s2907_s10 + $0x60] sm:$0xff] }
0x3606   :  { %1792 = vst.msk [vmem:[#allocation4] sm:$0x3] %vm1791_vm6, %v1789_v24  ;;  %1896 = vmatpush.msrb.mxu2 %v1885_v25 }
0x3607   :  { %1797 = vst.msk [vmem:[#allocation4] sm:$0x3] %vm1796_vm4, %v1794_v61 }
0x3608   :  { %1897 = vmatpush.msrb.mxu2 %v1884_v40 }
0x360a   :  { %1898 = vmatpush.msrb.mxu2 %v1883_v63 }
0x360c   :  { %1899 = vmatpush.msrb.mxu2 %v1882_v48 }
0x360e   :  { %1900 = vmatpush.msrb.mxu2 %v1881_v55 }
0x3610   :  { %1901 = vmatpush.msrb.mxu2 %v1880_v29 }
0x3612   :  { %1902 = vmatpush.msrb.mxu2 %v1879_v32 }
0x3614   :  { %1903 = vmatpush.msrb.mxu2 %v1878_v33 }
0x3616   :  { %1904 = vmatpush.msrb.mxu2 %v1877_v34 }
0x3618   :  { %1905 = vmatpush.msrb.mxu2 %v1876_v35 }
0x361a   :  { %1906 = vmatpush.msrb.mxu2 %v1875_v37 }
0x361c   :  { %1907 = vmatpush.msrb.mxu2 %v1874_v28 }
0x361e   :  { %1908 = vmatpush.msrb.mxu2 %v1873_v57 }
0x3648   :  { %v1863_v16 = vpop.permute.xlu2 %1862 }
0x3649   :  { %1866 = vst.msk [vmem:[#allocation4] sm:$0x3] %vm1865_vm9, %v1863_v16 }
0x3660   :  { %v1868_v22 = vpop.permute.xlu0 %1867 }
0x3661   :  { %1871 = vst.msk [vmem:[#allocation4] sm:$0x3] %vm1870_vm5, %v1868_v22 }
0x3668   :  { %v1872_v15 = vld [vmem:[#allocation4] sm:$0x3] }
0x3669   :  { %1909 = vmatmul.f32.vlgmr.msrb.gmra.mxu2 %v1872_v15 }
0x36ec   :  { %v1910_v45 = vpop.f32.mrf.mxu2 }
0x36ed   :  { %v1911_v46 = vadd.f32 %v2078_v44, %v1910_v45 }
0x36ef   :  { %v1913_v47 = vmax.f32 %v1911_v46, 0.0 }
0x36f1   :  { %2060 = vmatmul.msk.f32.vlgmr.msra.gmra.mxu3 %vm665_vm8, %v1913_v47 }
0x3774   :  { %v1942_v9 = vpop.f32.mrf.mxu3 }
0x3775   :  { %v1943_v54 = vadd.f32 %v2079_v51, %v1942_v9 }
0x3777   :  { %v1945_v59 = vmax.f32 %v1943_v54, 0.0 }
0x3779   :  { %2061 = vmatmul.msk.f32.vlgmr.msra.gmra.mxu0 %vm665_vm8, %v1945_v59 }
0x37f6   :  { %v1974_v0 = vpop.f32.mrf.mxu0 }
0x37f7   :  { %v1975_v1 = vadd.f32 %v2080_v60, %v1974_v0 }
0x37f9   :  { %v1978_v5 = vsel %vm1977_vm7, %v1975_v1, -inf }
0x37fa   :  { %1979 = vmax.xlane.f32.xlu1 %v1978_v5 }
0x386d   :  { %v1980_v2 = vpop.xlane.xlu1 %1979 }
0x386e   :  { %v1981_v3 = vsub.f32 %v1975_v1, %v1980_v2 }
0x3870   :  { %v1982_v6 = vmul.f32 1.442695, %v1981_v3 }
0x3872   :  { %2273 = vpow2.f32 %v1982_v6 }
0x3878   :  { %v2274_v8 = vpop.eup %2273 }
0x3879   :  { %v1984_v10 = vsel %vm1977_vm7, %v2274_v8, 0.0 }
0x387a   :  { %1985 = vadd.xlane.f32.xlu2 %v1984_v10 }
0x38ed   :  { %v1986_v53 = vpop.xlane.xlu2 %1985 }
0x38ee   :  { %2275 = vrcp.f32 %v1986_v53 }
0x38f4   :  { %v2276_v11 = vpop.eup %2275 }
0x38f5   :  { %v1988_v12 = vmul.f32 %v2276_v11, %v1986_v53 }
0x38f7   :  { %v1989_v7 = vsub.f32 2.0, %v1988_v12 }
0x38f9   :  { %v1990_v13 = vmul.f32 %v2276_v11, %v1989_v7 }
0x38fb   :  { %v1991_v14 = vmul.f32 %v2274_v8, %v1990_v13 }
0x38fd   :  { %1992 = vst.msk [vmem:[#allocation5] sm:$0x3] %vm1977_vm7, %v1991_v14 }
0x38fe   :  { %2003 = dma.vmem_to_hbm [thread:$0]  %s1999_s14, 32, %s2001_s2, [#allocation6]  }
0x38ff   :  { %2301 = dma.done.wait [#allocation6], 32  }
0x3900   :  { %2302 = vsyncadd [#allocation6], 4294967264 }
0x3901   :  { %2008 = vsyncpa [#allocation6], 1 }

</bundles_post_ra>
